<compile_context>
chip_gen: v7x
topology: tpu7x:2x2x1
jax: 0.10.0
libtpu: 0.0.40
codegen_flags: <defaults>
</compile_context>

<pallas_src>
import functools

import jax
import jax.numpy as jnp
from jax.experimental import pallas as pl
from jax.experimental.pallas import tpu as pltpu

COUT_PAD = 128        # lane-padded conv output channels
CONV3_CHANNELS = 30   # real channel count entering the flatten / fc1


def _round_up(x, m):
    return -(-x // m) * m


# ----------------------------------------------------------------------------
# Pallas kernels
# ----------------------------------------------------------------------------
def _conv_pool_kernel(x_ref, w_ref, b_ref, o_ref):
    """Fused 5x5 conv (K-packed taps) + 2x2 maxpool + bias + ReLU.

    x_ref: (1, 4, tq, Kp)  im2col rows for the 4 pool phases of tq pooled pixels.
    w_ref: (Kp, 128)       packed taps (rows = (ky,kx,cin), zero padded).
    b_ref: (1, 128)        bias (zero padded).
    o_ref: (1, tq, 128)    pooled + activated output rows.
    Pool-then-bias/ReLU == ReLU(conv)+pool since ReLU(x+b) is monotone in x.
    """
    w = w_ref[...]
    a0 = jnp.dot(x_ref[0, 0], w, preferred_element_type=jnp.float32)
    a1 = jnp.dot(x_ref[0, 1], w, preferred_element_type=jnp.float32)
    a2 = jnp.dot(x_ref[0, 2], w, preferred_element_type=jnp.float32)
    a3 = jnp.dot(x_ref[0, 3], w, preferred_element_type=jnp.float32)
    m = jnp.maximum(jnp.maximum(a0, a1), jnp.maximum(a2, a3))
    o_ref[0] = jnp.maximum(m + b_ref[...], 0.0)


def _fc_fused_kernel(x_ref, w1_ref, b1_ref, w2_ref, b2_ref, w3_ref, b3_ref,
                     o_ref, h2_acc):
    """fc1+ReLU -> fc2 (streamed over the shared 1024 axis) -> +ReLU -> fc3."""
    @pl.when(pl.program_id(0) == 0)
    def _():
        h2_acc[...] = jnp.zeros_like(h2_acc)

    h1 = jnp.dot(x_ref[...], w1_ref[...], preferred_element_type=jnp.float32)
    h1 = jnp.maximum(h1 + b1_ref[...], 0.0)
    h2_acc[...] += jnp.dot(h1, w2_ref[...], preferred_element_type=jnp.float32)

    @pl.when(pl.program_id(0) == pl.num_programs(0) - 1)
    def _():
        h2 = jnp.maximum(h2_acc[...] + b2_ref[...], 0.0)
        y = jnp.dot(h2, w3_ref[...], preferred_element_type=jnp.float32)
        o_ref[...] = y + b3_ref[...]


# ----------------------------------------------------------------------------
# Pallas wrappers
# ----------------------------------------------------------------------------
def conv5x5_relu_pool(xcol, w, b, *, tile_q=128):
    """Fused conv(5x5, pad 2) + bias + ReLU + 2x2 maxpool on packed input.

    xcol: (B, 4, Q, Kp) pool-phase-major im2col rows (Q = Ho*Wo pooled pixels).
    Returns (B, Q, 128) pooled activations (lane-padded channels).
    """
    B, _, Q, Kp = xcol.shape
    tq = min(Q, tile_q)
    assert Q % tq == 0 and tq % 8 == 0 and Kp % 128 == 0
    grid = (B, Q // tq)
    return pl.pallas_call(
        _conv_pool_kernel,
        out_shape=jax.ShapeDtypeStruct((B, Q, COUT_PAD), jnp.float32),
        grid=grid,
        in_specs=[
            pl.BlockSpec((1, 4, tq, Kp), lambda bi, ti: (bi, 0, ti, 0)),
            pl.BlockSpec((Kp, COUT_PAD), lambda bi, ti: (0, 0)),
            pl.BlockSpec((1, COUT_PAD), lambda bi, ti: (0, 0)),
        ],
        out_specs=pl.BlockSpec((1, tq, COUT_PAD), lambda bi, ti: (bi, ti, 0)),
        compiler_params=pltpu.CompilerParams(
            dimension_semantics=("parallel", "parallel"),
            vmem_limit_bytes=32 * 1024 * 1024),
    )(xcol, w, b)


def fc_fused(feat, w1, b1, w2, b2, w3, b3, *, tile_n=256):
    """relu(relu(feat @ w1 + b1) @ w2 + b2) @ w3 + b3; fc1/fc2 weights streamed."""
    M, K1 = feat.shape
    N1, N2, N3 = w1.shape[1], w2.shape[1], w3.shape[1]
    assert N1 % tile_n == 0
    return pl.pallas_call(
        _fc_fused_kernel,
        out_shape=jax.ShapeDtypeStruct((M, N3), jnp.float32),
        grid=(N1 // tile_n,),
        in_specs=[
            pl.BlockSpec((M, K1), lambda i: (0, 0)),
            pl.BlockSpec((K1, tile_n), lambda i: (0, i)),
            pl.BlockSpec((1, tile_n), lambda i: (0, i)),
            pl.BlockSpec((tile_n, N2), lambda i: (i, 0)),
            pl.BlockSpec((1, N2), lambda i: (0, 0)),
            pl.BlockSpec((N2, N3), lambda i: (0, 0)),
            pl.BlockSpec((1, N3), lambda i: (0, 0)),
        ],
        out_specs=pl.BlockSpec((M, N3), lambda i: (0, 0)),
        scratch_shapes=[pltpu.VMEM((M, N2), jnp.float32)],
        compiler_params=pltpu.CompilerParams(
            dimension_semantics=("arbitrary",),
            vmem_limit_bytes=32 * 1024 * 1024),
    )(feat, w1, b1, w2, b2, w3, b3)


# ----------------------------------------------------------------------------
# XLA layout glue: K-packed, pool-phase-major im2col
# ----------------------------------------------------------------------------
def _im2col_pool_phases(x, cin):
    """x: (B,H,W,C>=cin) NHWC -> (B, 4, Ho*Wo, Kp) with K = 25*cin (zero padded).

    Column order matches the packed taps: (ky, kx, cin).  Rows of each phase p
    (p = (dy,dx) of the 2x2 pool window) are ordered (yo, xo), so pooling in the
    kernel is a max over 4 contiguous row blocks.
    """
    B, H, W, _ = x.shape
    xp = jnp.pad(x[..., :cin], ((0, 0), (2, 2), (2, 2), (0, 0)))
    cols = [xp[:, ky:ky + H, kx:kx + W, :] for ky in range(5) for kx in range(5)]
    xcol = jnp.concatenate(cols, axis=-1)                    # (B, H, W, 25*cin)
    phases = jnp.stack([xcol[:, 0::2, 0::2], xcol[:, 0::2, 1::2],
                        xcol[:, 1::2, 0::2], xcol[:, 1::2, 1::2]], axis=1)
    K = 25 * cin
    Kp = _round_up(K, 128)
    phases = jnp.pad(phases, ((0, 0), (0, 0), (0, 0), (0, 0), (0, Kp - K)))
    return phases.reshape(B, 4, (H // 2) * (W // 2), Kp)


# ----------------------------------------------------------------------------
# Model: parameters + forward
# ----------------------------------------------------------------------------
def init_params(key, flatten_dim):
    """PyTorch-layout params, U(-1/sqrt(fan_in), 1/sqrt(fan_in)) init."""
    ks = jax.random.split(key, 12)

    def conv_init(kw, kb, cout, cin, k):
        bound = 1.0 / (cin * k * k) ** 0.5
        w = jax.random.uniform(kw, (cout, cin, k, k), jnp.float32, -bound, bound)
        b = jax.random.uniform(kb, (cout,), jnp.float32, -bound, bound)
        return w, b

    def fc_init(kw, kb, fin, fout):
        bound = 1.0 / fin ** 0.5
        w = jax.random.uniform(kw, (fout, fin), jnp.float32, -bound, bound)
        b = jax.random.uniform(kb, (fout,), jnp.float32, -bound, bound)
        return w, b

    p = {}
    p["conv1_w"], p["conv1_b"] = conv_init(ks[0], ks[1], 10, 3, 5)
    p["conv2_w"], p["conv2_b"] = conv_init(ks[2], ks[3], 20, 10, 5)
    p["conv3_w"], p["conv3_b"] = conv_init(ks[4], ks[5], 30, 20, 5)
    # fc1 is lazily sized in PyTorch; resolved statically here from input shape.
    p["fc1_w"], p["fc1_b"] = fc_init(ks[6], ks[7], flatten_dim, 1024)
    p["fc2_w"], p["fc2_b"] = fc_init(ks[8], ks[9], 1024, 256)
    p["fc3_w"], p["fc3_b"] = fc_init(ks[10], ks[11], 256, 500)
    return p


def prepare_kernel_params(params, h3, w3, c3):
    """One-time conversion of PyTorch-layout params into kernel-ready tensors."""
    kp = {}
    for i, cin in ((1, 3), (2, 10), (3, 20)):
        w, b = params[f"conv{i}_w"], params[f"conv{i}_b"]
        cout = w.shape[0]
        K = 25 * cin
        Kp = _round_up(K, 128)
        # rows ordered (ky, kx, cin) to match the im2col column packing.
        wm = jnp.transpose(w, (2, 3, 1, 0)).reshape(K, cout)
        kp[f"conv{i}_w"] = jnp.pad(wm, ((0, Kp - K), (0, COUT_PAD - cout)))
        kp[f"conv{i}_b"] = jnp.pad(b, (0, COUT_PAD - cout)).reshape(1, COUT_PAD)

    k1 = c3 * h3 * w3
    k1p = _round_up(k1, 128)
    # fc1 consumes the NHWC-flattened conv3 features: permute the torch
    # (out, c*h*w) columns into (h*w*c) order once, transpose, pad K to 128x.
    w1 = params["fc1_w"].reshape(-1, c3, h3, w3).transpose(0, 2, 3, 1).reshape(-1, k1)
    kp["fc1_w"] = jnp.pad(w1.T, ((0, k1p - k1), (0, 0)))
    kp["fc1_b"] = params["fc1_b"].reshape(1, -1)
    kp["fc2_w"] = params["fc2_w"].T
    kp["fc2_b"] = params["fc2_b"].reshape(1, -1)
    n3 = params["fc3_w"].shape[0]
    n3p = _round_up(n3, 128)
    kp["fc3_w"] = jnp.pad(params["fc3_w"].T, ((0, 0), (0, n3p - n3)))
    kp["fc3_b"] = jnp.pad(params["fc3_b"], (0, n3p - n3)).reshape(1, n3p)
    return kp


@jax.jit
def widerface_forward(x_nchw, kp):
    # x_nchw: (B, 3, H, W) float32 (PyTorch convention).
    B = x_nchw.shape[0]
    x = jnp.transpose(x_nchw, (0, 2, 3, 1))                      # -> NHWC
    H, W = x.shape[1], x.shape[2]

    for i, cin in ((1, 3), (2, 10), (3, 20)):
        xcol = _im2col_pool_phases(x, cin)                       # packing glue
        y = conv5x5_relu_pool(xcol, kp[f"conv{i}_w"], kp[f"conv{i}_b"])
        H, W = H // 2, W // 2
        x = y.reshape(B, H, W, COUT_PAD)

    # NHWC flatten of the real conv3 channels (fc1 weights were permuted to match).
    feat = x[..., :CONV3_CHANNELS].reshape(B, -1)
    k1p = kp["fc1_w"].shape[0]
    mb = max(8, _round_up(B, 8))
    feat = jnp.pad(feat, ((0, mb - B), (0, k1p - feat.shape[1])))

    y = fc_fused(feat, kp["fc1_w"], kp["fc1_b"], kp["fc2_w"], kp["fc2_b"],
                 kp["fc3_w"], kp["fc3_b"])
    y = y[:B, :500].reshape(B, 100, 5)
    pred_boxes = y[:, :, :4]   # (B, 100, 4)
    conf_scores = y[:, :, 4]   # (B, 100)
    return pred_boxes, conf_scores


# ----------------------------------------------------------------------------
# Pure-XLA reference (numerical sanity check)
# ----------------------------------------------------------------------------
def reference_forward(x_nchw, params):
    x = jnp.transpose(x_nchw, (0, 2, 3, 1))

    def conv(x, w, b):
        y = jax.lax.conv_general_dilated(
            x, jnp.transpose(w, (2, 3, 1, 0)), (1, 1), ((2, 2), (2, 2)),
            dimension_numbers=("NHWC", "HWIO", "NHWC"),
            precision=jax.lax.Precision.HIGHEST)
        return jax.nn.relu(y + b)

    def pool(x):
        return jax.lax.reduce_window(x, -jnp.inf, jax.lax.max,
                                     (1, 2, 2, 1), (1, 2, 2, 1), "VALID")

    x = pool(conv(x, params["conv1_w"], params["conv1_b"]))
    x = pool(conv(x, params["conv2_w"], params["conv2_b"]))
    x = pool(conv(x, params["conv3_w"], params["conv3_b"]))
    B = x.shape[0]
    x = jnp.transpose(x, (0, 3, 1, 2)).reshape(B, -1)     # NCHW flatten
    x = jax.nn.relu(x @ params["fc1_w"].T + params["fc1_b"])
    x = jax.nn.relu(x @ params["fc2_w"].T + params["fc2_b"])
    x = x @ params["fc3_w"].T + params["fc3_b"]
    x = x.reshape(B, 100, 5)
    return x[:, :, :4], x[:, :, 4]


if __name__ == "__main__":
    key = jax.random.PRNGKey(0)
    pkey, xkey = jax.random.split(key)

    B, C, H, W = 2, 3, 32, 32
    x = jax.random.normal(xkey, (B, C, H, W), dtype=jnp.float32)

    h3, w3, c3 = H // 8, W // 8, CONV3_CHANNELS
    flatten_dim = c3 * h3 * w3                 # 480 (matches torch's lazy fc1)
    params = init_params(pkey, flatten_dim)
    kparams = prepare_kernel_params(params, h3, w3, c3)   # one-time weight prep

    pred_boxes, conf_scores = widerface_forward(x, kparams)
    jax.block_until_ready((pred_boxes, conf_scores))

    assert pred_boxes.shape == (B, 100, 4), pred_boxes.shape
    assert conf_scores.shape == (B, 100), conf_scores.shape
    assert pred_boxes.dtype == jnp.float32 and conf_scores.dtype == jnp.float32

    # Numerical sanity check against a pure-XLA reference of the same network.
    ref_boxes, ref_scores = reference_forward(x, params)
    assert jnp.allclose(pred_boxes, ref_boxes, rtol=2e-2, atol=2e-2), (
        float(jnp.max(jnp.abs(pred_boxes - ref_boxes))))
    assert jnp.allclose(conf_scores, ref_scores, rtol=2e-2, atol=2e-2), (
        float(jnp.max(jnp.abs(conf_scores - ref_scores))))

    print("KERNEL_OK")
</pallas_src>

<mosaic_0001>
module attributes {stable_mosaic.version = 11 : i64} {
  func.func @_conv_pool_kernel(%arg0: i32, %arg1: i32, %arg2: memref<1x4x128x128xf32, #tpu.memory_space<vmem>>, %arg3: memref<128x128xf32, #tpu.memory_space<vmem>>, %arg4: memref<1x128xf32, #tpu.memory_space<vmem>>, %arg5: memref<1x128x128xf32, #tpu.memory_space<vmem>>) attributes {dimension_semantics = [#tpu.dimension_semantics<parallel>, #tpu.dimension_semantics<parallel>], iteration_bounds = array<i64: 2, 2>, scalar_prefetch = 0 : i64, scratch_operands = 0 : i64, tpu.core_type = #tpu.core_type<tc>, window_params = [{transform_indices = @transform_0, window_bounds = array<i64: 1, 4, 128, 128>}, {pipeline_mode = #tpu.pipeline_mode<synchronous>, transform_indices = @transform_1, window_bounds = array<i64: 128, 128>}, {pipeline_mode = #tpu.pipeline_mode<synchronous>, transform_indices = @transform_2, window_bounds = array<i64: 1, 128>}, {transform_indices = @transform_3, window_bounds = array<i64: 1, 128, 128>}]} {
    %c0 = arith.constant 0 : index
    %c0_0 = arith.constant 0 : index
    %0 = vector.load %arg3[%c0, %c0_0] : memref<128x128xf32, #tpu.memory_space<vmem>>, vector<128x128xf32>
    %c0_1 = arith.constant 0 : index
    %c0_2 = arith.constant 0 : index
    %c0_3 = arith.constant 0 : index
    %c0_4 = arith.constant 0 : index
    %1 = vector.load %arg2[%c0_1, %c0_2, %c0_3, %c0_4] : memref<1x4x128x128xf32, #tpu.memory_space<vmem>>, vector<1x1x128x128xf32>
    %2 = vector.shape_cast %1 : vector<1x1x128x128xf32> to vector<128x128xf32>
    %cst = arith.constant dense<0.000000e+00> : vector<128x128xf32>
    %3 = tpu.matmul %2, %0, %cst {dimension_numbers = #tpu.dot_dimension_numbers<[1], [0], [0], [1], [0, 0, 1, 1], [], []>} : vector<128x128xf32>, vector<128x128xf32>, vector<128x128xf32> -> vector<128x128xf32>
    %c0_5 = arith.constant 0 : index
    %c1 = arith.constant 1 : index
    %c0_6 = arith.constant 0 : index
    %c0_7 = arith.constant 0 : index
    %4 = vector.load %arg2[%c0_5, %c1, %c0_6, %c0_7] : memref<1x4x128x128xf32, #tpu.memory_space<vmem>>, vector<1x1x128x128xf32>
    %5 = vector.shape_cast %4 : vector<1x1x128x128xf32> to vector<128x128xf32>
    %cst_8 = arith.constant dense<0.000000e+00> : vector<128x128xf32>
    %6 = tpu.matmul %5, %0, %cst_8 {dimension_numbers = #tpu.dot_dimension_numbers<[1], [0], [0], [1], [0, 0, 1, 1], [], []>} : vector<128x128xf32>, vector<128x128xf32>, vector<128x128xf32> -> vector<128x128xf32>
    %c0_9 = arith.constant 0 : index
    %c2 = arith.constant 2 : index
    %c0_10 = arith.constant 0 : index
    %c0_11 = arith.constant 0 : index
    %7 = vector.load %arg2[%c0_9, %c2, %c0_10, %c0_11] : memref<1x4x128x128xf32, #tpu.memory_space<vmem>>, vector<1x1x128x128xf32>
    %8 = vector.shape_cast %7 : vector<1x1x128x128xf32> to vector<128x128xf32>
    %cst_12 = arith.constant dense<0.000000e+00> : vector<128x128xf32>
    %9 = tpu.matmul %8, %0, %cst_12 {dimension_numbers = #tpu.dot_dimension_numbers<[1], [0], [0], [1], [0, 0, 1, 1], [], []>} : vector<128x128xf32>, vector<128x128xf32>, vector<128x128xf32> -> vector<128x128xf32>
    %c0_13 = arith.constant 0 : index
    %c3 = arith.constant 3 : index
    %c0_14 = arith.constant 0 : index
    %c0_15 = arith.constant 0 : index
    %10 = vector.load %arg2[%c0_13, %c3, %c0_14, %c0_15] : memref<1x4x128x128xf32, #tpu.memory_space<vmem>>, vector<1x1x128x128xf32>
    %11 = vector.shape_cast %10 : vector<1x1x128x128xf32> to vector<128x128xf32>
    %cst_16 = arith.constant dense<0.000000e+00> : vector<128x128xf32>
    %12 = tpu.matmul %11, %0, %cst_16 {dimension_numbers = #tpu.dot_dimension_numbers<[1], [0], [0], [1], [0, 0, 1, 1], [], []>} : vector<128x128xf32>, vector<128x128xf32>, vector<128x128xf32> -> vector<128x128xf32>
    %13 = arith.maximumf %3, %6 : vector<128x128xf32>
    %14 = arith.maximumf %9, %12 : vector<128x128xf32>
    %15 = arith.maximumf %13, %14 : vector<128x128xf32>
    %c0_17 = arith.constant 0 : index
    %c0_18 = arith.constant 0 : index
    %16 = vector.load %arg4[%c0_17, %c0_18] : memref<1x128xf32, #tpu.memory_space<vmem>>, vector<1x128xf32>
    %17 = vector.broadcast %16 : vector<1x128xf32> to vector<128x128xf32>
    %18 = arith.addf %15, %17 : vector<128x128xf32>
    %cst_19 = arith.constant 0.000000e+00 : f32
    %19 = vector.broadcast %cst_19 : f32 to vector<128x128xf32>
    %20 = arith.maximumf %18, %19 : vector<128x128xf32>
    %c0_20 = arith.constant 0 : index
    %c0_21 = arith.constant 0 : index
    %c0_22 = arith.constant 0 : index
    %21 = vector.load %arg5[%c0_20, %c0_21, %c0_22] : memref<1x128x128xf32, #tpu.memory_space<vmem>>, vector<1x128x128xf32>
    %22 = vector.shape_cast %21 : vector<1x128x128xf32> to vector<128x128xf32>
    %23 = vector.shape_cast %20 : vector<128x128xf32> to vector<1x128x128xf32>
    tpu.vector_store %arg5[%c0_20, %c0_21, %c0_22], %23 {strides = array<i32>} : memref<1x128x128xf32, #tpu.memory_space<vmem>>, vector<1x128x128xf32>,
    return
  }
  func.func @transform_0(%arg0: i32, %arg1: i32) -> (i32, i32, i32, i32) {
    %c0_i32 = arith.constant 0 : i32
    %c0_i32_0 = arith.constant 0 : i32
    %c0_i32_1 = arith.constant 0 : i32
    return %arg0, %c0_i32, %arg1, %c0_i32_0 : i32, i32, i32, i32
  }
  func.func @transform_1(%arg0: i32, %arg1: i32) -> (i32, i32) {
    %c0_i32 = arith.constant 0 : i32
    %c0_i32_0 = arith.constant 0 : i32
    %c0_i32_1 = arith.constant 0 : i32
    return %c0_i32, %c0_i32_0 : i32, i32
  }
  func.func @transform_2(%arg0: i32, %arg1: i32) -> (i32, i32) {
    %c0_i32 = arith.constant 0 : i32
    %c0_i32_0 = arith.constant 0 : i32
    %c0_i32_1 = arith.constant 0 : i32
    return %c0_i32, %c0_i32_0 : i32, i32
  }
  func.func @transform_3(%arg0: i32, %arg1: i32) -> (i32, i32, i32) {
    %c0_i32 = arith.constant 0 : i32
    %c0_i32_0 = arith.constant 0 : i32
    return %arg0, %arg1, %c0_i32 : i32, i32, i32
  }
}

module attributes {stable_mosaic.version = 11 : i64} {
  func.func @_conv_pool_kernel(%arg0: i32, %arg1: i32, %arg2: memref<1x4x64x256xf32, #tpu.memory_space<vmem>>, %arg3: memref<256x128xf32, #tpu.memory_space<vmem>>, %arg4: memref<1x128xf32, #tpu.memory_space<vmem>>, %arg5: memref<1x64x128xf32, #tpu.memory_space<vmem>>) attributes {dimension_semantics = [#tpu.dimension_semantics<parallel>, #tpu.dimension_semantics<parallel>], iteration_bounds = array<i64: 2, 1>, scalar_prefetch = 0 : i64, scratch_operands = 0 : i64, tpu.core_type = #tpu.core_type<tc>, window_params = [{transform_indices = @transform_0, window_bounds = array<i64: 1, 4, 64, 256>}, {pipeline_mode = #tpu.pipeline_mode<synchronous>, transform_indices = @transform_1, window_bounds = array<i64: 256, 128>}, {pipeline_mode = #tpu.pipeline_mode<synchronous>, transform_indices = @transform_2, window_bounds = array<i64: 1, 128>}, {transform_indices = @transform_3, window_bounds = array<i64: 1, 64, 128>}]} {
    %c0 = arith.constant 0 : index
    %c0_0 = arith.constant 0 : index
    %0 = vector.load %arg3[%c0, %c0_0] : memref<256x128xf32, #tpu.memory_space<vmem>>, vector<256x128xf32>
    %c0_1 = arith.constant 0 : index
    %c0_2 = arith.constant 0 : index
    %c0_3 = arith.constant 0 : index
    %c0_4 = arith.constant 0 : index
    %1 = vector.load %arg2[%c0_1, %c0_2, %c0_3, %c0_4] : memref<1x4x64x256xf32, #tpu.memory_space<vmem>>, vector<1x1x64x256xf32>
    %2 = vector.shape_cast %1 : vector<1x1x64x256xf32> to vector<64x256xf32>
    %cst = arith.constant dense<0.000000e+00> : vector<64x128xf32>
    %3 = tpu.matmul %2, %0, %cst {dimension_numbers = #tpu.dot_dimension_numbers<[1], [0], [0], [1], [0, 0, 1, 1], [], []>} : vector<64x256xf32>, vector<256x128xf32>, vector<64x128xf32> -> vector<64x128xf32>
    %c0_5 = arith.constant 0 : index
    %c1 = arith.constant 1 : index
    %c0_6 = arith.constant 0 : index
    %c0_7 = arith.constant 0 : index
    %4 = vector.load %arg2[%c0_5, %c1, %c0_6, %c0_7] : memref<1x4x64x256xf32, #tpu.memory_space<vmem>>, vector<1x1x64x256xf32>
    %5 = vector.shape_cast %4 : vector<1x1x64x256xf32> to vector<64x256xf32>
    %cst_8 = arith.constant dense<0.000000e+00> : vector<64x128xf32>
    %6 = tpu.matmul %5, %0, %cst_8 {dimension_numbers = #tpu.dot_dimension_numbers<[1], [0], [0], [1], [0, 0, 1, 1], [], []>} : vector<64x256xf32>, vector<256x128xf32>, vector<64x128xf32> -> vector<64x128xf32>
    %c0_9 = arith.constant 0 : index
    %c2 = arith.constant 2 : index
    %c0_10 = arith.constant 0 : index
    %c0_11 = arith.constant 0 : index
    %7 = vector.load %arg2[%c0_9, %c2, %c0_10, %c0_11] : memref<1x4x64x256xf32, #tpu.memory_space<vmem>>, vector<1x1x64x256xf32>
    %8 = vector.shape_cast %7 : vector<1x1x64x256xf32> to vector<64x256xf32>
    %cst_12 = arith.constant dense<0.000000e+00> : vector<64x128xf32>
    %9 = tpu.matmul %8, %0, %cst_12 {dimension_numbers = #tpu.dot_dimension_numbers<[1], [0], [0], [1], [0, 0, 1, 1], [], []>} : vector<64x256xf32>, vector<256x128xf32>, vector<64x128xf32> -> vector<64x128xf32>
    %c0_13 = arith.constant 0 : index
    %c3 = arith.constant 3 : index
    %c0_14 = arith.constant 0 : index
    %c0_15 = arith.constant 0 : index
    %10 = vector.load %arg2[%c0_13, %c3, %c0_14, %c0_15] : memref<1x4x64x256xf32, #tpu.memory_space<vmem>>, vector<1x1x64x256xf32>
    %11 = vector.shape_cast %10 : vector<1x1x64x256xf32> to vector<64x256xf32>
    %cst_16 = arith.constant dense<0.000000e+00> : vector<64x128xf32>
    %12 = tpu.matmul %11, %0, %cst_16 {dimension_numbers = #tpu.dot_dimension_numbers<[1], [0], [0], [1], [0, 0, 1, 1], [], []>} : vector<64x256xf32>, vector<256x128xf32>, vector<64x128xf32> -> vector<64x128xf32>
    %13 = arith.maximumf %3, %6 : vector<64x128xf32>
    %14 = arith.maximumf %9, %12 : vector<64x128xf32>
    %15 = arith.maximumf %13, %14 : vector<64x128xf32>
    %c0_17 = arith.constant 0 : index
    %c0_18 = arith.constant 0 : index
    %16 = vector.load %arg4[%c0_17, %c0_18] : memref<1x128xf32, #tpu.memory_space<vmem>>, vector<1x128xf32>
    %17 = vector.broadcast %16 : vector<1x128xf32> to vector<64x128xf32>
    %18 = arith.addf %15, %17 : vector<64x128xf32>
    %cst_19 = arith.constant 0.000000e+00 : f32
    %19 = vector.broadcast %cst_19 : f32 to vector<64x128xf32>
    %20 = arith.maximumf %18, %19 : vector<64x128xf32>
    %c0_20 = arith.constant 0 : index
    %c0_21 = arith.constant 0 : index
    %c0_22 = arith.constant 0 : index
    %21 = vector.load %arg5[%c0_20, %c0_21, %c0_22] : memref<1x64x128xf32, #tpu.memory_space<vmem>>, vector<1x64x128xf32>
    %22 = vector.shape_cast %21 : vector<1x64x128xf32> to vector<64x128xf32>
    %23 = vector.shape_cast %20 : vector<64x128xf32> to vector<1x64x128xf32>
    tpu.vector_store %arg5[%c0_20, %c0_21, %c0_22], %23 {strides = array<i32>} : memref<1x64x128xf32, #tpu.memory_space<vmem>>, vector<1x64x128xf32>,
    return
  }
  func.func @transform_0(%arg0: i32, %arg1: i32) -> (i32, i32, i32, i32) {
    %c0_i32 = arith.constant 0 : i32
    %c0_i32_0 = arith.constant 0 : i32
    %c0_i32_1 = arith.constant 0 : i32
    return %arg0, %c0_i32, %arg1, %c0_i32_0 : i32, i32, i32, i32
  }
  func.func @transform_1(%arg0: i32, %arg1: i32) -> (i32, i32) {
    %c0_i32 = arith.constant 0 : i32
    %c0_i32_0 = arith.constant 0 : i32
    %c0_i32_1 = arith.constant 0 : i32
    return %c0_i32, %c0_i32_0 : i32, i32
  }
  func.func @transform_2(%arg0: i32, %arg1: i32) -> (i32, i32) {
    %c0_i32 = arith.constant 0 : i32
    %c0_i32_0 = arith.constant 0 : i32
    %c0_i32_1 = arith.constant 0 : i32
    return %c0_i32, %c0_i32_0 : i32, i32
  }
  func.func @transform_3(%arg0: i32, %arg1: i32) -> (i32, i32, i32) {
    %c0_i32 = arith.constant 0 : i32
    %c0_i32_0 = arith.constant 0 : i32
    return %arg0, %arg1, %c0_i32 : i32, i32, i32
  }
}

module attributes {stable_mosaic.version = 11 : i64} {
  func.func @_conv_pool_kernel(%arg0: i32, %arg1: i32, %arg2: memref<1x4x16x512xf32, #tpu.memory_space<vmem>>, %arg3: memref<512x128xf32, #tpu.memory_space<vmem>>, %arg4: memref<1x128xf32, #tpu.memory_space<vmem>>, %arg5: memref<1x16x128xf32, #tpu.memory_space<vmem>>) attributes {dimension_semantics = [#tpu.dimension_semantics<parallel>, #tpu.dimension_semantics<parallel>], iteration_bounds = array<i64: 2, 1>, scalar_prefetch = 0 : i64, scratch_operands = 0 : i64, tpu.core_type = #tpu.core_type<tc>, window_params = [{transform_indices = @transform_0, window_bounds = array<i64: 1, 4, 16, 512>}, {pipeline_mode = #tpu.pipeline_mode<synchronous>, transform_indices = @transform_1, window_bounds = array<i64: 512, 128>}, {pipeline_mode = #tpu.pipeline_mode<synchronous>, transform_indices = @transform_2, window_bounds = array<i64: 1, 128>}, {transform_indices = @transform_3, window_bounds = array<i64: 1, 16, 128>}]} {
    %c0 = arith.constant 0 : index
    %c0_0 = arith.constant 0 : index
    %0 = vector.load %arg3[%c0, %c0_0] : memref<512x128xf32, #tpu.memory_space<vmem>>, vector<512x128xf32>
    %c0_1 = arith.constant 0 : index
    %c0_2 = arith.constant 0 : index
    %c0_3 = arith.constant 0 : index
    %c0_4 = arith.constant 0 : index
    %1 = vector.load %arg2[%c0_1, %c0_2, %c0_3, %c0_4] : memref<1x4x16x512xf32, #tpu.memory_space<vmem>>, vector<1x1x16x512xf32>
    %2 = vector.shape_cast %1 : vector<1x1x16x512xf32> to vector<16x512xf32>
    %cst = arith.constant dense<0.000000e+00> : vector<16x128xf32>
    %3 = tpu.matmul %2, %0, %cst {dimension_numbers = #tpu.dot_dimension_numbers<[1], [0], [0], [1], [0, 0, 1, 1], [], []>} : vector<16x512xf32>, vector<512x128xf32>, vector<16x128xf32> -> vector<16x128xf32>
    %c0_5 = arith.constant 0 : index
    %c1 = arith.constant 1 : index
    %c0_6 = arith.constant 0 : index
    %c0_7 = arith.constant 0 : index
    %4 = vector.load %arg2[%c0_5, %c1, %c0_6, %c0_7] : memref<1x4x16x512xf32, #tpu.memory_space<vmem>>, vector<1x1x16x512xf32>
    %5 = vector.shape_cast %4 : vector<1x1x16x512xf32> to vector<16x512xf32>
    %cst_8 = arith.constant dense<0.000000e+00> : vector<16x128xf32>
    %6 = tpu.matmul %5, %0, %cst_8 {dimension_numbers = #tpu.dot_dimension_numbers<[1], [0], [0], [1], [0, 0, 1, 1], [], []>} : vector<16x512xf32>, vector<512x128xf32>, vector<16x128xf32> -> vector<16x128xf32>
    %c0_9 = arith.constant 0 : index
    %c2 = arith.constant 2 : index
    %c0_10 = arith.constant 0 : index
    %c0_11 = arith.constant 0 : index
    %7 = vector.load %arg2[%c0_9, %c2, %c0_10, %c0_11] : memref<1x4x16x512xf32, #tpu.memory_space<vmem>>, vector<1x1x16x512xf32>
    %8 = vector.shape_cast %7 : vector<1x1x16x512xf32> to vector<16x512xf32>
    %cst_12 = arith.constant dense<0.000000e+00> : vector<16x128xf32>
    %9 = tpu.matmul %8, %0, %cst_12 {dimension_numbers = #tpu.dot_dimension_numbers<[1], [0], [0], [1], [0, 0, 1, 1], [], []>} : vector<16x512xf32>, vector<512x128xf32>, vector<16x128xf32> -> vector<16x128xf32>
    %c0_13 = arith.constant 0 : index
    %c3 = arith.constant 3 : index
    %c0_14 = arith.constant 0 : index
    %c0_15 = arith.constant 0 : index
    %10 = vector.load %arg2[%c0_13, %c3, %c0_14, %c0_15] : memref<1x4x16x512xf32, #tpu.memory_space<vmem>>, vector<1x1x16x512xf32>
    %11 = vector.shape_cast %10 : vector<1x1x16x512xf32> to vector<16x512xf32>
    %cst_16 = arith.constant dense<0.000000e+00> : vector<16x128xf32>
    %12 = tpu.matmul %11, %0, %cst_16 {dimension_numbers = #tpu.dot_dimension_numbers<[1], [0], [0], [1], [0, 0, 1, 1], [], []>} : vector<16x512xf32>, vector<512x128xf32>, vector<16x128xf32> -> vector<16x128xf32>
    %13 = arith.maximumf %3, %6 : vector<16x128xf32>
    %14 = arith.maximumf %9, %12 : vector<16x128xf32>
    %15 = arith.maximumf %13, %14 : vector<16x128xf32>
    %c0_17 = arith.constant 0 : index
    %c0_18 = arith.constant 0 : index
    %16 = vector.load %arg4[%c0_17, %c0_18] : memref<1x128xf32, #tpu.memory_space<vmem>>, vector<1x128xf32>
    %17 = vector.broadcast %16 : vector<1x128xf32> to vector<16x128xf32>
    %18 = arith.addf %15, %17 : vector<16x128xf32>
    %cst_19 = arith.constant 0.000000e+00 : f32
    %19 = vector.broadcast %cst_19 : f32 to vector<16x128xf32>
    %20 = arith.maximumf %18, %19 : vector<16x128xf32>
    %c0_20 = arith.constant 0 : index
    %c0_21 = arith.constant 0 : index
    %c0_22 = arith.constant 0 : index
    %21 = vector.load %arg5[%c0_20, %c0_21, %c0_22] : memref<1x16x128xf32, #tpu.memory_space<vmem>>, vector<1x16x128xf32>
    %22 = vector.shape_cast %21 : vector<1x16x128xf32> to vector<16x128xf32>
    %23 = vector.shape_cast %20 : vector<16x128xf32> to vector<1x16x128xf32>
    tpu.vector_store %arg5[%c0_20, %c0_21, %c0_22], %23 {strides = array<i32>} : memref<1x16x128xf32, #tpu.memory_space<vmem>>, vector<1x16x128xf32>,
    return
  }
  func.func @transform_0(%arg0: i32, %arg1: i32) -> (i32, i32, i32, i32) {
    %c0_i32 = arith.constant 0 : i32
    %c0_i32_0 = arith.constant 0 : i32
    %c0_i32_1 = arith.constant 0 : i32
    return %arg0, %c0_i32, %arg1, %c0_i32_0 : i32, i32, i32, i32
  }
  func.func @transform_1(%arg0: i32, %arg1: i32) -> (i32, i32) {
    %c0_i32 = arith.constant 0 : i32
    %c0_i32_0 = arith.constant 0 : i32
    %c0_i32_1 = arith.constant 0 : i32
    return %c0_i32, %c0_i32_0 : i32, i32
  }
  func.func @transform_2(%arg0: i32, %arg1: i32) -> (i32, i32) {
    %c0_i32 = arith.constant 0 : i32
    %c0_i32_0 = arith.constant 0 : i32
    %c0_i32_1 = arith.constant 0 : i32
    return %c0_i32, %c0_i32_0 : i32, i32
  }
  func.func @transform_3(%arg0: i32, %arg1: i32) -> (i32, i32, i32) {
    %c0_i32 = arith.constant 0 : i32
    %c0_i32_0 = arith.constant 0 : i32
    return %arg0, %arg1, %c0_i32 : i32, i32, i32
  }
}

module attributes {stable_mosaic.version = 11 : i64} {
  func.func @_fc_fused_kernel(%arg0: i32, %arg1: memref<8x512xf32, #tpu.memory_space<vmem>>, %arg2: memref<512x256xf32, #tpu.memory_space<vmem>>, %arg3: memref<1x256xf32, #tpu.memory_space<vmem>>, %arg4: memref<256x256xf32, #tpu.memory_space<vmem>>, %arg5: memref<1x256xf32, #tpu.memory_space<vmem>>, %arg6: memref<256x512xf32, #tpu.memory_space<vmem>>, %arg7: memref<1x512xf32, #tpu.memory_space<vmem>>, %arg8: memref<8x512xf32, #tpu.memory_space<vmem>>, %arg9: memref<8x256xf32, #tpu.memory_space<vmem>>) attributes {dimension_semantics = [#tpu.dimension_semantics<arbitrary>], iteration_bounds = array<i64: 4>, scalar_prefetch = 0 : i64, scratch_operands = 1 : i64, tpu.core_type = #tpu.core_type<tc>, window_params = [{pipeline_mode = #tpu.pipeline_mode<synchronous>, transform_indices = @transform_0, window_bounds = array<i64: 8, 512>}, {transform_indices = @transform_1, window_bounds = array<i64: 512, 256>}, {transform_indices = @transform_2, window_bounds = array<i64: 1, 256>}, {transform_indices = @transform_3, window_bounds = array<i64: 256, 256>}, {pipeline_mode = #tpu.pipeline_mode<synchronous>, transform_indices = @transform_4, window_bounds = array<i64: 1, 256>}, {pipeline_mode = #tpu.pipeline_mode<synchronous>, transform_indices = @transform_5, window_bounds = array<i64: 256, 512>}, {pipeline_mode = #tpu.pipeline_mode<synchronous>, transform_indices = @transform_6, window_bounds = array<i64: 1, 512>}, {pipeline_mode = #tpu.pipeline_mode<synchronous>, transform_indices = @transform_7, window_bounds = array<i64: 8, 512>}]} {
    %c0_i32 = arith.constant 0 : i32
    %0 = arith.cmpi eq, %arg0, %c0_i32 : i32
    %1 = arith.extui %0 : i1 to i32
    %c0_i32_0 = arith.constant 0 : i32
    %2 = arith.cmpi ne, %1, %c0_i32_0 : i32
    scf.if %2 {
      %cst_15 = arith.constant 0.000000e+00 : f32
      %19 = vector.broadcast %cst_15 : f32 to vector<8x256xf32>
      %c0_16 = arith.constant 0 : index
      %c0_17 = arith.constant 0 : index
      %20 = vector.load %arg9[%c0_16, %c0_17] : memref<8x256xf32, #tpu.memory_space<vmem>>, vector<8x256xf32>
      tpu.vector_store %arg9[%c0_16, %c0_17], %19 {strides = array<i32>} : memref<8x256xf32, #tpu.memory_space<vmem>>, vector<8x256xf32>,
    } else {
    }
    %c0 = arith.constant 0 : index
    %c0_1 = arith.constant 0 : index
    %3 = vector.load %arg1[%c0, %c0_1] : memref<8x512xf32, #tpu.memory_space<vmem>>, vector<8x512xf32>
    %c0_2 = arith.constant 0 : index
    %c0_3 = arith.constant 0 : index
    %4 = vector.load %arg2[%c0_2, %c0_3] : memref<512x256xf32, #tpu.memory_space<vmem>>, vector<512x256xf32>
    %cst = arith.constant dense<0.000000e+00> : vector<8x256xf32>
    %5 = tpu.matmul %3, %4, %cst {dimension_numbers = #tpu.dot_dimension_numbers<[1], [0], [0], [1], [0, 0, 1, 1], [], []>} : vector<8x512xf32>, vector<512x256xf32>, vector<8x256xf32> -> vector<8x256xf32>
    %c0_4 = arith.constant 0 : index
    %c0_5 = arith.constant 0 : index
    %6 = vector.load %arg3[%c0_4, %c0_5] : memref<1x256xf32, #tpu.memory_space<vmem>>, vector<1x256xf32>
    %7 = vector.broadcast %6 : vector<1x256xf32> to vector<8x256xf32>
    %8 = arith.addf %5, %7 : vector<8x256xf32>
    %cst_6 = arith.constant 0.000000e+00 : f32
    %9 = vector.broadcast %cst_6 : f32 to vector<8x256xf32>
    %10 = arith.maximumf %8, %9 : vector<8x256xf32>
    %c0_7 = arith.constant 0 : index
    %c0_8 = arith.constant 0 : index
    %11 = vector.load %arg9[%c0_7, %c0_8] : memref<8x256xf32, #tpu.memory_space<vmem>>, vector<8x256xf32>
    %c0_9 = arith.constant 0 : index
    %c0_10 = arith.constant 0 : index
    %12 = vector.load %arg4[%c0_9, %c0_10] : memref<256x256xf32, #tpu.memory_space<vmem>>, vector<256x256xf32>
    %cst_11 = arith.constant dense<0.000000e+00> : vector<8x256xf32>
    %13 = tpu.matmul %10, %12, %cst_11 {dimension_numbers = #tpu.dot_dimension_numbers<[1], [0], [0], [1], [0, 0, 1, 1], [], []>} : vector<8x256xf32>, vector<256x256xf32>, vector<8x256xf32> -> vector<8x256xf32>
    %14 = arith.addf %11, %13 : vector<8x256xf32>
    %c0_12 = arith.constant 0 : index
    %c0_13 = arith.constant 0 : index
    %15 = vector.load %arg9[%c0_12, %c0_13] : memref<8x256xf32, #tpu.memory_space<vmem>>, vector<8x256xf32>
    tpu.vector_store %arg9[%c0_12, %c0_13], %14 {strides = array<i32>} : memref<8x256xf32, #tpu.memory_space<vmem>>, vector<8x256xf32>,
    %c3_i32 = arith.constant 3 : i32
    %16 = arith.cmpi eq, %arg0, %c3_i32 : i32
    %17 = arith.extui %16 : i1 to i32
    %c0_i32_14 = arith.constant 0 : i32
    %18 = arith.cmpi ne, %17, %c0_i32_14 : i32
    scf.if %18 {
      %c0_15 = arith.constant 0 : index
      %c0_16 = arith.constant 0 : index
      %19 = vector.load %arg9[%c0_15, %c0_16] : memref<8x256xf32, #tpu.memory_space<vmem>>, vector<8x256xf32>
      %c0_17 = arith.constant 0 : index
      %c0_18 = arith.constant 0 : index
      %20 = vector.load %arg5[%c0_17, %c0_18] : memref<1x256xf32, #tpu.memory_space<vmem>>, vector<1x256xf32>
      %21 = vector.broadcast %20 : vector<1x256xf32> to vector<8x256xf32>
      %22 = arith.addf %19, %21 : vector<8x256xf32>
      %cst_19 = arith.constant 0.000000e+00 : f32
      %23 = vector.broadcast %cst_19 : f32 to vector<8x256xf32>
      %24 = arith.maximumf %22, %23 : vector<8x256xf32>
      %c0_20 = arith.constant 0 : index
      %c0_21 = arith.constant 0 : index
      %25 = vector.load %arg6[%c0_20, %c0_21] : memref<256x512xf32, #tpu.memory_space<vmem>>, vector<256x512xf32>
      %cst_22 = arith.constant dense<0.000000e+00> : vector<8x512xf32>
      %26 = tpu.matmul %24, %25, %cst_22 {dimension_numbers = #tpu.dot_dimension_numbers<[1], [0], [0], [1], [0, 0, 1, 1], [], []>} : vector<8x256xf32>, vector<256x512xf32>, vector<8x512xf32> -> vector<8x512xf32>
      %c0_23 = arith.constant 0 : index
      %c0_24 = arith.constant 0 : index
      %27 = vector.load %arg7[%c0_23, %c0_24] : memref<1x512xf32, #tpu.memory_space<vmem>>, vector<1x512xf32>
      %28 = vector.broadcast %27 : vector<1x512xf32> to vector<8x512xf32>
      %29 = arith.addf %26, %28 : vector<8x512xf32>
      %c0_25 = arith.constant 0 : index
      %c0_26 = arith.constant 0 : index
      %30 = vector.load %arg8[%c0_25, %c0_26] : memref<8x512xf32, #tpu.memory_space<vmem>>, vector<8x512xf32>
      tpu.vector_store %arg8[%c0_25, %c0_26], %29 {strides = array<i32>} : memref<8x512xf32, #tpu.memory_space<vmem>>, vector<8x512xf32>,
    } else {
    }
    return
  }
  func.func @transform_0(%arg0: i32) -> (i32, i32) {
    %c0_i32 = arith.constant 0 : i32
    %c0_i32_0 = arith.constant 0 : i32
    %c0_i32_1 = arith.constant 0 : i32
    return %c0_i32, %c0_i32_0 : i32, i32
  }
  func.func @transform_1(%arg0: i32) -> (i32, i32) {
    %c0_i32 = arith.constant 0 : i32
    %c0_i32_0 = arith.constant 0 : i32
    return %c0_i32, %arg0 : i32, i32
  }
  func.func @transform_2(%arg0: i32) -> (i32, i32) {
    %c0_i32 = arith.constant 0 : i32
    %c0_i32_0 = arith.constant 0 : i32
    return %c0_i32, %arg0 : i32, i32
  }
  func.func @transform_3(%arg0: i32) -> (i32, i32) {
    %c0_i32 = arith.constant 0 : i32
    %c0_i32_0 = arith.constant 0 : i32
    return %arg0, %c0_i32 : i32, i32
  }
  func.func @transform_4(%arg0: i32) -> (i32, i32) {
    %c0_i32 = arith.constant 0 : i32
    %c0_i32_0 = arith.constant 0 : i32
    %c0_i32_1 = arith.constant 0 : i32
    return %c0_i32, %c0_i32_0 : i32, i32
  }
  func.func @transform_5(%arg0: i32) -> (i32, i32) {
    %c0_i32 = arith.constant 0 : i32
    %c0_i32_0 = arith.constant 0 : i32
    %c0_i32_1 = arith.constant 0 : i32
    return %c0_i32, %c0_i32_0 : i32, i32
  }
  func.func @transform_6(%arg0: i32) -> (i32, i32) {
    %c0_i32 = arith.constant 0 : i32
    %c0_i32_0 = arith.constant 0 : i32
    %c0_i32_1 = arith.constant 0 : i32
    return %c0_i32, %c0_i32_0 : i32, i32
  }
  func.func @transform_7(%arg0: i32) -> (i32, i32) {
    %c0_i32 = arith.constant 0 : i32
    %c0_i32_0 = arith.constant 0 : i32
    %c0_i32_1 = arith.constant 0 : i32
    return %c0_i32, %c0_i32_0 : i32, i32
  }
}

</mosaic_0001>

<bundles_post_ra>
// kernel: widerface_forward.4
= control target key start
LH: loop header
LB: loop body
LE: loop exit
PB: predicated region body
PF: predicated region fallthrough
CT: control target
= control target key end

     0   :  { %s2021_s12 = smov 0   ;;  %s2023_s13 = smov 0   ;;  %s2608_s0 = inlined_call_operand.vmem [shape: f32[2,4,256,128], index: 0, kind: input, shape index: {}]   ;;  %s2609_s1 = inlined_call_operand.vmem [shape: f32[128,128], index: 1, kind: input, shape index: {}]   ;;  %s2610_s2 = inlined_call_operand.vmem [shape: f32[1,128], index: 2, kind: input, shape index: {}]   ;;  %s2611_s3 = inlined_call_operand.vmem [shape: f32[2,256,128], index: 3, kind: output, shape index: {}]  }
   0x1   :  { %s2025_s14 = smov 0   ;;  %s2027_s15 = smov 0  }
   0x2   :  { %s2029_s16 = smov 0   ;;  %s2031_s17 = smov 0  }
   0x3   :  { %s2033_s18 = smov 0  }
   0x4 LB: > { %s22_s19 = sadd.s32 1, %s1991_s16  ;;  %s25_s20 = sadd.s32 1, %s1995_s17  ;;  %s1999_s18 = sphi %s2033_s18, %s13_s18   ;;  %s1995_s17 = sphi %s2031_s17, %s2617_s17   ;;  %s1991_s16 = sphi %s2029_s16, %s2616_s16   ;;  %s1987_s15 = sphi %s2027_s15, %s2615_s15   ;;  %s1983_s14 = sphi %s2025_s14, %s2614_s14   ;;  %s1979_s13 = sphi %s2023_s13, %s2613_s13   ;;  %s1975_s12 = sphi %s2021_s12, %s2612_s12  }
   0x5   : > { %p23_p0 = scmp.ge.s32.totalorder %s22_s19, 2  ;;  %p41_p1 = scmp.ne.s32.totalorder %s1979_s13, %s1975_s12 }
   0x6   : > { %p42_p2 = scmp.eq.s32.totalorder %s1999_s18, 0  ;;  %s34_s24 = sadd.s32 1, %s1979_s13 }
   0x7   : > { %s2619_s19 = smov (%p23_p0, %s22_s19), 0  ;;  %s2621_s20 = smov (!%p23_p0, %s25_s20), %s1995_s17 }
   0x8   : > { %p43_p3 = por %p42_p2, %p41_p1  ;;  %p27_p4 = scmp.ge.s32.totalorder %s2621_s20, 2 }
   0x9   : > { %s30_s21 = ssub.s32 %s1991_s16, %s2619_s19  ;;  %p1348_p6 = scmp.ge.s32.totalorder %s1999_s18, 4 }
   0xa   : > { %s2623_s20 = smov (%p27_p4, %s2621_s20), 0 }
   0xb   : > { %s29_s22 = ssub.s32 %s1995_s17, %s2623_s20  ;;  %143 = sbr.rel (%p1348_p6) target bundleno = 57 (0x39), region = 24 }
   0xc   : > { %s31_s23 = sor.u32 %s30_s21, %s29_s22 }
   0xd   : > { %p32_p5 = scmp.eq.s32.totalorder %s31_s23, 0 }
   0xf   : > { %s2072_s25 = scalar_select %p32_p5, %s1979_s13, %s34_s24  }
  0x12   : > { %146 = sbr.rel (!%p43_p3) target bundleno = 57 (0x39), region = 28  ;;  %s148_s26 = sand.u32 (%p43_p3), 1, %s1979_s13  }
  0x13   : > { %s1350_s27 = sshll.u32 (%p43_p3), %s1991_s16, 4  ;;  %s1349_s28 = sshll.u32 (%p43_p3), %s148_s26, 9 }
  0x14   : > { %s1351_s29 = sshll.u32 (%p43_p3), %s1995_s17, 7  ;;  %s2086_s8 = scalar_lea.vmem (%p43_p3), [#allocation2], %s1349_s28 }
  0x15   : > { %s153_s30 = sadd.s32 (%p43_p3), %s1351_s29, %s1350_s27 }
  0x16   : > { %s1352_s4 = sshll.u32 (%p43_p3), %s153_s30, 3 }
  0x17   : > { %s2081_s7 = scalar_lea.vmem (%p43_p3), %s2608_s0, %s1352_s4 }
  0x18   : > { %v309_v0 = vld [vmem:[%s2081_s7] sm:$0xff] (%p43_p3)  ;;  %v311_v1 = vld [vmem:[%s2081_s7 + $0x8] sm:$0xff] (%p43_p3)  ;;  %v313_v2 = vld [vmem:[%s2081_s7 + $0x10] sm:$0xff] (%p43_p3) }
  0x19   : > { %310 = vst [vmem:[%s2086_s8] sm:$0xff] %v309_v0  ;;  %312 = vst [vmem:[%s2086_s8 + $0x8] sm:$0xff] %v311_v1  ;;  %v315_v3 = vld [vmem:[%s2081_s7 + $0x18] sm:$0xff]  ;;  %v317_v4 = vld [vmem:[%s2081_s7 + $0x20] sm:$0xff] }
  0x1a   : > { %314 = vst [vmem:[%s2086_s8 + $0x10] sm:$0xff] %v313_v2  ;;  %v319_v5 = vld [vmem:[%s2081_s7 + $0x28] sm:$0xff]  ;;  %316 = vst [vmem:[%s2086_s8 + $0x18] sm:$0xff] %v315_v3  ;;  %v321_v6 = vld [vmem:[%s2081_s7 + $0x30] sm:$0xff] }
  0x1b   : > { %318 = vst [vmem:[%s2086_s8 + $0x20] sm:$0xff] %v317_v4  ;;  %320 = vst [vmem:[%s2086_s8 + $0x28] sm:$0xff] %v319_v5  ;;  %v323_v7 = vld [vmem:[%s2081_s7 + $0x38] sm:$0xff]  ;;  %v325_v8 = vld [vmem:[%s2081_s7 + $0x40] sm:$0xff] }
  0x1c   : > { %322 = vst [vmem:[%s2086_s8 + $0x30] sm:$0xff] %v321_v6  ;;  %324 = vst [vmem:[%s2086_s8 + $0x38] sm:$0xff] %v323_v7  ;;  %v327_v9 = vld [vmem:[%s2081_s7 + $0x48] sm:$0xff]  ;;  %v329_v10 = vld [vmem:[%s2081_s7 + $0x50] sm:$0xff] }
  0x1d   : > { %326 = vst [vmem:[%s2086_s8 + $0x40] sm:$0xff] %v325_v8  ;;  %v331_v11 = vld [vmem:[%s2081_s7 + $0x58] sm:$0xff]  ;;  %328 = vst [vmem:[%s2086_s8 + $0x48] sm:$0xff] %v327_v9  ;;  %v333_v12 = vld [vmem:[%s2081_s7 + $0x60] sm:$0xff] }
  0x1e   : > { %330 = vst [vmem:[%s2086_s8 + $0x50] sm:$0xff] %v329_v10  ;;  %332 = vst [vmem:[%s2086_s8 + $0x58] sm:$0xff] %v331_v11  ;;  %v335_v13 = vld [vmem:[%s2081_s7 + $0x68] sm:$0xff]  ;;  %v337_v14 = vld [vmem:[%s2081_s7 + $0x70] sm:$0xff] }
  0x1f   : > { %334 = vst [vmem:[%s2086_s8 + $0x60] sm:$0xff] %v333_v12  ;;  %336 = vst [vmem:[%s2086_s8 + $0x68] sm:$0xff] %v335_v13  ;;  %v339_v15 = vld [vmem:[%s2081_s7 + $0x78] sm:$0xff]  ;;  %v341_v16 = vld [vmem:[%s2081_s7 + $0x100] sm:$0xff] }
  0x20   : > { %338 = vst [vmem:[%s2086_s8 + $0x70] sm:$0xff] %v337_v14  ;;  %v343_v17 = vld [vmem:[%s2081_s7 + $0x108] sm:$0xff]  ;;  %340 = vst [vmem:[%s2086_s8 + $0x78] sm:$0xff] %v339_v15  ;;  %v345_v18 = vld [vmem:[%s2081_s7 + $0x110] sm:$0xff] }
  0x21   : > { %342 = vst [vmem:[%s2086_s8 + $0x80] sm:$0xff] %v341_v16  ;;  %344 = vst [vmem:[%s2086_s8 + $0x88] sm:$0xff] %v343_v17  ;;  %v347_v19 = vld [vmem:[%s2081_s7 + $0x118] sm:$0xff]  ;;  %v349_v20 = vld [vmem:[%s2081_s7 + $0x120] sm:$0xff] }
  0x22   : > { %346 = vst [vmem:[%s2086_s8 + $0x90] sm:$0xff] %v345_v18  ;;  %348 = vst [vmem:[%s2086_s8 + $0x98] sm:$0xff] %v347_v19  ;;  %v351_v21 = vld [vmem:[%s2081_s7 + $0x128] sm:$0xff]  ;;  %v353_v22 = vld [vmem:[%s2081_s7 + $0x130] sm:$0xff] }
  0x23   : > { %350 = vst [vmem:[%s2086_s8 + $0xa0] sm:$0xff] %v349_v20  ;;  %v355_v23 = vld [vmem:[%s2081_s7 + $0x138] sm:$0xff]  ;;  %352 = vst [vmem:[%s2086_s8 + $0xa8] sm:$0xff] %v351_v21  ;;  %v357_v24 = vld [vmem:[%s2081_s7 + $0x140] sm:$0xff] }
  0x24   : > { %354 = vst [vmem:[%s2086_s8 + $0xb0] sm:$0xff] %v353_v22  ;;  %356 = vst [vmem:[%s2086_s8 + $0xb8] sm:$0xff] %v355_v23  ;;  %v359_v25 = vld [vmem:[%s2081_s7 + $0x148] sm:$0xff]  ;;  %v361_v26 = vld [vmem:[%s2081_s7 + $0x150] sm:$0xff] }
  0x25   : > { %358 = vst [vmem:[%s2086_s8 + $0xc0] sm:$0xff] %v357_v24  ;;  %360 = vst [vmem:[%s2086_s8 + $0xc8] sm:$0xff] %v359_v25  ;;  %v363_v27 = vld [vmem:[%s2081_s7 + $0x158] sm:$0xff]  ;;  %v365_v28 = vld [vmem:[%s2081_s7 + $0x160] sm:$0xff] }
  0x26   : > { %362 = vst [vmem:[%s2086_s8 + $0xd0] sm:$0xff] %v361_v26  ;;  %v367_v29 = vld [vmem:[%s2081_s7 + $0x168] sm:$0xff]  ;;  %364 = vst [vmem:[%s2086_s8 + $0xd8] sm:$0xff] %v363_v27  ;;  %v369_v30 = vld [vmem:[%s2081_s7 + $0x170] sm:$0xff] }
  0x27   : > { %366 = vst [vmem:[%s2086_s8 + $0xe0] sm:$0xff] %v365_v28  ;;  %368 = vst [vmem:[%s2086_s8 + $0xe8] sm:$0xff] %v367_v29  ;;  %v371_v31 = vld [vmem:[%s2081_s7 + $0x178] sm:$0xff]  ;;  %v373_v32 = vld [vmem:[%s2081_s7 + $0x200] sm:$0xff] }
  0x28   : > { %370 = vst [vmem:[%s2086_s8 + $0xf0] sm:$0xff] %v369_v30  ;;  %372 = vst [vmem:[%s2086_s8 + $0xf8] sm:$0xff] %v371_v31  ;;  %v375_v33 = vld [vmem:[%s2081_s7 + $0x208] sm:$0xff]  ;;  %v377_v34 = vld [vmem:[%s2081_s7 + $0x210] sm:$0xff] }
  0x29   : > { %374 = vst [vmem:[%s2086_s8 + $0x100] sm:$0xff] %v373_v32  ;;  %v379_v35 = vld [vmem:[%s2081_s7 + $0x218] sm:$0xff]  ;;  %376 = vst [vmem:[%s2086_s8 + $0x108] sm:$0xff] %v375_v33  ;;  %v381_v36 = vld [vmem:[%s2081_s7 + $0x220] sm:$0xff] }
  0x2a   : > { %378 = vst [vmem:[%s2086_s8 + $0x110] sm:$0xff] %v377_v34  ;;  %380 = vst [vmem:[%s2086_s8 + $0x118] sm:$0xff] %v379_v35  ;;  %v383_v37 = vld [vmem:[%s2081_s7 + $0x228] sm:$0xff]  ;;  %v385_v38 = vld [vmem:[%s2081_s7 + $0x230] sm:$0xff] }
  0x2b   : > { %382 = vst [vmem:[%s2086_s8 + $0x120] sm:$0xff] %v381_v36  ;;  %384 = vst [vmem:[%s2086_s8 + $0x128] sm:$0xff] %v383_v37  ;;  %v387_v39 = vld [vmem:[%s2081_s7 + $0x238] sm:$0xff]  ;;  %v389_v40 = vld [vmem:[%s2081_s7 + $0x240] sm:$0xff] }
  0x2c   : > { %386 = vst [vmem:[%s2086_s8 + $0x130] sm:$0xff] %v385_v38  ;;  %v391_v41 = vld [vmem:[%s2081_s7 + $0x248] sm:$0xff]  ;;  %388 = vst [vmem:[%s2086_s8 + $0x138] sm:$0xff] %v387_v39  ;;  %v393_v42 = vld [vmem:[%s2081_s7 + $0x250] sm:$0xff] }
  0x2d   : > { %390 = vst [vmem:[%s2086_s8 + $0x140] sm:$0xff] %v389_v40  ;;  %392 = vst [vmem:[%s2086_s8 + $0x148] sm:$0xff] %v391_v41  ;;  %v395_v43 = vld [vmem:[%s2081_s7 + $0x258] sm:$0xff]  ;;  %v397_v44 = vld [vmem:[%s2081_s7 + $0x260] sm:$0xff] }
  0x2e   : > { %394 = vst [vmem:[%s2086_s8 + $0x150] sm:$0xff] %v393_v42  ;;  %396 = vst [vmem:[%s2086_s8 + $0x158] sm:$0xff] %v395_v43  ;;  %v399_v45 = vld [vmem:[%s2081_s7 + $0x268] sm:$0xff]  ;;  %v401_v46 = vld [vmem:[%s2081_s7 + $0x270] sm:$0xff] }
  0x2f   : > { %398 = vst [vmem:[%s2086_s8 + $0x160] sm:$0xff] %v397_v44  ;;  %v403_v47 = vld [vmem:[%s2081_s7 + $0x278] sm:$0xff]  ;;  %400 = vst [vmem:[%s2086_s8 + $0x168] sm:$0xff] %v399_v45  ;;  %v405_v48 = vld [vmem:[%s2081_s7 + $0x300] sm:$0xff] }
  0x30   : > { %402 = vst [vmem:[%s2086_s8 + $0x170] sm:$0xff] %v401_v46  ;;  %404 = vst [vmem:[%s2086_s8 + $0x178] sm:$0xff] %v403_v47  ;;  %v407_v49 = vld [vmem:[%s2081_s7 + $0x308] sm:$0xff]  ;;  %v409_v50 = vld [vmem:[%s2081_s7 + $0x310] sm:$0xff] }
  0x31   : > { %406 = vst [vmem:[%s2086_s8 + $0x180] sm:$0xff] %v405_v48  ;;  %408 = vst [vmem:[%s2086_s8 + $0x188] sm:$0xff] %v407_v49  ;;  %v411_v51 = vld [vmem:[%s2081_s7 + $0x318] sm:$0xff]  ;;  %v413_v52 = vld [vmem:[%s2081_s7 + $0x320] sm:$0xff] }
  0x32   : > { %410 = vst [vmem:[%s2086_s8 + $0x190] sm:$0xff] %v409_v50  ;;  %v415_v53 = vld [vmem:[%s2081_s7 + $0x328] sm:$0xff]  ;;  %412 = vst [vmem:[%s2086_s8 + $0x198] sm:$0xff] %v411_v51  ;;  %v417_v54 = vld [vmem:[%s2081_s7 + $0x330] sm:$0xff] }
  0x33   : > { %414 = vst [vmem:[%s2086_s8 + $0x1a0] sm:$0xff] %v413_v52  ;;  %416 = vst [vmem:[%s2086_s8 + $0x1a8] sm:$0xff] %v415_v53  ;;  %v419_v55 = vld [vmem:[%s2081_s7 + $0x338] sm:$0xff]  ;;  %v421_v56 = vld [vmem:[%s2081_s7 + $0x340] sm:$0xff] }
  0x34   : > { %418 = vst [vmem:[%s2086_s8 + $0x1b0] sm:$0xff] %v417_v54  ;;  %420 = vst [vmem:[%s2086_s8 + $0x1b8] sm:$0xff] %v419_v55  ;;  %v423_v57 = vld [vmem:[%s2081_s7 + $0x348] sm:$0xff]  ;;  %v425_v58 = vld [vmem:[%s2081_s7 + $0x350] sm:$0xff] }
  0x35   : > { %422 = vst [vmem:[%s2086_s8 + $0x1c0] sm:$0xff] %v421_v56  ;;  %v427_v59 = vld [vmem:[%s2081_s7 + $0x358] sm:$0xff]  ;;  %424 = vst [vmem:[%s2086_s8 + $0x1c8] sm:$0xff] %v423_v57  ;;  %v429_v60 = vld [vmem:[%s2081_s7 + $0x360] sm:$0xff] }
  0x36   : > { %426 = vst [vmem:[%s2086_s8 + $0x1d0] sm:$0xff] %v425_v58  ;;  %428 = vst [vmem:[%s2086_s8 + $0x1d8] sm:$0xff] %v427_v59  ;;  %v431_v61 = vld [vmem:[%s2081_s7 + $0x368] sm:$0xff]  ;;  %v433_v62 = vld [vmem:[%s2081_s7 + $0x370] sm:$0xff] }
  0x37   : > { %430 = vst [vmem:[%s2086_s8 + $0x1e0] sm:$0xff] %v429_v60  ;;  %432 = vst [vmem:[%s2086_s8 + $0x1e8] sm:$0xff] %v431_v61  ;;  %v435_v63 = vld [vmem:[%s2081_s7 + $0x378] sm:$0xff] }
  0x38   : > { %434 = vst [vmem:[%s2086_s8 + $0x1f0] sm:$0xff] %v433_v62  ;;  %436 = vst [vmem:[%s2086_s8 + $0x1f8] sm:$0xff] %v435_v63 }
  0x39 PF: > { %p1353_p7 = scmp.ge.s32.totalorder %s1999_s18, 1  ;;  %p441_p8 = scmp.lt.s32.totalorder %s1999_s18, 5 }
  0x3b   : > { %p442_p9 = pnand %p1353_p7, %p441_p8 }
  0x3c   : > { %v486_v0 = vld [vmem:[%s2609_s1] sm:$0xff] (!%p442_p9)  ;;  %v487_v1 = vld [vmem:[%s2609_s1 + $0x8] sm:$0xff] (!%p442_p9)  ;;  %v488_v2 = vld [vmem:[%s2609_s1 + $0x10] sm:$0xff] (!%p442_p9)  ;;  %s448_s24 = sand.u32 (!%p442_p9), 1, %s1975_s12   ;;  %p477_p10 = scmp.lt.s32.totalorder (!%p442_p9), %s1987_s15, 1 }
  0x3d   : > { %445 = sbr.rel (%p442_p9) target bundleno = 377 (0x179), region = 66  ;;  %v2225_v3 = vpack.c.bf16 (!%p442_p9), %v487_v1, %v486_v0  ;;  %v489_v4 = vld [vmem:[%s2609_s1 + $0x18] sm:$0xff] (!%p442_p9)  ;;  %s1354_s28 = sshll.u32 (!%p442_p9), %s448_s24, 9  ;;  %v490_v6 = vld [vmem:[%s2609_s1 + $0x20] sm:$0xff] (!%p442_p9)  ;;  %v491_v7 = vld [vmem:[%s2609_s1 + $0x28] sm:$0xff] (!%p442_p9) }
  0x3e   : > { %v2230_v5 = vpack.c.bf16 (!%p442_p9), %v489_v4, %v488_v2  ;;  %v2244_v8 = vpack.c.bf16 (!%p442_p9), %v491_v7, %v490_v6  ;;  %s2246_s12 = scalar_lea.vmem (!%p442_p9), [#allocation2], %s1354_s28  ;;  %v492_v11 = vld [vmem:[%s2609_s1 + $0x30] sm:$0xff] (!%p442_p9)  ;;  %v493_v12 = vld [vmem:[%s2609_s1 + $0x38] sm:$0xff] (!%p442_p9)  ;;  %v494_v14 = vld [vmem:[%s2609_s1 + $0x40] sm:$0xff] (!%p442_p9) }
  0x3f   : > { %1762 = vmatprep.subr.bf16.mxu0 (!%p442_p9), %v2225_v3  ;;  %1794 = vmatprep.subr.bf16.mxu1 (!%p442_p9), %v2225_v3  ;;  %v502_v9 = vld [vmem:[%s2246_s12] sm:$0xff] (!%p442_p9)  ;;  %v2260_v13 = vpack.c.bf16 (!%p442_p9), %v493_v12, %v492_v11  ;;  %v495_v15 = vld [vmem:[%s2609_s1 + $0x48] sm:$0xff] (!%p442_p9)  ;;  %v496_v17 = vld [vmem:[%s2609_s1 + $0x50] sm:$0xff] (!%p442_p9) }
  0x40   : > { %1764 = vmatpush3.bf16.msra.mxu0 (!%p442_p9), %v2225_v3  ;;  %1796 = vmatpush3.bf16.msra.mxu1 (!%p442_p9), %v2225_v3  ;;  %v1358_v10 = vld [vmem:[%s2246_s12 + $0x80] sm:$0xff] (!%p442_p9)  ;;  %v2272_v16 = vpack.c.bf16 (!%p442_p9), %v495_v15, %v494_v14  ;;  %v497_v18 = vld [vmem:[%s2609_s1 + $0x58] sm:$0xff] (!%p442_p9)  ;;  %v499_v21 = vld [vmem:[%s2609_s1 + $0x68] sm:$0xff] (!%p442_p9) }
  0x41   : > { %1766 = vmatprep.subr.bf16.mxu0 (!%p442_p9), %v2230_v5  ;;  %1798 = vmatprep.subr.bf16.mxu1 (!%p442_p9), %v2230_v5  ;;  %v2284_v19 = vpack.c.bf16 (!%p442_p9), %v497_v18, %v496_v17  ;;  %v498_v20 = vld [vmem:[%s2609_s1 + $0x60] sm:$0xff] (!%p442_p9)  ;;  %v500_v23 = vld [vmem:[%s2609_s1 + $0x70] sm:$0xff] (!%p442_p9)  ;;  %v501_v24 = vld [vmem:[%s2609_s1 + $0x78] sm:$0xff] (!%p442_p9) }
  0x42   : > { %1569 = vmatprep.mubr.f32.mxu0 (!%p442_p9), %v502_v9  ;;  %1625 = vmatprep.mubr.f32.mxu1 (!%p442_p9), %v1358_v10  ;;  %v2296_v22 = vpack.c.bf16 (!%p442_p9), %v499_v21, %v498_v20  ;;  %v2308_v25 = vpack.c.bf16 (!%p442_p9), %v501_v24, %v500_v23  ;;  %v503_v26 = vld [vmem:[%s2246_s12 + $0x8] sm:$0xff] (!%p442_p9)  ;;  %v504_v28 = vld [vmem:[%s2246_s12 + $0x10] sm:$0xff] (!%p442_p9)  ;;  %v505_v30 = vld [vmem:[%s2246_s12 + $0x18] sm:$0xff] (!%p442_p9) }
  0x43   : > { %v1359_v27 = vld [vmem:[%s2246_s12 + $0x88] sm:$0xff] (!%p442_p9)  ;;  %v1360_v29 = vld [vmem:[%s2246_s12 + $0x90] sm:$0xff] (!%p442_p9)  ;;  %v1361_v31 = vld [vmem:[%s2246_s12 + $0x98] sm:$0xff] (!%p442_p9) }
  0x44   : > { %1768 = vmatpush3.bf16.msra.mxu0 %v2230_v5  ;;  %1800 = vmatpush3.bf16.msra.mxu1 %v2230_v5  ;;  %v506_v32 = vld [vmem:[%s2246_s12 + $0x20] sm:$0xff]  ;;  %v507_v34 = vld [vmem:[%s2246_s12 + $0x28] sm:$0xff]  ;;  %v508_v36 = vld [vmem:[%s2246_s12 + $0x30] sm:$0xff]  ;;  %s2625_s15 = smov (!%p477_p10, %s1987_s15), 1 }
  0x45   : > { %1770 = vmatprep.subr.bf16.mxu0 %v2244_v8  ;;  %1802 = vmatprep.subr.bf16.mxu1 %v2244_v8  ;;  %v1362_v33 = vld [vmem:[%s2246_s12 + $0xa0] sm:$0xff]  ;;  %v1363_v35 = vld [vmem:[%s2246_s12 + $0xa8] sm:$0xff]  ;;  %v1364_v37 = vld [vmem:[%s2246_s12 + $0xb0] sm:$0xff] }
  0x46   : > { %v509_v38 = vld [vmem:[%s2246_s12 + $0x38] sm:$0xff]  ;;  %v510_v40 = vld [vmem:[%s2246_s12 + $0x40] sm:$0xff]  ;;  %v511_v42 = vld [vmem:[%s2246_s12 + $0x48] sm:$0xff] }
  0x47   : > { %v1365_v39 = vld [vmem:[%s2246_s12 + $0xb8] sm:$0xff]  ;;  %v1366_v41 = vld [vmem:[%s2246_s12 + $0xc0] sm:$0xff]  ;;  %v1367_v43 = vld [vmem:[%s2246_s12 + $0xc8] sm:$0xff] }
  0x48   : > { %1772 = vmatpush3.bf16.msra.mxu0 %v2244_v8  ;;  %1804 = vmatpush3.bf16.msra.mxu1 %v2244_v8  ;;  %v512_v44 = vld [vmem:[%s2246_s12 + $0x50] sm:$0xff]  ;;  %v513_v46 = vld [vmem:[%s2246_s12 + $0x58] sm:$0xff]  ;;  %v514_v48 = vld [vmem:[%s2246_s12 + $0x60] sm:$0xff] }
  0x49   : > { %1774 = vmatprep.subr.bf16.mxu0 %v2260_v13  ;;  %1806 = vmatprep.subr.bf16.mxu1 %v2260_v13  ;;  %v1368_v45 = vld [vmem:[%s2246_s12 + $0xd0] sm:$0xff]  ;;  %v1369_v47 = vld [vmem:[%s2246_s12 + $0xd8] sm:$0xff]  ;;  %v1370_v49 = vld [vmem:[%s2246_s12 + $0xe0] sm:$0xff] }
  0x4a   : > { %v515_v50 = vld [vmem:[%s2246_s12 + $0x68] sm:$0xff]  ;;  %v516_v52 = vld [vmem:[%s2246_s12 + $0x70] sm:$0xff]  ;;  %v517_v54 = vld [vmem:[%s2246_s12 + $0x78] sm:$0xff] }
  0x4b   : > { %v1371_v51 = vld [vmem:[%s2246_s12 + $0xe8] sm:$0xff]  ;;  %v1372_v53 = vld [vmem:[%s2246_s12 + $0xf0] sm:$0xff]  ;;  %v1373_v55 = vld [vmem:[%s2246_s12 + $0xf8] sm:$0xff] }
  0x4c   : > { %1776 = vmatpush3.bf16.msra.mxu0 %v2260_v13  ;;  %1808 = vmatpush3.bf16.msra.mxu1 %v2260_v13  ;;  %v1374_v56 = vld [vmem:[%s2246_s12 + $0x100] sm:$0xff]  ;;  %v1375_v58 = vld [vmem:[%s2246_s12 + $0x108] sm:$0xff]  ;;  %v1376_v60 = vld [vmem:[%s2246_s12 + $0x110] sm:$0xff] }
  0x4d   : > { %1778 = vmatprep.subr.bf16.mxu0 %v2272_v16  ;;  %1810 = vmatprep.subr.bf16.mxu1 %v2272_v16  ;;  %v1390_v57 = vld [vmem:[%s2246_s12 + $0x180] sm:$0xff]  ;;  %v1391_v59 = vld [vmem:[%s2246_s12 + $0x188] sm:$0xff]  ;;  %v1392_v61 = vld [vmem:[%s2246_s12 + $0x190] sm:$0xff] }
  0x4e   : > { %v1377_v62 = vld [vmem:[%s2246_s12 + $0x118] sm:$0xff]  ;;  %v1378_v0 = vld [vmem:[%s2246_s12 + $0x120] sm:$0xff]  ;;  %v1379_v2 = vld [vmem:[%s2246_s12 + $0x128] sm:$0xff] }
  0x4f   : > { %v1393_v63 = vld [vmem:[%s2246_s12 + $0x198] sm:$0xff]  ;;  %v1394_v1 = vld [vmem:[%s2246_s12 + $0x1a0] sm:$0xff]  ;;  %v1380_v4 = vld [vmem:[%s2246_s12 + $0x130] sm:$0xff] }
  0x50   : > { %1780 = vmatpush3.bf16.msra.mxu0 %v2272_v16  ;;  %1812 = vmatpush3.bf16.msra.mxu1 %v2272_v16  ;;  %v1381_v6 = vld [vmem:[%s2246_s12 + $0x138] sm:$0xff]  ;;  %v1398_v9 = vld [vmem:[%s2246_s12 + $0x1c0] sm:$0xff]  ;;  %v1383_v10 = vld [vmem:[%s2246_s12 + $0x148] sm:$0xff] }
  0x51   : > { %1782 = vmatprep.subr.bf16.mxu0 %v2284_v19  ;;  %1814 = vmatprep.subr.bf16.mxu1 %v2284_v19  ;;  %v1397_v7 = vld [vmem:[%s2246_s12 + $0x1b8] sm:$0xff]  ;;  %v1399_v11 = vld [vmem:[%s2246_s12 + $0x1c8] sm:$0xff]  ;;  %v1384_v12 = vld [vmem:[%s2246_s12 + $0x150] sm:$0xff] }
  0x52   : > { %v1385_v14 = vld [vmem:[%s2246_s12 + $0x158] sm:$0xff]  ;;  %v1402_v17 = vld [vmem:[%s2246_s12 + $0x1e0] sm:$0xff]  ;;  %v1387_v18 = vld [vmem:[%s2246_s12 + $0x168] sm:$0xff] }
  0x53   : > { %v1401_v15 = vld [vmem:[%s2246_s12 + $0x1d8] sm:$0xff]  ;;  %v1388_v20 = vld [vmem:[%s2246_s12 + $0x170] sm:$0xff] }
  0x54   : > { %1784 = vmatpush3.bf16.msra.mxu0 %v2284_v19  ;;  %1816 = vmatpush3.bf16.msra.mxu1 %v2284_v19  ;;  %v1404_v21 = vld [vmem:[%s2246_s12 + $0x1f0] sm:$0xff]  ;;  %v1405_v23 = vld [vmem:[%s2246_s12 + $0x1f8] sm:$0xff] }
  0x55   : > { %1786 = vmatprep.subr.bf16.mxu0 %v2296_v22  ;;  %1818 = vmatprep.subr.bf16.mxu1 %v2296_v22 }
  0x58   : > { %1788 = vmatpush3.bf16.msra.mxu0 %v2296_v22  ;;  %1820 = vmatpush3.bf16.msra.mxu1 %v2296_v22 }
  0x59   : > { %1790 = vmatprep.subr.bf16.mxu0 %v2308_v25  ;;  %1822 = vmatprep.subr.bf16.mxu1 %v2308_v25 }
  0x5c   : > { %1792 = vmatpush3.bf16.msra.mxu0 %v2308_v25  ;;  %1824 = vmatpush3.bf16.msra.mxu1 %v2308_v25 }
  0x5d   : > { %1826 = vmatprep.subr.bf16.mxu0 %v2225_v3  ;;  %1858 = vmatprep.subr.bf16.mxu1 %v2225_v3 }
  0x5f   : > { %1570 = vmatmul.mubr.f32.vlgmr.msra.gmra.mrb[0].mxu0 %v503_v26  ;;  %1626 = vmatmul.mubr.f32.vlgmr.msra.gmra.mrb[0].mxu1 %v1359_v27 }
  0x60   : > { %1828 = vmatpush3.bf16.msra.mxu0 %v2225_v3  ;;  %1860 = vmatpush3.bf16.msra.mxu1 %v2225_v3  ;;  %v1395_v3 = vld [vmem:[%s2246_s12 + $0x1a8] sm:$0xff] }
  0x61   : > { %1572 = vmatprep.mubr.f32.mxu0 %v504_v28  ;;  %1628 = vmatprep.mubr.f32.mxu1 %v1360_v29 }
  0x62   : > { %1830 = vmatprep.subr.bf16.mxu0 %v2230_v5  ;;  %1862 = vmatprep.subr.bf16.mxu1 %v2230_v5 }
  0x63   : > { %1573 = vmatmul.mubr.f32.gmra.mrb[2].mxu0 %v505_v30  ;;  %1629 = vmatmul.mubr.f32.gmra.mrb[2].mxu1 %v1361_v31 }
  0x64   : > { %1832 = vmatpush3.bf16.msra.mxu0 %v2230_v5  ;;  %1864 = vmatpush3.bf16.msra.mxu1 %v2230_v5  ;;  %v1396_v5 = vld [vmem:[%s2246_s12 + $0x1b0] sm:$0xff] }
  0x65   : > { %1575 = vmatprep.mubr.f32.mxu0 %v506_v32  ;;  %1631 = vmatprep.mubr.f32.mxu1 %v1362_v33 }
  0x66   : > { %1834 = vmatprep.subr.bf16.mxu0 %v2244_v8  ;;  %1866 = vmatprep.subr.bf16.mxu1 %v2244_v8 }
  0x67   : > { %1576 = vmatmul.mubr.f32.gmra.mrb[4].mxu0 %v507_v34  ;;  %1632 = vmatmul.mubr.f32.gmra.mrb[4].mxu1 %v1363_v35 }
  0x68   : > { %1836 = vmatpush3.bf16.msra.mxu0 %v2244_v8  ;;  %1868 = vmatpush3.bf16.msra.mxu1 %v2244_v8  ;;  %v1382_v8 = vld [vmem:[%s2246_s12 + $0x140] sm:$0xff] }
  0x69   : > { %1578 = vmatprep.mubr.f32.mxu0 %v508_v36  ;;  %1634 = vmatprep.mubr.f32.mxu1 %v1364_v37 }
  0x6a   : > { %1838 = vmatprep.subr.bf16.mxu0 %v2260_v13  ;;  %1870 = vmatprep.subr.bf16.mxu1 %v2260_v13 }
  0x6b   : > { %1579 = vmatmul.mubr.f32.gmra.mrb[6].mxu0 %v509_v38  ;;  %1635 = vmatmul.mubr.f32.gmra.mrb[6].mxu1 %v1365_v39 }
  0x6c   : > { %1840 = vmatpush3.bf16.msra.mxu0 %v2260_v13  ;;  %1872 = vmatpush3.bf16.msra.mxu1 %v2260_v13  ;;  %v1400_v13 = vld [vmem:[%s2246_s12 + $0x1d0] sm:$0xff] }
  0x6d   : > { %1581 = vmatprep.mubr.f32.mxu0 %v510_v40  ;;  %1637 = vmatprep.mubr.f32.mxu1 %v1366_v41 }
  0x6e   : > { %1842 = vmatprep.subr.bf16.mxu0 %v2272_v16  ;;  %1874 = vmatprep.subr.bf16.mxu1 %v2272_v16 }
  0x6f   : > { %1582 = vmatmul.mubr.f32.gmra.mrb[8].mxu0 %v511_v42  ;;  %1638 = vmatmul.mubr.f32.gmra.mrb[8].mxu1 %v1367_v43 }
  0x70   : > { %1844 = vmatpush3.bf16.msra.mxu0 %v2272_v16  ;;  %1876 = vmatpush3.bf16.msra.mxu1 %v2272_v16  ;;  %v1386_v16 = vld [vmem:[%s2246_s12 + $0x160] sm:$0xff] }
  0x71   : > { %1584 = vmatprep.mubr.f32.mxu0 %v512_v44  ;;  %1640 = vmatprep.mubr.f32.mxu1 %v1368_v45 }
  0x72   : > { %1846 = vmatprep.subr.bf16.mxu0 %v2284_v19  ;;  %1878 = vmatprep.subr.bf16.mxu1 %v2284_v19 }
  0x73   : > { %1585 = vmatmul.mubr.f32.gmra.mrb[10].mxu0 %v513_v46  ;;  %1641 = vmatmul.mubr.f32.gmra.mrb[10].mxu1 %v1369_v47 }
  0x74   : > { %1848 = vmatpush3.bf16.msra.mxu0 %v2284_v19  ;;  %1880 = vmatpush3.bf16.msra.mxu1 %v2284_v19  ;;  %v1403_v19 = vld [vmem:[%s2246_s12 + $0x1e8] sm:$0xff] }
  0x75   : > { %1587 = vmatprep.mubr.f32.mxu0 %v514_v48  ;;  %1643 = vmatprep.mubr.f32.mxu1 %v1370_v49 }
  0x76   : > { %1850 = vmatprep.subr.bf16.mxu0 %v2296_v22  ;;  %1882 = vmatprep.subr.bf16.mxu1 %v2296_v22 }
  0x77   : > { %1588 = vmatmul.mubr.f32.gmra.mrb[12].mxu0 %v515_v50  ;;  %1644 = vmatmul.mubr.f32.gmra.mrb[12].mxu1 %v1371_v51 }
  0x78   : > { %1852 = vmatpush3.bf16.msra.mxu0 %v2296_v22  ;;  %1884 = vmatpush3.bf16.msra.mxu1 %v2296_v22  ;;  %v1389_v22 = vld [vmem:[%s2246_s12 + $0x178] sm:$0xff]  ;;  %s1355_s12 = sshll.u32 %s1983_s14, 4  ;;  %s1356_s14 = sshll.u32 %s2625_s15, 5 }
  0x79   : > { %1590 = vmatprep.mubr.f32.mxu0 %v516_v52  ;;  %1646 = vmatprep.mubr.f32.mxu1 %v1372_v53  ;;  %p479_p11 = scmp.lt.s32.totalorder %s1355_s12, 31 }
  0x7a   : > { %1854 = vmatprep.subr.bf16.mxu0 %v2308_v25  ;;  %1886 = vmatprep.subr.bf16.mxu1 %v2308_v25 }
  0x7b   : > { %1591 = vmatmul.mubr.f32.gmra.mrb[14].mxu0 %v517_v54  ;;  %1647 = vmatmul.mubr.f32.gmra.mrb[14].mxu1 %v1373_v55  ;;  %s2627_s12 = smov (!%p479_p11, %s1355_s12), 31 }
  0x7c   : > { %1856 = vmatpush3.bf16.msra.mxu0 %v2308_v25  ;;  %1888 = vmatpush3.bf16.msra.mxu1 %v2308_v25  ;;  %s482_s9 = sadd.s32 %s1356_s14, %s2627_s12 }
  0x7d   : > { %1681 = vmatprep.mubr.f32.mxu0 %v1374_v56  ;;  %1737 = vmatprep.mubr.f32.mxu1 %v1390_v57  ;;  %s1357_s21 = sshll.u32 %s482_s9, 3 }
  0x7e   : > { %s2512_s23 = scalar_lea.vmem %s2611_s3, %s1357_s21 }
  0x7f   : > { %1682 = vmatmul.mubr.f32.vlgmr.msra.gmra.mrb[16].mxu0 %v1375_v58  ;;  %1738 = vmatmul.mubr.f32.vlgmr.msra.gmra.mrb[16].mxu1 %v1391_v59 }
  0x80   : > { %1684 = vmatprep.mubr.f32.mxu0 %v1376_v60  ;;  %1740 = vmatprep.mubr.f32.mxu1 %v1392_v61 }
  0x83   : > { %1685 = vmatmul.mubr.f32.gmra.mrb[18].mxu0 %v1377_v62  ;;  %1741 = vmatmul.mubr.f32.gmra.mrb[18].mxu1 %v1393_v63 }
  0x84   : > { %1687 = vmatprep.mubr.f32.mxu0 %v1378_v0  ;;  %1743 = vmatprep.mubr.f32.mxu1 %v1394_v1 }
  0x87   : > { %1688 = vmatmul.mubr.f32.gmra.mrb[20].mxu0 %v1379_v2  ;;  %1744 = vmatmul.mubr.f32.gmra.mrb[20].mxu1 %v1395_v3 }
  0x88   : > { %1690 = vmatprep.mubr.f32.mxu0 %v1380_v4  ;;  %1746 = vmatprep.mubr.f32.mxu1 %v1396_v5 }
  0x8b   : > { %1691 = vmatmul.mubr.f32.gmra.mrb[22].mxu0 %v1381_v6  ;;  %1747 = vmatmul.mubr.f32.gmra.mrb[22].mxu1 %v1397_v7 }
  0x8c   : > { %1693 = vmatprep.mubr.f32.mxu0 %v1382_v8  ;;  %1749 = vmatprep.mubr.f32.mxu1 %v1398_v9 }
  0x8f   : > { %1694 = vmatmul.mubr.f32.gmra.mrb[24].mxu0 %v1383_v10  ;;  %1750 = vmatmul.mubr.f32.gmra.mrb[24].mxu1 %v1399_v11 }
  0x90   : > { %1696 = vmatprep.mubr.f32.mxu0 %v1384_v12  ;;  %1752 = vmatprep.mubr.f32.mxu1 %v1400_v13  ;;  %v2506_v13 = vld [vmem:[%s2610_s2] ss:$0 sm:$0xff] }
  0x93   : > { %1697 = vmatmul.mubr.f32.gmra.mrb[26].mxu0 %v1385_v14  ;;  %1753 = vmatmul.mubr.f32.gmra.mrb[26].mxu1 %v1401_v15 }
  0x94   : > { %1699 = vmatprep.mubr.f32.mxu0 %v1386_v16  ;;  %1755 = vmatprep.mubr.f32.mxu1 %v1402_v17 }
  0x97   : > { %1700 = vmatmul.mubr.f32.gmra.mrb[28].mxu0 %v1387_v18  ;;  %1756 = vmatmul.mubr.f32.gmra.mrb[28].mxu1 %v1403_v19 }
  0x98   : > { %1702 = vmatprep.mubr.f32.mxu0 %v1388_v20  ;;  %1758 = vmatprep.mubr.f32.mxu1 %v1404_v21 }
  0x9b   : > { %1703 = vmatmul.mubr.f32.gmra.mrb[30].mxu0 %v1389_v22  ;;  %1759 = vmatmul.mubr.f32.gmra.mrb[30].mxu1 %v1405_v23 }
 0x132   : > { %v2410_v24 = vpop.f32.mrb[0].mxu0  ;;  %v2412_v25 = vpop.f32.mrb[0].mxu1 }
 0x133   : > { %v1150_v26 = vmax.f32 %v2410_v24, %v2412_v25  ;;  %v584_v27 = vpop.f32.mrb[1].mxu0  ;;  %v746_v28 = vpop.f32.mrb[1].mxu1 }
 0x134   : > { %v1149_v29 = vmax.f32 %v584_v27, %v746_v28 }
 0x136   : > { %v2416_v30 = vpop.f32.mrb[2].mxu0  ;;  %v2418_v31 = vpop.f32.mrb[2].mxu1 }
 0x137   : > { %v1152_v32 = vmax.f32 %v2416_v30, %v2418_v31  ;;  %v2422_v33 = vpop.f32.mrb[3].mxu0  ;;  %v2424_v34 = vpop.f32.mrb[3].mxu1 }
 0x138   : > { %v1151_v35 = vmax.f32 %v2422_v33, %v2424_v34 }
 0x13a   : > { %v2428_v36 = vpop.f32.mrb[4].mxu0  ;;  %v2430_v37 = vpop.f32.mrb[4].mxu1 }
 0x13b   : > { %v1154_v38 = vmax.f32 %v2428_v36, %v2430_v37  ;;  %v2434_v39 = vpop.f32.mrb[5].mxu0  ;;  %v2436_v40 = vpop.f32.mrb[5].mxu1 }
 0x13c   : > { %v1153_v41 = vmax.f32 %v2434_v39, %v2436_v40 }
 0x13e   : > { %v2440_v42 = vpop.f32.mrb[6].mxu0  ;;  %v2442_v43 = vpop.f32.mrb[6].mxu1 }
 0x13f   : > { %v1156_v44 = vmax.f32 %v2440_v42, %v2442_v43  ;;  %v2446_v45 = vpop.f32.mrb[7].mxu0  ;;  %v2448_v46 = vpop.f32.mrb[7].mxu1 }
 0x140   : > { %v1155_v47 = vmax.f32 %v2446_v45, %v2448_v46 }
 0x142   : > { %v2452_v48 = vpop.f32.mrb[8].mxu0  ;;  %v2454_v49 = vpop.f32.mrb[8].mxu1 }
 0x143   : > { %v1158_v50 = vmax.f32 %v2452_v48, %v2454_v49  ;;  %v2458_v51 = vpop.f32.mrb[9].mxu0  ;;  %v2460_v52 = vpop.f32.mrb[9].mxu1 }
 0x144   : > { %v1157_v53 = vmax.f32 %v2458_v51, %v2460_v52 }
 0x146   : > { %v2464_v54 = vpop.f32.mrb[10].mxu0  ;;  %v2466_v55 = vpop.f32.mrb[10].mxu1 }
 0x147   : > { %v1160_v56 = vmax.f32 %v2464_v54, %v2466_v55  ;;  %v2470_v57 = vpop.f32.mrb[11].mxu0  ;;  %v2472_v58 = vpop.f32.mrb[11].mxu1 }
 0x148   : > { %v1159_v59 = vmax.f32 %v2470_v57, %v2472_v58 }
 0x14a   : > { %v2478_v60 = vpop.f32.mrb[12].mxu0  ;;  %v2480_v61 = vpop.f32.mrb[12].mxu1 }
 0x14b   : > { %v1162_v62 = vmax.f32 %v2478_v60, %v2480_v61  ;;  %v2484_v63 = vpop.f32.mrb[13].mxu0  ;;  %v2486_v0 = vpop.f32.mrb[13].mxu1 }
 0x14c   : > { %v1161_v1 = vmax.f32 %v2484_v63, %v2486_v0 }
 0x14e   : > { %v2491_v2 = vpop.f32.mrb[14].mxu0  ;;  %v2493_v3 = vpop.f32.mrb[14].mxu1 }
 0x14f   : > { %v1164_v4 = vmax.f32 %v2491_v2, %v2493_v3  ;;  %v2497_v5 = vpop.f32.mrb[15].mxu0  ;;  %v2499_v6 = vpop.f32.mrb[15].mxu1 }
 0x150   : > { %v1163_v7 = vmax.f32 %v2497_v5, %v2499_v6 }
 0x152   : > { %v1683_v8 = vpop.f32.mrb[16].mxu0  ;;  %v1739_v9 = vpop.f32.mrb[16].mxu1 }
 0x153   : > { %v1166_v10 = vmax.f32 %v1683_v8, %v1739_v9  ;;  %v908_v11 = vpop.f32.mrb[17].mxu0  ;;  %v1070_v12 = vpop.f32.mrb[17].mxu1 }
 0x154   : > { %v1165_v14 = vmax.f32 %v908_v11, %v1070_v12 }
 0x155   : > { %v1182_v15 = vmax.f32 %v1150_v26, %v1166_v10 }
 0x156   : > { %v1181_v16 = vmax.f32 %v1149_v29, %v1165_v14  ;;  %v1686_v17 = vpop.f32.mrb[18].mxu0  ;;  %v1742_v18 = vpop.f32.mrb[18].mxu1 }
 0x157   : > { %v1205_v19 = vadd.f32 %v2506_v13, %v1182_v15  ;;  %v1168_v20 = vmax.f32 %v1686_v17, %v1742_v18  ;;  %v918_v21 = vpop.f32.mrb[19].mxu0  ;;  %v1080_v22 = vpop.f32.mrb[19].mxu1 }
 0x158   : > { %v1204_v23 = vadd.f32 %v2506_v13, %v1181_v16  ;;  %v1167_v24 = vmax.f32 %v918_v21, %v1080_v22 }
 0x159   : > { %v1221_v25 = vmax.f32 %v1205_v19, 0.0  ;;  %v1184_v26 = vmax.f32 %v1152_v32, %v1168_v20 }
 0x15a   : > { %v1220_v27 = vmax.f32 %v1204_v23, 0.0  ;;  %v1183_v28 = vmax.f32 %v1151_v35, %v1167_v24  ;;  %v1689_v29 = vpop.f32.mrb[20].mxu0  ;;  %v1745_v8 = vpop.f32.mrb[20].mxu1 }
 0x15b   : > { %1237 = vst [vmem:[%s2512_s23 + $0x8] sm:$0xff] %v1221_v25  ;;  %v1207_v9 = vadd.f32 %v2506_v13, %v1184_v26  ;;  %v1170_v10 = vmax.f32 %v1689_v29, %v1745_v8  ;;  %v928_v11 = vpop.f32.mrb[21].mxu0  ;;  %v1090_v12 = vpop.f32.mrb[21].mxu1 }
 0x15c   : > { %1236 = vst [vmem:[%s2512_s23] sm:$0xff] %v1220_v27  ;;  %v1206_v14 = vadd.f32 %v2506_v13, %v1183_v28  ;;  %v1169_v30 = vmax.f32 %v928_v11, %v1090_v12 }
 0x15d   : > { %v1223_v31 = vmax.f32 %v1207_v9, 0.0  ;;  %v1186_v32 = vmax.f32 %v1154_v38, %v1170_v10 }
 0x15e   : > { %v1222_v33 = vmax.f32 %v1206_v14, 0.0  ;;  %v1185_v34 = vmax.f32 %v1153_v41, %v1169_v30  ;;  %v1692_v35 = vpop.f32.mrb[22].mxu0  ;;  %v1748_v15 = vpop.f32.mrb[22].mxu1 }
 0x15f   : > { %1239 = vst [vmem:[%s2512_s23 + $0x18] sm:$0xff] %v1223_v31  ;;  %v1209_v16 = vadd.f32 %v2506_v13, %v1186_v32  ;;  %v1172_v17 = vmax.f32 %v1692_v35, %v1748_v15  ;;  %v938_v18 = vpop.f32.mrb[23].mxu0  ;;  %v1100_v19 = vpop.f32.mrb[23].mxu1 }
 0x160   : > { %1238 = vst [vmem:[%s2512_s23 + $0x10] sm:$0xff] %v1222_v33  ;;  %v1208_v20 = vadd.f32 %v2506_v13, %v1185_v34  ;;  %v1171_v36 = vmax.f32 %v938_v18, %v1100_v19 }
 0x161   : > { %v1225_v37 = vmax.f32 %v1209_v16, 0.0  ;;  %v1188_v38 = vmax.f32 %v1156_v44, %v1172_v17 }
 0x162   : > { %v1224_v39 = vmax.f32 %v1208_v20, 0.0  ;;  %v1187_v40 = vmax.f32 %v1155_v47, %v1171_v36  ;;  %v1695_v41 = vpop.f32.mrb[24].mxu0  ;;  %v1751_v21 = vpop.f32.mrb[24].mxu1 }
 0x163   : > { %1241 = vst [vmem:[%s2512_s23 + $0x28] sm:$0xff] %v1225_v37  ;;  %v1211_v22 = vadd.f32 %v2506_v13, %v1188_v38  ;;  %v1174_v23 = vmax.f32 %v1695_v41, %v1751_v21  ;;  %v948_v24 = vpop.f32.mrb[25].mxu0  ;;  %v1110_v25 = vpop.f32.mrb[25].mxu1 }
 0x164   : > { %1240 = vst [vmem:[%s2512_s23 + $0x20] sm:$0xff] %v1224_v39  ;;  %v1210_v26 = vadd.f32 %v2506_v13, %v1187_v40  ;;  %v1173_v42 = vmax.f32 %v948_v24, %v1110_v25 }
 0x165   : > { %v1227_v43 = vmax.f32 %v1211_v22, 0.0  ;;  %v1190_v44 = vmax.f32 %v1158_v50, %v1174_v23 }
 0x166   : > { %v1226_v45 = vmax.f32 %v1210_v26, 0.0  ;;  %v1189_v46 = vmax.f32 %v1157_v53, %v1173_v42  ;;  %v1698_v47 = vpop.f32.mrb[26].mxu0  ;;  %v1754_v27 = vpop.f32.mrb[26].mxu1 }
 0x167   : > { %1243 = vst [vmem:[%s2512_s23 + $0x38] sm:$0xff] %v1227_v43  ;;  %v1213_v28 = vadd.f32 %v2506_v13, %v1190_v44  ;;  %v1176_v29 = vmax.f32 %v1698_v47, %v1754_v27  ;;  %v958_v8 = vpop.f32.mrb[27].mxu0  ;;  %v1120_v9 = vpop.f32.mrb[27].mxu1 }
 0x168   : > { %1242 = vst [vmem:[%s2512_s23 + $0x30] sm:$0xff] %v1226_v45  ;;  %v1212_v10 = vadd.f32 %v2506_v13, %v1189_v46  ;;  %v1175_v48 = vmax.f32 %v958_v8, %v1120_v9 }
 0x169   : > { %v1229_v49 = vmax.f32 %v1213_v28, 0.0  ;;  %v1192_v50 = vmax.f32 %v1160_v56, %v1176_v29 }
 0x16a   : > { %v1228_v51 = vmax.f32 %v1212_v10, 0.0  ;;  %v1191_v52 = vmax.f32 %v1159_v59, %v1175_v48  ;;  %v1701_v53 = vpop.f32.mrb[28].mxu0  ;;  %v1757_v11 = vpop.f32.mrb[28].mxu1 }
 0x16b   : > { %1245 = vst [vmem:[%s2512_s23 + $0x48] sm:$0xff] %v1229_v49  ;;  %v1215_v12 = vadd.f32 %v2506_v13, %v1192_v50  ;;  %v1178_v14 = vmax.f32 %v1701_v53, %v1757_v11  ;;  %v968_v30 = vpop.f32.mrb[29].mxu0  ;;  %v1130_v31 = vpop.f32.mrb[29].mxu1 }
 0x16c   : > { %1244 = vst [vmem:[%s2512_s23 + $0x40] sm:$0xff] %v1228_v51  ;;  %v1214_v32 = vadd.f32 %v2506_v13, %v1191_v52  ;;  %v1177_v54 = vmax.f32 %v968_v30, %v1130_v31 }
 0x16d   : > { %v1231_v55 = vmax.f32 %v1215_v12, 0.0  ;;  %v1194_v56 = vmax.f32 %v1162_v62, %v1178_v14 }
 0x16e   : > { %v1230_v57 = vmax.f32 %v1214_v32, 0.0  ;;  %v1193_v58 = vmax.f32 %v1161_v1, %v1177_v54  ;;  %v1704_v59 = vpop.f32.mrb[30].mxu0  ;;  %v1760_v33 = vpop.f32.mrb[30].mxu1 }
 0x16f   : > { %1247 = vst [vmem:[%s2512_s23 + $0x58] sm:$0xff] %v1231_v55  ;;  %v1217_v34 = vadd.f32 %v2506_v13, %v1194_v56  ;;  %v1180_v35 = vmax.f32 %v1704_v59, %v1760_v33  ;;  %v978_v15 = vpop.f32.mrb[31].mxu0  ;;  %v1140_v16 = vpop.f32.mrb[31].mxu1 }
 0x170   : > { %1246 = vst [vmem:[%s2512_s23 + $0x50] sm:$0xff] %v1230_v57  ;;  %v1216_v60 = vadd.f32 %v2506_v13, %v1193_v58  ;;  %v1179_v61 = vmax.f32 %v978_v15, %v1140_v16 }
 0x171   : > { %v1233_v62 = vmax.f32 %v1217_v34, 0.0  ;;  %v1196_v63 = vmax.f32 %v1164_v4, %v1180_v35 }
 0x172   : > { %v1232_v0 = vmax.f32 %v1216_v60, 0.0  ;;  %v1195_v1 = vmax.f32 %v1163_v7, %v1179_v61 }
 0x173   : > { %1249 = vst [vmem:[%s2512_s23 + $0x68] sm:$0xff] %v1233_v62  ;;  %v1219_v17 = vadd.f32 %v2506_v13, %v1196_v63 }
 0x174   : > { %1248 = vst [vmem:[%s2512_s23 + $0x60] sm:$0xff] %v1232_v0  ;;  %v1218_v18 = vadd.f32 %v2506_v13, %v1195_v1 }
 0x175   : > { %v1235_v19 = vmax.f32 %v1219_v17, 0.0 }
 0x176   : > { %v1234_v20 = vmax.f32 %v1218_v18, 0.0 }
 0x177   : > { %1251 = vst [vmem:[%s2512_s23 + $0x78] sm:$0xff] %v1235_v19 }
 0x178   : > { %1250 = vst [vmem:[%s2512_s23 + $0x70] sm:$0xff] %v1234_v20 }
 0x179 PF: > { %s13_s18 = sadd.s32 1, %s1999_s18   ;;  %s2612_s12 = smov %s1979_s13 }
 0x17a   : > { %p10_p12 = scmp.ge.s32.totalorder %s13_s18, 6   ;;  %s2613_s13 = smov %s2072_s25 }
 0x17b   : > { %s2614_s14 = smov %s1991_s16  ;;  %s2615_s15 = smov %s1995_s17 }
 0x17c   : > { %s2616_s16 = smov %s2619_s19  ;;  %s2617_s17 = smov %s2623_s20 }
 0x17d   :  { %12 = sbr.rel (!%p10_p12) target bundleno = 4 (0x4), region = 108 }

// kernel: widerface_forward.5
= control target key start
LH: loop header
LB: loop body
LE: loop exit
PB: predicated region body
PF: predicated region fallthrough
CT: control target
= control target key end

     0   :  { %s1359_s12 = smov 0   ;;  %s1361_s13 = smov 0   ;;  %s1749_s0 = inlined_call_operand.vmem [shape: f32[2,4,64,256], index: 0, kind: input, shape index: {}]   ;;  %s1750_s1 = inlined_call_operand.vmem [shape: f32[256,128], index: 1, kind: input, shape index: {}]   ;;  %s1751_s2 = inlined_call_operand.vmem [shape: f32[1,128], index: 2, kind: input, shape index: {}]   ;;  %s1752_s3 = inlined_call_operand.vmem [shape: f32[2,64,128], index: 3, kind: output, shape index: {}]  }
   0x1   :  { %s1363_s14 = smov 0  }
   0x2 LB: > { %s25_s15 = sadd.s32 1, %s1333_s13  ;;  %p881_p0 = scmp.ge.s32.totalorder %s1337_s14, 1  ;;  %s1337_s14 = sphi %s1363_s14, %s13_s14   ;;  %s1333_s13 = sphi %s1361_s13, %s1754_s13   ;;  %s1329_s12 = sphi %s1359_s12, %s1753_s12  }
   0x3   : > { %p27_p1 = scmp.ge.s32.totalorder %s25_s15, 2  ;;  %p159_p2 = scmp.lt.s32.totalorder %s1337_s14, 3 }
   0x5   : > { %s1756_s15 = smov (%p27_p1, %s25_s15), 0  ;;  %p160_p3 = pnand %p881_p0, %p159_p2 }
   0x6   : > { %v229_v0 = vld [vmem:[%s1750_s1 + $0x80] sm:$0xff] (!%p160_p3)  ;;  %v230_v1 = vld [vmem:[%s1750_s1 + $0x88] sm:$0xff] (!%p160_p3)  ;;  %p193_p4 = scmp.lt.s32.totalorder (!%p160_p3), %s1329_s12, 1  ;;  %v231_v5 = vld [vmem:[%s1750_s1 + $0x90] sm:$0xff] (!%p160_p3) }
   0x7   : > { %163 = sbr.rel (%p160_p3) target bundleno = 326 (0x146), region = 32  ;;  %v213_v2 = vld [vmem:[%s1750_s1] sm:$0xff] (!%p160_p3)  ;;  %v1386_v3 = vpack.c.bf16 (!%p160_p3), %v230_v1, %v229_v0  ;;  %v214_v4 = vld [vmem:[%s1750_s1 + $0x8] sm:$0xff] (!%p160_p3)  ;;  %v232_v6 = vld [vmem:[%s1750_s1 + $0x98] sm:$0xff] (!%p160_p3) }
   0x8   : > { %v1397_v7 = vpack.c.bf16 (!%p160_p3), %v214_v4, %v213_v2  ;;  %v1399_v8 = vpack.c.bf16 (!%p160_p3), %v232_v6, %v231_v5  ;;  %v215_v9 = vld [vmem:[%s1750_s1 + $0x10] sm:$0xff] (!%p160_p3)  ;;  %v216_v10 = vld [vmem:[%s1750_s1 + $0x18] sm:$0xff] (!%p160_p3)  ;;  %v233_v11 = vld [vmem:[%s1750_s1 + $0xa0] sm:$0xff] (!%p160_p3) }
   0x9   : > { %1164 = vmatprep.subr.bf16.mxu0 (!%p160_p3), %v1386_v3  ;;  %1196 = vmatprep.subr.bf16.mxu1 (!%p160_p3), %v1386_v3  ;;  %v234_v12 = vld [vmem:[%s1750_s1 + $0xa8] sm:$0xff] (!%p160_p3)  ;;  %v1419_v13 = vpack.c.bf16 (!%p160_p3), %v216_v10, %v215_v9  ;;  %v217_v15 = vld [vmem:[%s1750_s1 + $0x20] sm:$0xff] (!%p160_p3)  ;;  %v235_v17 = vld [vmem:[%s1750_s1 + $0xb0] sm:$0xff] (!%p160_p3) }
   0xa   : > { %1166 = vmatpush3.bf16.msra.mxu0 (!%p160_p3), %v1397_v7  ;;  %1198 = vmatpush3.bf16.msra.mxu1 (!%p160_p3), %v1397_v7  ;;  %v1424_v14 = vpack.c.bf16 (!%p160_p3), %v234_v12, %v233_v11  ;;  %v218_v16 = vld [vmem:[%s1750_s1 + $0x28] sm:$0xff] (!%p160_p3)  ;;  %v236_v18 = vld [vmem:[%s1750_s1 + $0xb8] sm:$0xff] (!%p160_p3)  ;;  %v219_v21 = vld [vmem:[%s1750_s1 + $0x30] sm:$0xff] (!%p160_p3) }
   0xb   : > { %1168 = vmatprep.subr.bf16.mxu0 (!%p160_p3), %v1399_v8  ;;  %1200 = vmatprep.subr.bf16.mxu1 (!%p160_p3), %v1399_v8  ;;  %v1445_v19 = vpack.c.bf16 (!%p160_p3), %v218_v16, %v217_v15  ;;  %v1449_v20 = vpack.c.bf16 (!%p160_p3), %v236_v18, %v235_v17  ;;  %v220_v22 = vld [vmem:[%s1750_s1 + $0x38] sm:$0xff] (!%p160_p3)  ;;  %v237_v23 = vld [vmem:[%s1750_s1 + $0xc0] sm:$0xff] (!%p160_p3)  ;;  %v238_v24 = vld [vmem:[%s1750_s1 + $0xc8] sm:$0xff] (!%p160_p3) }
   0xc   : > { %v1467_v27 = vpack.c.bf16 (!%p160_p3), %v220_v22, %v219_v21  ;;  %v1471_v28 = vpack.c.bf16 (!%p160_p3), %v238_v24, %v237_v23  ;;  %v221_v29 = vld [vmem:[%s1750_s1 + $0x40] sm:$0xff] (!%p160_p3)  ;;  %v222_v30 = vld [vmem:[%s1750_s1 + $0x48] sm:$0xff] (!%p160_p3)  ;;  %v239_v31 = vld [vmem:[%s1750_s1 + $0xd0] sm:$0xff] (!%p160_p3) }
   0xd   : > { %v240_v32 = vld [vmem:[%s1750_s1 + $0xd8] sm:$0xff] (!%p160_p3)  ;;  %v1487_v33 = vpack.c.bf16 (!%p160_p3), %v222_v30, %v221_v29  ;;  %v223_v35 = vld [vmem:[%s1750_s1 + $0x50] sm:$0xff] (!%p160_p3)  ;;  %v241_v37 = vld [vmem:[%s1750_s1 + $0xe0] sm:$0xff] (!%p160_p3) }
   0xe   : > { %s1758_s12 = smov (!%p193_p4, %s1329_s12), 1  ;;  %1170 = vmatpush3.bf16.msra.mxu0 %v1419_v13  ;;  %1202 = vmatpush3.bf16.msra.mxu1 %v1419_v13  ;;  %v1491_v34 = vpack.c.bf16 %v240_v32, %v239_v31  ;;  %v224_v36 = vld [vmem:[%s1750_s1 + $0x58] sm:$0xff]  ;;  %v242_v38 = vld [vmem:[%s1750_s1 + $0xe8] sm:$0xff]  ;;  %v225_v41 = vld [vmem:[%s1750_s1 + $0x60] sm:$0xff] }
   0xf   : > { %s937_s9 = sshll.u32 %s1758_s12, 9  ;;  %1172 = vmatprep.subr.bf16.mxu0 %v1424_v14  ;;  %1204 = vmatprep.subr.bf16.mxu1 %v1424_v14  ;;  %v1507_v39 = vpack.c.bf16 %v224_v36, %v223_v35  ;;  %v1511_v40 = vpack.c.bf16 %v242_v38, %v241_v37  ;;  %v226_v42 = vld [vmem:[%s1750_s1 + $0x68] sm:$0xff]  ;;  %v243_v43 = vld [vmem:[%s1750_s1 + $0xf0] sm:$0xff]  ;;  %v244_v44 = vld [vmem:[%s1750_s1 + $0xf8] sm:$0xff]  ;;  %s938_s17 = sshll.u32 %s1758_s12, 6 }
  0x10   : > { %s1441_s24 = scalar_lea.vmem %s1749_s0, %s937_s9  ;;  %v1527_v45 = vpack.c.bf16 %v226_v42, %v225_v41  ;;  %v1531_v46 = vpack.c.bf16 %v244_v44, %v243_v43  ;;  %v227_v47 = vld [vmem:[%s1750_s1 + $0x70] sm:$0xff]  ;;  %v228_v48 = vld [vmem:[%s1750_s1 + $0x78] sm:$0xff]  ;;  %s1702_s20 = scalar_lea.vmem %s1752_s3, %s938_s17 }
  0x11   : > { %v246_v25 = vld [vmem:[%s1441_s24 + $0x8] sm:$0xff]  ;;  %v1541_v49 = vpack.c.bf16 %v228_v48, %v227_v47  ;;  %v245_v50 = vld [vmem:[%s1441_s24] sm:$0xff]  ;;  %v248_v52 = vld [vmem:[%s1441_s24 + $0x18] sm:$0xff] }
  0x12   : > { %325 = vmatprep.mubr.f32.mxu0 %v246_v25  ;;  %v887_v26 = vld [vmem:[%s1441_s24 + $0x88] sm:$0xff]  ;;  %1174 = vmatpush3.bf16.msra.mxu0 %v1445_v19  ;;  %v886_v51 = vld [vmem:[%s1441_s24 + $0x80] sm:$0xff]  ;;  %v889_v53 = vld [vmem:[%s1441_s24 + $0x98] sm:$0xff] }
  0x13   : > { %1206 = vmatpush3.bf16.msra.mxu1 %v1445_v19  ;;  %1176 = vmatprep.subr.bf16.mxu0 %v1449_v20  ;;  %v247_v54 = vld [vmem:[%s1441_s24 + $0x10] sm:$0xff]  ;;  %v250_v56 = vld [vmem:[%s1441_s24 + $0x28] sm:$0xff]  ;;  %v249_v58 = vld [vmem:[%s1441_s24 + $0x20] sm:$0xff] }
  0x14   : > { %1208 = vmatprep.subr.bf16.mxu1 %v1449_v20  ;;  %447 = vmatprep.mubr.f32.mxu1 %v887_v26  ;;  %v888_v55 = vld [vmem:[%s1441_s24 + $0x90] sm:$0xff]  ;;  %v891_v57 = vld [vmem:[%s1441_s24 + $0xa8] sm:$0xff]  ;;  %v890_v59 = vld [vmem:[%s1441_s24 + $0xa0] sm:$0xff] }
  0x15   : > { %v252_v60 = vld [vmem:[%s1441_s24 + $0x38] sm:$0xff]  ;;  %v251_v62 = vld [vmem:[%s1441_s24 + $0x30] sm:$0xff]  ;;  %v254_v0 = vld [vmem:[%s1441_s24 + $0x48] sm:$0xff] }
  0x16   : > { %1178 = vmatpush3.bf16.msra.mxu0 %v1467_v27  ;;  %v893_v61 = vld [vmem:[%s1441_s24 + $0xb8] sm:$0xff]  ;;  %v892_v63 = vld [vmem:[%s1441_s24 + $0xb0] sm:$0xff]  ;;  %v895_v1 = vld [vmem:[%s1441_s24 + $0xc8] sm:$0xff] }
  0x17   : > { %1210 = vmatpush3.bf16.msra.mxu1 %v1467_v27  ;;  %1180 = vmatprep.subr.bf16.mxu0 %v1471_v28  ;;  %v253_v2 = vld [vmem:[%s1441_s24 + $0x40] sm:$0xff]  ;;  %v256_v4 = vld [vmem:[%s1441_s24 + $0x58] sm:$0xff]  ;;  %v255_v6 = vld [vmem:[%s1441_s24 + $0x50] sm:$0xff] }
  0x18   : > { %1212 = vmatprep.subr.bf16.mxu1 %v1471_v28  ;;  %v897_v5 = vld [vmem:[%s1441_s24 + $0xd8] sm:$0xff]  ;;  %v899_v9 = vld [vmem:[%s1441_s24 + $0xe8] sm:$0xff]  ;;  %v257_v10 = vld [vmem:[%s1441_s24 + $0x60] sm:$0xff] }
  0x19   : > { %v898_v11 = vld [vmem:[%s1441_s24 + $0xe0] sm:$0xff]  ;;  %v260_v12 = vld [vmem:[%s1441_s24 + $0x78] sm:$0xff]  ;;  %v900_v15 = vld [vmem:[%s1441_s24 + $0xf0] sm:$0xff] }
  0x1a   : > { %1182 = vmatpush3.bf16.msra.mxu0 %v1487_v33  ;;  %v903_v16 = vld [vmem:[%s1441_s24 + $0x108] sm:$0xff]  ;;  %v902_v18 = vld [vmem:[%s1441_s24 + $0x100] sm:$0xff]  ;;  %v921_v21 = vld [vmem:[%s1441_s24 + $0x198] sm:$0xff] }
  0x1b   : > { %1214 = vmatpush3.bf16.msra.mxu1 %v1487_v33  ;;  %1184 = vmatprep.subr.bf16.mxu0 %v1491_v34  ;;  %v919_v17 = vld [vmem:[%s1441_s24 + $0x188] sm:$0xff]  ;;  %v904_v22 = vld [vmem:[%s1441_s24 + $0x110] sm:$0xff]  ;;  %v906_v26 = vld [vmem:[%s1441_s24 + $0x120] sm:$0xff] }
  0x1c   : > { %1216 = vmatprep.subr.bf16.mxu1 %v1491_v34  ;;  %v920_v23 = vld [vmem:[%s1441_s24 + $0x190] sm:$0xff]  ;;  %v907_v24 = vld [vmem:[%s1441_s24 + $0x128] sm:$0xff]  ;;  %v925_v29 = vld [vmem:[%s1441_s24 + $0x1b8] sm:$0xff] }
  0x1d   : > { %v923_v25 = vld [vmem:[%s1441_s24 + $0x1a8] sm:$0xff]  ;;  %v908_v30 = vld [vmem:[%s1441_s24 + $0x130] sm:$0xff]  ;;  %v926_v35 = vld [vmem:[%s1441_s24 + $0x1c0] sm:$0xff] }
  0x1e   : > { %1186 = vmatpush3.bf16.msra.mxu0 %v1507_v39  ;;  %v924_v31 = vld [vmem:[%s1441_s24 + $0x1b0] sm:$0xff]  ;;  %v911_v32 = vld [vmem:[%s1441_s24 + $0x148] sm:$0xff]  ;;  %v913_v36 = vld [vmem:[%s1441_s24 + $0x158] sm:$0xff] }
  0x1f   : > { %1218 = vmatpush3.bf16.msra.mxu1 %v1507_v39  ;;  %1188 = vmatprep.subr.bf16.mxu0 %v1511_v40  ;;  %v929_v37 = vld [vmem:[%s1441_s24 + $0x1d8] sm:$0xff]  ;;  %v912_v38 = vld [vmem:[%s1441_s24 + $0x150] sm:$0xff]  ;;  %v931_v41 = vld [vmem:[%s1441_s24 + $0x1e8] sm:$0xff] }
  0x20   : > { %1220 = vmatprep.subr.bf16.mxu1 %v1511_v40  ;;  %v914_v42 = vld [vmem:[%s1441_s24 + $0x160] sm:$0xff]  ;;  %v917_v44 = vld [vmem:[%s1441_s24 + $0x178] sm:$0xff]  ;;  %v932_v47 = vld [vmem:[%s1441_s24 + $0x1f0] sm:$0xff] }
  0x21   : > { %v930_v43 = vld [vmem:[%s1441_s24 + $0x1e0] sm:$0xff] }
  0x22   : > { %1190 = vmatpush3.bf16.msra.mxu0 %v1527_v45 }
  0x23   : > { %1222 = vmatpush3.bf16.msra.mxu1 %v1527_v45  ;;  %1192 = vmatprep.subr.bf16.mxu0 %v1531_v46 }
  0x24   : > { %1224 = vmatprep.subr.bf16.mxu1 %v1531_v46 }
  0x26   : > { %1194 = vmatpush3.bf16.msra.mxu0 %v1541_v49 }
  0x27   : > { %1226 = vmatpush3.bf16.msra.mxu1 %v1541_v49  ;;  %1228 = vmatprep.subr.bf16.mxu0 %v1386_v3 }
  0x28   : > { %1260 = vmatprep.subr.bf16.mxu1 %v1386_v3  ;;  %v894_v3 = vld [vmem:[%s1441_s24 + $0xc0] sm:$0xff] }
  0x29   : > { %326 = vmatmul.mubr.f32.vlgmr.msra.gmra.mrb[0].mxu0 %v245_v50 }
  0x2a   : > { %448 = vmatmul.mubr.f32.vlgmr.msra.gmra.mrb[0].mxu1 %v886_v51  ;;  %1230 = vmatpush3.bf16.msra.mxu0 %v1397_v7 }
  0x2b   : > { %1262 = vmatpush3.bf16.msra.mxu1 %v1397_v7  ;;  %330 = vmatprep.mubr.f32.mxu0 %v248_v52  ;;  %v896_v7 = vld [vmem:[%s1441_s24 + $0xd0] sm:$0xff] }
  0x2c   : > { %452 = vmatprep.mubr.f32.mxu1 %v889_v53  ;;  %1232 = vmatprep.subr.bf16.mxu0 %v1399_v8 }
  0x2d   : > { %1264 = vmatprep.subr.bf16.mxu1 %v1399_v8  ;;  %331 = vmatmul.mubr.f32.gmra.mrb[2].mxu0 %v247_v54  ;;  %v258_v8 = vld [vmem:[%s1441_s24 + $0x68] sm:$0xff] }
  0x2e   : > { %453 = vmatmul.mubr.f32.gmra.mrb[2].mxu1 %v888_v55  ;;  %1234 = vmatpush3.bf16.msra.mxu0 %v1419_v13 }
  0x2f   : > { %1266 = vmatpush3.bf16.msra.mxu1 %v1419_v13  ;;  %335 = vmatprep.mubr.f32.mxu0 %v250_v56  ;;  %v901_v13 = vld [vmem:[%s1441_s24 + $0xf8] sm:$0xff] }
  0x30   : > { %457 = vmatprep.mubr.f32.mxu1 %v891_v57  ;;  %1236 = vmatprep.subr.bf16.mxu0 %v1424_v14 }
  0x31   : > { %1268 = vmatprep.subr.bf16.mxu1 %v1424_v14  ;;  %336 = vmatmul.mubr.f32.gmra.mrb[4].mxu0 %v249_v58  ;;  %v259_v14 = vld [vmem:[%s1441_s24 + $0x70] sm:$0xff] }
  0x32   : > { %458 = vmatmul.mubr.f32.gmra.mrb[4].mxu1 %v890_v59  ;;  %1238 = vmatpush3.bf16.msra.mxu0 %v1445_v19 }
  0x33   : > { %1270 = vmatpush3.bf16.msra.mxu1 %v1445_v19  ;;  %340 = vmatprep.mubr.f32.mxu0 %v252_v60  ;;  %v918_v19 = vld [vmem:[%s1441_s24 + $0x180] sm:$0xff] }
  0x34   : > { %462 = vmatprep.mubr.f32.mxu1 %v893_v61  ;;  %1240 = vmatprep.subr.bf16.mxu0 %v1449_v20 }
  0x35   : > { %1272 = vmatprep.subr.bf16.mxu1 %v1449_v20  ;;  %341 = vmatmul.mubr.f32.gmra.mrb[6].mxu0 %v251_v62  ;;  %v905_v20 = vld [vmem:[%s1441_s24 + $0x118] sm:$0xff] }
  0x36   : > { %463 = vmatmul.mubr.f32.gmra.mrb[6].mxu1 %v892_v63  ;;  %1242 = vmatpush3.bf16.msra.mxu0 %v1467_v27 }
  0x37   : > { %1274 = vmatpush3.bf16.msra.mxu1 %v1467_v27  ;;  %345 = vmatprep.mubr.f32.mxu0 %v254_v0  ;;  %v922_v27 = vld [vmem:[%s1441_s24 + $0x1a0] sm:$0xff] }
  0x38   : > { %467 = vmatprep.mubr.f32.mxu1 %v895_v1  ;;  %1244 = vmatprep.subr.bf16.mxu0 %v1471_v28 }
  0x39   : > { %1276 = vmatprep.subr.bf16.mxu1 %v1471_v28  ;;  %346 = vmatmul.mubr.f32.gmra.mrb[8].mxu0 %v253_v2  ;;  %v909_v28 = vld [vmem:[%s1441_s24 + $0x138] sm:$0xff] }
  0x3a   : > { %468 = vmatmul.mubr.f32.gmra.mrb[8].mxu1 %v894_v3  ;;  %1246 = vmatpush3.bf16.msra.mxu0 %v1487_v33 }
  0x3b   : > { %1278 = vmatpush3.bf16.msra.mxu1 %v1487_v33  ;;  %350 = vmatprep.mubr.f32.mxu0 %v256_v4  ;;  %v927_v33 = vld [vmem:[%s1441_s24 + $0x1c8] sm:$0xff] }
  0x3c   : > { %472 = vmatprep.mubr.f32.mxu1 %v897_v5  ;;  %1248 = vmatprep.subr.bf16.mxu0 %v1491_v34 }
  0x3d   : > { %1280 = vmatprep.subr.bf16.mxu1 %v1491_v34  ;;  %351 = vmatmul.mubr.f32.gmra.mrb[10].mxu0 %v255_v6  ;;  %v910_v34 = vld [vmem:[%s1441_s24 + $0x140] sm:$0xff] }
  0x3e   : > { %473 = vmatmul.mubr.f32.gmra.mrb[10].mxu1 %v896_v7  ;;  %1250 = vmatpush3.bf16.msra.mxu0 %v1507_v39 }
  0x3f   : > { %1282 = vmatpush3.bf16.msra.mxu1 %v1507_v39  ;;  %355 = vmatprep.mubr.f32.mxu0 %v258_v8  ;;  %v928_v39 = vld [vmem:[%s1441_s24 + $0x1d0] sm:$0xff] }
  0x40   : > { %477 = vmatprep.mubr.f32.mxu1 %v899_v9  ;;  %1252 = vmatprep.subr.bf16.mxu0 %v1511_v40 }
  0x41   : > { %1284 = vmatprep.subr.bf16.mxu1 %v1511_v40  ;;  %356 = vmatmul.mubr.f32.gmra.mrb[12].mxu0 %v257_v10  ;;  %v915_v40 = vld [vmem:[%s1441_s24 + $0x168] sm:$0xff] }
  0x42   : > { %478 = vmatmul.mubr.f32.gmra.mrb[12].mxu1 %v898_v11  ;;  %1254 = vmatpush3.bf16.msra.mxu0 %v1527_v45 }
  0x43   : > { %1286 = vmatpush3.bf16.msra.mxu1 %v1527_v45  ;;  %360 = vmatprep.mubr.f32.mxu0 %v260_v12  ;;  %v933_v45 = vld [vmem:[%s1441_s24 + $0x1f8] sm:$0xff] }
  0x44   : > { %482 = vmatprep.mubr.f32.mxu1 %v901_v13  ;;  %1256 = vmatprep.subr.bf16.mxu0 %v1531_v46 }
  0x45   : > { %1288 = vmatprep.subr.bf16.mxu1 %v1531_v46  ;;  %361 = vmatmul.mubr.f32.gmra.mrb[14].mxu0 %v259_v14  ;;  %v916_v46 = vld [vmem:[%s1441_s24 + $0x170] sm:$0xff] }
  0x46   : > { %483 = vmatmul.mubr.f32.gmra.mrb[14].mxu1 %v900_v15  ;;  %1258 = vmatpush3.bf16.msra.mxu0 %v1541_v49 }
  0x47   : > { %1290 = vmatpush3.bf16.msra.mxu1 %v1541_v49  ;;  %569 = vmatprep.mubr.f32.mxu0 %v903_v16 }
  0x48   : > { %691 = vmatprep.mubr.f32.mxu1 %v919_v17 }
  0x49   : > { %570 = vmatmul.mubr.f32.vlgmr.msra.gmra.mrb[16].mxu0 %v902_v18 }
  0x4a   : > { %692 = vmatmul.mubr.f32.vlgmr.msra.gmra.mrb[16].mxu1 %v918_v19  ;;  %574 = vmatprep.mubr.f32.mxu0 %v905_v20 }
  0x4b   : > { %696 = vmatprep.mubr.f32.mxu1 %v921_v21 }
  0x4d   : > { %575 = vmatmul.mubr.f32.gmra.mrb[18].mxu0 %v904_v22 }
  0x4e   : > { %697 = vmatmul.mubr.f32.gmra.mrb[18].mxu1 %v920_v23  ;;  %579 = vmatprep.mubr.f32.mxu0 %v907_v24 }
  0x4f   : > { %701 = vmatprep.mubr.f32.mxu1 %v923_v25 }
  0x51   : > { %580 = vmatmul.mubr.f32.gmra.mrb[20].mxu0 %v906_v26 }
  0x52   : > { %702 = vmatmul.mubr.f32.gmra.mrb[20].mxu1 %v922_v27  ;;  %584 = vmatprep.mubr.f32.mxu0 %v909_v28 }
  0x53   : > { %706 = vmatprep.mubr.f32.mxu1 %v925_v29 }
  0x55   : > { %585 = vmatmul.mubr.f32.gmra.mrb[22].mxu0 %v908_v30 }
  0x56   : > { %707 = vmatmul.mubr.f32.gmra.mrb[22].mxu1 %v924_v31  ;;  %589 = vmatprep.mubr.f32.mxu0 %v911_v32 }
  0x57   : > { %711 = vmatprep.mubr.f32.mxu1 %v927_v33 }
  0x59   : > { %590 = vmatmul.mubr.f32.gmra.mrb[24].mxu0 %v910_v34 }
  0x5a   : > { %712 = vmatmul.mubr.f32.gmra.mrb[24].mxu1 %v926_v35  ;;  %594 = vmatprep.mubr.f32.mxu0 %v913_v36 }
  0x5b   : > { %716 = vmatprep.mubr.f32.mxu1 %v929_v37 }
  0x5d   : > { %595 = vmatmul.mubr.f32.gmra.mrb[26].mxu0 %v912_v38 }
  0x5e   : > { %717 = vmatmul.mubr.f32.gmra.mrb[26].mxu1 %v928_v39  ;;  %599 = vmatprep.mubr.f32.mxu0 %v915_v40 }
  0x5f   : > { %721 = vmatprep.mubr.f32.mxu1 %v931_v41 }
  0x61   : > { %600 = vmatmul.mubr.f32.gmra.mrb[28].mxu0 %v914_v42 }
  0x62   : > { %722 = vmatmul.mubr.f32.gmra.mrb[28].mxu1 %v930_v43  ;;  %604 = vmatprep.mubr.f32.mxu0 %v917_v44 }
  0x63   : > { %726 = vmatprep.mubr.f32.mxu1 %v933_v45 }
  0x65   : > { %605 = vmatmul.mubr.f32.gmra.mrb[30].mxu0 %v916_v46 }
  0x66   : > { %727 = vmatmul.mubr.f32.gmra.mrb[30].mxu1 %v932_v47 }
  0xfc   : > { %v971_v48 = vpop.f32.mrb[0].mxu0 }
  0xfd   : > { %v1027_v49 = vpop.f32.mrb[0].mxu1  ;;  %v972_v50 = vpop.f32.mrb[1].mxu0 }
  0xfe   : > { %v1028_v51 = vpop.f32.mrb[1].mxu1  ;;  %v1641_v52 = vadd.f32 %v972_v50, %v971_v48 }
  0xff   : > { %v1643_v53 = vadd.f32 %v1028_v51, %v1027_v49  ;;  %v1692_v49 = vld [vmem:[%s1751_s2] ss:$0 sm:$0xff] }
 0x100   : > { %v974_v55 = vpop.f32.mrb[2].mxu0 }
 0x101   : > { %v732_v54 = vmax.f32 %v1641_v52, %v1643_v53  ;;  %v1030_v56 = vpop.f32.mrb[2].mxu1  ;;  %v975_v57 = vpop.f32.mrb[3].mxu0 }
 0x102   : > { %v1031_v58 = vpop.f32.mrb[3].mxu1  ;;  %v1647_v59 = vadd.f32 %v975_v57, %v974_v55 }
 0x103   : > { %v1649_v60 = vadd.f32 %v1031_v58, %v1030_v56 }
 0x104   : > { %v977_v62 = vpop.f32.mrb[4].mxu0 }
 0x105   : > { %v733_v61 = vmax.f32 %v1647_v59, %v1649_v60  ;;  %v1033_v63 = vpop.f32.mrb[4].mxu1  ;;  %v978_v0 = vpop.f32.mrb[5].mxu0 }
 0x106   : > { %v1034_v1 = vpop.f32.mrb[5].mxu1  ;;  %v1653_v2 = vadd.f32 %v978_v0, %v977_v62 }
 0x107   : > { %v1655_v3 = vadd.f32 %v1034_v1, %v1033_v63 }
 0x108   : > { %v980_v5 = vpop.f32.mrb[6].mxu0 }
 0x109   : > { %v734_v4 = vmax.f32 %v1653_v2, %v1655_v3  ;;  %v1036_v6 = vpop.f32.mrb[6].mxu1  ;;  %v981_v7 = vpop.f32.mrb[7].mxu0 }
 0x10a   : > { %v1037_v8 = vpop.f32.mrb[7].mxu1  ;;  %v1659_v9 = vadd.f32 %v981_v7, %v980_v5 }
 0x10b   : > { %v1661_v10 = vadd.f32 %v1037_v8, %v1036_v6 }
 0x10c   : > { %v983_v12 = vpop.f32.mrb[8].mxu0 }
 0x10d   : > { %v735_v11 = vmax.f32 %v1659_v9, %v1661_v10  ;;  %v1039_v13 = vpop.f32.mrb[8].mxu1  ;;  %v984_v14 = vpop.f32.mrb[9].mxu0 }
 0x10e   : > { %v1040_v15 = vpop.f32.mrb[9].mxu1  ;;  %v1665_v16 = vadd.f32 %v984_v14, %v983_v12 }
 0x10f   : > { %v1667_v17 = vadd.f32 %v1040_v15, %v1039_v13 }
 0x110   : > { %v986_v19 = vpop.f32.mrb[10].mxu0 }
 0x111   : > { %v736_v18 = vmax.f32 %v1665_v16, %v1667_v17  ;;  %v1042_v20 = vpop.f32.mrb[10].mxu1  ;;  %v987_v21 = vpop.f32.mrb[11].mxu0 }
 0x112   : > { %v1043_v22 = vpop.f32.mrb[11].mxu1  ;;  %v1671_v23 = vadd.f32 %v987_v21, %v986_v19 }
 0x113   : > { %v1673_v24 = vadd.f32 %v1043_v22, %v1042_v20 }
 0x114   : > { %v989_v26 = vpop.f32.mrb[12].mxu0 }
 0x115   : > { %v737_v25 = vmax.f32 %v1671_v23, %v1673_v24  ;;  %v1045_v27 = vpop.f32.mrb[12].mxu1  ;;  %v990_v28 = vpop.f32.mrb[13].mxu0 }
 0x116   : > { %v1046_v29 = vpop.f32.mrb[13].mxu1  ;;  %v1677_v30 = vadd.f32 %v990_v28, %v989_v26 }
 0x117   : > { %v1679_v31 = vadd.f32 %v1046_v29, %v1045_v27 }
 0x118   : > { %v992_v33 = vpop.f32.mrb[14].mxu0 }
 0x119   : > { %v738_v32 = vmax.f32 %v1677_v30, %v1679_v31  ;;  %v1048_v34 = vpop.f32.mrb[14].mxu1  ;;  %v993_v35 = vpop.f32.mrb[15].mxu0 }
 0x11a   : > { %v1049_v36 = vpop.f32.mrb[15].mxu1  ;;  %v1683_v37 = vadd.f32 %v993_v35, %v992_v33 }
 0x11b   : > { %v1685_v38 = vadd.f32 %v1049_v36, %v1048_v34 }
 0x11c   : > { %v1083_v40 = vpop.f32.mrb[16].mxu0 }
 0x11d   : > { %v739_v39 = vmax.f32 %v1683_v37, %v1685_v38  ;;  %v1139_v41 = vpop.f32.mrb[16].mxu1  ;;  %v1084_v42 = vpop.f32.mrb[17].mxu0 }
 0x11e   : > { %v1140_v43 = vpop.f32.mrb[17].mxu1  ;;  %v1085_v44 = vadd.f32 %v1084_v42, %v1083_v40 }
 0x11f   : > { %v1141_v45 = vadd.f32 %v1140_v43, %v1139_v41 }
 0x120   : > { %v1086_v47 = vpop.f32.mrb[18].mxu0 }
 0x121   : > { %v740_v46 = vmax.f32 %v1085_v44, %v1141_v45  ;;  %v1142_v48 = vpop.f32.mrb[18].mxu1  ;;  %v1087_v50 = vpop.f32.mrb[19].mxu0 }
 0x122   : > { %v1143_v51 = vpop.f32.mrb[19].mxu1  ;;  %v1088_v56 = vadd.f32 %v1087_v50, %v1086_v47 }
 0x123   : > { %v748_v55 = vmax.f32 %v732_v54, %v740_v46  ;;  %v1144_v57 = vadd.f32 %v1143_v51, %v1142_v48 }
 0x124   : > { %v1089_v63 = vpop.f32.mrb[20].mxu0 }
 0x125   : > { %v763_v58 = vadd.f32 %v1692_v49, %v748_v55  ;;  %v741_v62 = vmax.f32 %v1088_v56, %v1144_v57  ;;  %v1145_v0 = vpop.f32.mrb[20].mxu1  ;;  %v1090_v1 = vpop.f32.mrb[21].mxu0 }
 0x126   : > { %v1146_v5 = vpop.f32.mrb[21].mxu1  ;;  %v1091_v53 = vadd.f32 %v1090_v1, %v1089_v63 }
 0x127   : > { %v771_v6 = vmax.f32 %v763_v58, 0.0  ;;  %v749_v52 = vmax.f32 %v733_v61, %v741_v62  ;;  %v1147_v54 = vadd.f32 %v1146_v5, %v1145_v0 }
 0x128   : > { %v1092_v12 = vpop.f32.mrb[22].mxu0 }
 0x129   : > { %779 = vst [vmem:[%s1702_s20] sm:$0xff] %v771_v6  ;;  %v764_v7 = vadd.f32 %v1692_v49, %v749_v52  ;;  %v742_v8 = vmax.f32 %v1091_v53, %v1147_v54  ;;  %v1148_v13 = vpop.f32.mrb[22].mxu1  ;;  %v1093_v14 = vpop.f32.mrb[23].mxu0 }
 0x12a   : > { %v1149_v15 = vpop.f32.mrb[23].mxu1  ;;  %v1094_v21 = vadd.f32 %v1093_v14, %v1092_v12 }
 0x12b   : > { %v772_v19 = vmax.f32 %v764_v7, 0.0  ;;  %v750_v20 = vmax.f32 %v734_v4, %v742_v8  ;;  %v1150_v22 = vadd.f32 %v1149_v15, %v1148_v13 }
 0x12c   : > { %v1095_v61 = vpop.f32.mrb[24].mxu0 }
 0x12d   : > { %780 = vst [vmem:[%s1702_s20 + $0x8] sm:$0xff] %v772_v19  ;;  %v765_v59 = vadd.f32 %v1692_v49, %v750_v20  ;;  %v743_v60 = vmax.f32 %v1094_v21, %v1150_v22  ;;  %v1151_v26 = vpop.f32.mrb[24].mxu1  ;;  %v1096_v27 = vpop.f32.mrb[25].mxu0 }
 0x12e   : > { %v1152_v28 = vpop.f32.mrb[25].mxu1  ;;  %v1097_v34 = vadd.f32 %v1096_v27, %v1095_v61 }
 0x12f   : > { %v773_v29 = vmax.f32 %v765_v59, 0.0  ;;  %v751_v33 = vmax.f32 %v735_v11, %v743_v60  ;;  %v1153_v35 = vadd.f32 %v1152_v28, %v1151_v26 }
 0x130   : > { %v1098_v4 = vpop.f32.mrb[26].mxu0 }
 0x131   : > { %781 = vst [vmem:[%s1702_s20 + $0x10] sm:$0xff] %v773_v29  ;;  %v766_v2 = vadd.f32 %v1692_v49, %v751_v33  ;;  %v744_v3 = vmax.f32 %v1097_v34, %v1153_v35  ;;  %v1154_v36 = vpop.f32.mrb[26].mxu1  ;;  %v1099_v40 = vpop.f32.mrb[27].mxu0 }
 0x132   : > { %v1155_v41 = vpop.f32.mrb[27].mxu1  ;;  %v1100_v44 = vadd.f32 %v1099_v40, %v1098_v4 }
 0x133   : > { %v774_v42 = vmax.f32 %v766_v2, 0.0  ;;  %v752_v43 = vmax.f32 %v736_v18, %v744_v3  ;;  %v1156_v45 = vadd.f32 %v1155_v41, %v1154_v36 }
 0x134   : > { %v1101_v11 = vpop.f32.mrb[28].mxu0 }
 0x135   : > { %782 = vst [vmem:[%s1702_s20 + $0x18] sm:$0xff] %v774_v42  ;;  %v767_v9 = vadd.f32 %v1692_v49, %v752_v43  ;;  %v745_v10 = vmax.f32 %v1100_v44, %v1156_v45  ;;  %v1157_v46 = vpop.f32.mrb[28].mxu1  ;;  %v1102_v47 = vpop.f32.mrb[29].mxu0 }
 0x136   : > { %v1158_v48 = vpop.f32.mrb[29].mxu1  ;;  %v1103_v55 = vadd.f32 %v1102_v47, %v1101_v11 }
 0x137   : > { %v775_v50 = vmax.f32 %v767_v9, 0.0  ;;  %v753_v51 = vmax.f32 %v737_v25, %v745_v10  ;;  %v1159_v56 = vadd.f32 %v1158_v48, %v1157_v46 }
 0x138   : > { %v1104_v18 = vpop.f32.mrb[30].mxu0 }
 0x139   : > { %783 = vst [vmem:[%s1702_s20 + $0x20] sm:$0xff] %v775_v50  ;;  %v768_v16 = vadd.f32 %v1692_v49, %v753_v51  ;;  %v746_v17 = vmax.f32 %v1103_v55, %v1159_v56  ;;  %v1160_v57 = vpop.f32.mrb[30].mxu1  ;;  %v1105_v58 = vpop.f32.mrb[31].mxu0 }
 0x13a   : > { %v1161_v62 = vpop.f32.mrb[31].mxu1  ;;  %v1106_v1 = vadd.f32 %v1105_v58, %v1104_v18 }
 0x13b   : > { %v776_v63 = vmax.f32 %v768_v16, 0.0  ;;  %v754_v0 = vmax.f32 %v738_v32, %v746_v17  ;;  %v1162_v23 = vadd.f32 %v1161_v62, %v1160_v57 }
 0x13d   : > { %784 = vst [vmem:[%s1702_s20 + $0x28] sm:$0xff] %v776_v63  ;;  %v769_v24 = vadd.f32 %v1692_v49, %v754_v0  ;;  %v747_v25 = vmax.f32 %v1106_v1, %v1162_v23 }
 0x13f   : > { %v777_v5 = vmax.f32 %v769_v24, 0.0  ;;  %v755_v6 = vmax.f32 %v739_v39, %v747_v25 }
 0x141   : > { %785 = vst [vmem:[%s1702_s20 + $0x30] sm:$0xff] %v777_v5  ;;  %v770_v52 = vadd.f32 %v1692_v49, %v755_v6 }
 0x143   : > { %v778_v53 = vmax.f32 %v770_v52, 0.0 }
 0x145   : > { %786 = vst [vmem:[%s1702_s20 + $0x38] sm:$0xff] %v778_v53 }
 0x146 PF: > { %s13_s14 = sadd.s32 1, %s1337_s14   ;;  %s1753_s12 = smov %s1333_s13 }
 0x147   : > { %p10_p5 = scmp.ge.s32.totalorder %s13_s14, 4   ;;  %s1754_s13 = smov %s1756_s15 }
 0x149   :  { %12 = sbr.rel (!%p10_p5) target bundleno = 2 (0x2), region = 65 }

// kernel: widerface_forward.6
= control target key start
LH: loop header
LB: loop body
LE: loop exit
PB: predicated region body
PF: predicated region fallthrough
CT: control target
= control target key end

     0   :  { %s1687_s12 = smov 0   ;;  %s1689_s13 = smov 0   ;;  %s2151_s0 = inlined_call_operand.vmem [shape: f32[2,4,16,512], index: 0, kind: input, shape index: {}]   ;;  %s2152_s1 = inlined_call_operand.vmem [shape: f32[512,128], index: 1, kind: input, shape index: {}]   ;;  %s2153_s2 = inlined_call_operand.vmem [shape: f32[1,128], index: 2, kind: input, shape index: {}]   ;;  %s2154_s3 = inlined_call_operand.vmem [shape: f32[2,16,128], index: 3, kind: output, shape index: {}]  }
   0x1   :  { %s1691_s14 = smov 0  }
   0x2 LB: > { %s25_s15 = sadd.s32 1, %s1661_s13  ;;  %p1025_p0 = scmp.ge.s32.totalorder %s1665_s14, 1  ;;  %s1665_s14 = sphi %s1691_s14, %s13_s14   ;;  %s1661_s13 = sphi %s1689_s13, %s2156_s13   ;;  %s1657_s12 = sphi %s1687_s12, %s2155_s12  }
   0x3   : > { %p27_p1 = scmp.ge.s32.totalorder %s25_s15, 2  ;;  %p159_p2 = scmp.lt.s32.totalorder %s1665_s14, 3 }
   0x5   : > { %s2158_s15 = smov (%p27_p1, %s25_s15), 0  ;;  %p160_p3 = pnand %p1025_p0, %p159_p2 }
   0x6   : > { %v229_v0 = vld [vmem:[%s2152_s1 + $0x80] sm:$0xff] (!%p160_p3)  ;;  %v230_v1 = vld [vmem:[%s2152_s1 + $0x88] sm:$0xff] (!%p160_p3)  ;;  %v231_v11 = vld [vmem:[%s2152_s1 + $0x90] sm:$0xff] (!%p160_p3)  ;;  %p193_p4 = scmp.lt.s32.totalorder (!%p160_p3), %s1657_s12, 1 }
   0x7   : > { %163 = sbr.rel (%p160_p3) target bundleno = 369 (0x171), region = 32  ;;  %v261_v2 = vld [vmem:[%s2152_s1 + $0x180] sm:$0xff] (!%p160_p3)  ;;  %v1716_v3 = vpack.c.bf16 (!%p160_p3), %v230_v1, %v229_v0  ;;  %v262_v4 = vld [vmem:[%s2152_s1 + $0x188] sm:$0xff] (!%p160_p3)  ;;  %v232_v13 = vld [vmem:[%s2152_s1 + $0x98] sm:$0xff] (!%p160_p3) }
   0x8   : > { %v213_v5 = vld [vmem:[%s2152_s1] sm:$0xff] (!%p160_p3)  ;;  %v214_v6 = vld [vmem:[%s2152_s1 + $0x8] sm:$0xff] (!%p160_p3)  ;;  %v1727_v7 = vpack.c.bf16 (!%p160_p3), %v262_v4, %v261_v2  ;;  %v263_v14 = vld [vmem:[%s2152_s1 + $0x190] sm:$0xff] (!%p160_p3)  ;;  %v1754_v16 = vpack.c.bf16 (!%p160_p3), %v232_v13, %v231_v11 }
   0x9   : > { %v1729_v8 = vpack.c.bf16 (!%p160_p3), %v214_v6, %v213_v5  ;;  %v245_v9 = vld [vmem:[%s2152_s1 + $0x100] sm:$0xff] (!%p160_p3)  ;;  %v246_v10 = vld [vmem:[%s2152_s1 + $0x108] sm:$0xff] (!%p160_p3)  ;;  %1364 = vmatprep.subr.bf16.mxu0 (!%p160_p3), %v1716_v3  ;;  %v264_v15 = vld [vmem:[%s2152_s1 + $0x198] sm:$0xff] (!%p160_p3) }
   0xa   : > { %v1741_v12 = vpack.c.bf16 (!%p160_p3), %v246_v10, %v245_v9  ;;  %1396 = vmatprep.subr.bf16.mxu1 (!%p160_p3), %v1727_v7  ;;  %v1756_v17 = vpack.c.bf16 (!%p160_p3), %v264_v15, %v263_v14  ;;  %v215_v18 = vld [vmem:[%s2152_s1 + $0x10] sm:$0xff] (!%p160_p3)  ;;  %v216_v19 = vld [vmem:[%s2152_s1 + $0x18] sm:$0xff] (!%p160_p3)  ;;  %v233_v23 = vld [vmem:[%s2152_s1 + $0xa0] sm:$0xff] (!%p160_p3) }
   0xb   : > { %1366 = vmatpush3.bf16.msra.mxu0 (!%p160_p3), %v1729_v8  ;;  %v247_v20 = vld [vmem:[%s2152_s1 + $0x110] sm:$0xff] (!%p160_p3)  ;;  %v1768_v21 = vpack.c.bf16 (!%p160_p3), %v216_v19, %v215_v18  ;;  %v248_v22 = vld [vmem:[%s2152_s1 + $0x118] sm:$0xff] (!%p160_p3)  ;;  %v234_v24 = vld [vmem:[%s2152_s1 + $0xa8] sm:$0xff] (!%p160_p3) }
   0xc   : > { %1398 = vmatpush3.bf16.msra.mxu1 (!%p160_p3), %v1741_v12  ;;  %1368 = vmatprep.subr.bf16.mxu0 (!%p160_p3), %v1754_v16  ;;  %v1781_v25 = vpack.c.bf16 (!%p160_p3), %v248_v22, %v247_v20  ;;  %v1783_v26 = vpack.c.bf16 (!%p160_p3), %v234_v24, %v233_v23  ;;  %v265_v27 = vld [vmem:[%s2152_s1 + $0x1a0] sm:$0xff] (!%p160_p3)  ;;  %v266_v28 = vld [vmem:[%s2152_s1 + $0x1a8] sm:$0xff] (!%p160_p3)  ;;  %v235_v35 = vld [vmem:[%s2152_s1 + $0xb0] sm:$0xff] (!%p160_p3) }
   0xd   : > { %1400 = vmatprep.subr.bf16.mxu1 (!%p160_p3), %v1756_v17  ;;  %v217_v29 = vld [vmem:[%s2152_s1 + $0x20] sm:$0xff] (!%p160_p3)  ;;  %v1794_v30 = vpack.c.bf16 (!%p160_p3), %v266_v28, %v265_v27  ;;  %v218_v31 = vld [vmem:[%s2152_s1 + $0x28] sm:$0xff] (!%p160_p3)  ;;  %v236_v36 = vld [vmem:[%s2152_s1 + $0xb8] sm:$0xff] (!%p160_p3) }
   0xe   : > { %v249_v32 = vld [vmem:[%s2152_s1 + $0x120] sm:$0xff]  ;;  %v250_v33 = vld [vmem:[%s2152_s1 + $0x128] sm:$0xff]  ;;  %v1807_v34 = vpack.c.bf16 %v218_v31, %v217_v29  ;;  %v267_v37 = vld [vmem:[%s2152_s1 + $0x1b0] sm:$0xff]  ;;  %v1822_v39 = vpack.c.bf16 %v236_v36, %v235_v35  ;;  %s2160_s12 = smov (!%p193_p4, %s1657_s12), 1 }
   0xf   : > { %1370 = vmatpush3.bf16.msra.mxu0 %v1768_v21  ;;  %v1820_v38 = vpack.c.bf16 %v250_v33, %v249_v32  ;;  %v268_v40 = vld [vmem:[%s2152_s1 + $0x1b8] sm:$0xff]  ;;  %v219_v41 = vld [vmem:[%s2152_s1 + $0x30] sm:$0xff]  ;;  %v237_v46 = vld [vmem:[%s2152_s1 + $0xc0] sm:$0xff]  ;;  %s1057_s8 = sshll.u32 %s2160_s12, 8 }
  0x10   : > { %1402 = vmatpush3.bf16.msra.mxu1 %v1781_v25  ;;  %1372 = vmatprep.subr.bf16.mxu0 %v1783_v26  ;;  %v220_v42 = vld [vmem:[%s2152_s1 + $0x38] sm:$0xff]  ;;  %v1834_v43 = vpack.c.bf16 %v268_v40, %v267_v37  ;;  %v251_v44 = vld [vmem:[%s2152_s1 + $0x130] sm:$0xff]  ;;  %v238_v47 = vld [vmem:[%s2152_s1 + $0xc8] sm:$0xff]  ;;  %s1929_s27 = scalar_lea.vmem %s2151_s0, %s1057_s8  ;;  %s1058_s8 = sshll.u32 %s2160_s12, 4 }
  0x11   : > { %1404 = vmatprep.subr.bf16.mxu1 %v1794_v30  ;;  %v252_v45 = vld [vmem:[%s2152_s1 + $0x138] sm:$0xff]  ;;  %v269_v48 = vld [vmem:[%s2152_s1 + $0x1c0] sm:$0xff]  ;;  %v270_v49 = vld [vmem:[%s2152_s1 + $0x1c8] sm:$0xff]  ;;  %v1860_v50 = vpack.c.bf16 %v220_v42, %v219_v41  ;;  %v1866_v52 = vpack.c.bf16 %v238_v47, %v237_v46  ;;  %s211_s11 = scalar_lea.vmem %s2154_s3, %s1058_s8 }
  0x12   : > { %v1864_v51 = vpack.c.bf16 %v252_v45, %v251_v44  ;;  %v221_v53 = vld [vmem:[%s2152_s1 + $0x40] sm:$0xff]  ;;  %v222_v54 = vld [vmem:[%s2152_s1 + $0x48] sm:$0xff]  ;;  %v1878_v56 = vpack.c.bf16 %v270_v49, %v269_v48  ;;  %v239_v58 = vld [vmem:[%s2152_s1 + $0xd0] sm:$0xff] }
  0x13   : > { %1374 = vmatpush3.bf16.msra.mxu0 %v1807_v34  ;;  %v253_v55 = vld [vmem:[%s2152_s1 + $0x140] sm:$0xff]  ;;  %v254_v57 = vld [vmem:[%s2152_s1 + $0x148] sm:$0xff]  ;;  %v240_v59 = vld [vmem:[%s2152_s1 + $0xd8] sm:$0xff]  ;;  %v1897_v62 = vpack.c.bf16 %v222_v54, %v221_v53 }
  0x14   : > { %1406 = vmatpush3.bf16.msra.mxu1 %v1820_v38  ;;  %1376 = vmatprep.subr.bf16.mxu0 %v1822_v39  ;;  %v271_v60 = vld [vmem:[%s2152_s1 + $0x1d0] sm:$0xff]  ;;  %v272_v61 = vld [vmem:[%s2152_s1 + $0x1d8] sm:$0xff]  ;;  %v1901_v63 = vpack.c.bf16 %v254_v57, %v253_v55  ;;  %v1903_v0 = vpack.c.bf16 %v240_v59, %v239_v58  ;;  %v241_v9 = vld [vmem:[%s2152_s1 + $0xe0] sm:$0xff] }
  0x15   : > { %1408 = vmatprep.subr.bf16.mxu1 %v1834_v43  ;;  %v223_v1 = vld [vmem:[%s2152_s1 + $0x50] sm:$0xff]  ;;  %v224_v2 = vld [vmem:[%s2152_s1 + $0x58] sm:$0xff]  ;;  %v1915_v5 = vpack.c.bf16 %v272_v61, %v271_v60  ;;  %v242_v10 = vld [vmem:[%s2152_s1 + $0xe8] sm:$0xff] }
  0x16   : > { %v255_v4 = vld [vmem:[%s2152_s1 + $0x150] sm:$0xff]  ;;  %v256_v6 = vld [vmem:[%s2152_s1 + $0x158] sm:$0xff]  ;;  %v273_v11 = vld [vmem:[%s2152_s1 + $0x1e0] sm:$0xff]  ;;  %v1938_v14 = vpack.c.bf16 %v224_v2, %v223_v1  ;;  %v1950_v20 = vpack.c.bf16 %v242_v10, %v241_v9 }
  0x17   : > { %1378 = vmatpush3.bf16.msra.mxu0 %v1860_v50  ;;  %v274_v13 = vld [vmem:[%s2152_s1 + $0x1e8] sm:$0xff]  ;;  %v225_v15 = vld [vmem:[%s2152_s1 + $0x60] sm:$0xff]  ;;  %v1948_v19 = vpack.c.bf16 %v256_v6, %v255_v4  ;;  %v280_v24 = vld [vmem:[%s1929_s27 + $0x18] sm:$0xff] }
  0x18   : > { %1410 = vmatpush3.bf16.msra.mxu1 %v1864_v51  ;;  %1380 = vmatprep.subr.bf16.mxu0 %v1866_v52  ;;  %v226_v18 = vld [vmem:[%s2152_s1 + $0x68] sm:$0xff]  ;;  %v257_v22 = vld [vmem:[%s2152_s1 + $0x160] sm:$0xff]  ;;  %v1958_v27 = vpack.c.bf16 %v274_v13, %v273_v11  ;;  %v243_v29 = vld [vmem:[%s2152_s1 + $0xf0] sm:$0xff] }
  0x19   : > { %1412 = vmatprep.subr.bf16.mxu1 %v1878_v56  ;;  %v278_v23 = vld [vmem:[%s1929_s27 + $0x8] sm:$0xff]  ;;  %v244_v31 = vld [vmem:[%s2152_s1 + $0xf8] sm:$0xff]  ;;  %v275_v32 = vld [vmem:[%s2152_s1 + $0x1f0] sm:$0xff]  ;;  %424 = vmatprep.mubr.f32.mxu1 %v280_v24  ;;  %v1976_v35 = vpack.c.bf16 %v226_v18, %v225_v15 }
  0x1a   : > { %v258_v28 = vld [vmem:[%s2152_s1 + $0x168] sm:$0xff]  ;;  %349 = vmatprep.mubr.f32.mxu0 %v278_v23  ;;  %v276_v33 = vld [vmem:[%s2152_s1 + $0x1f8] sm:$0xff]  ;;  %v1982_v37 = vpack.c.bf16 %v244_v31, %v243_v29  ;;  %v227_v40 = vld [vmem:[%s2152_s1 + $0x70] sm:$0xff] }
  0x1b   : > { %1382 = vmatpush3.bf16.msra.mxu0 %v1897_v62  ;;  %v1980_v36 = vpack.c.bf16 %v258_v28, %v257_v22  ;;  %v228_v41 = vld [vmem:[%s2152_s1 + $0x78] sm:$0xff]  ;;  %v1991_v42 = vpack.c.bf16 %v276_v33, %v275_v32  ;;  %v259_v44 = vld [vmem:[%s2152_s1 + $0x170] sm:$0xff]  ;;  %v277_v48 = vld [vmem:[%s1929_s27] sm:$0xff] }
  0x1c   : > { %1414 = vmatpush3.bf16.msra.mxu1 %v1901_v63  ;;  %1384 = vmatprep.subr.bf16.mxu0 %v1903_v0  ;;  %v260_v45 = vld [vmem:[%s2152_s1 + $0x178] sm:$0xff]  ;;  %v2000_v46 = vpack.c.bf16 %v228_v41, %v227_v40  ;;  %v279_v49 = vld [vmem:[%s1929_s27 + $0x10] sm:$0xff]  ;;  %v282_v53 = vld [vmem:[%s1929_s27 + $0x28] sm:$0xff] }
  0x1d   : > { %1416 = vmatprep.subr.bf16.mxu1 %v1915_v5  ;;  %v2004_v47 = vpack.c.bf16 %v260_v45, %v259_v44  ;;  %v284_v54 = vld [vmem:[%s1929_s27 + $0x38] sm:$0xff]  ;;  %v281_v55 = vld [vmem:[%s1929_s27 + $0x20] sm:$0xff]  ;;  %v283_v57 = vld [vmem:[%s1929_s27 + $0x30] sm:$0xff] }
  0x1e   : > { %v1031_v58 = vld [vmem:[%s1929_s27 + $0x48] sm:$0xff]  ;;  %v1033_v59 = vld [vmem:[%s1929_s27 + $0x58] sm:$0xff]  ;;  %v1030_v60 = vld [vmem:[%s1929_s27 + $0x40] sm:$0xff] }
  0x1f   : > { %1386 = vmatpush3.bf16.msra.mxu0 %v1938_v14  ;;  %v1032_v61 = vld [vmem:[%s1929_s27 + $0x50] sm:$0xff]  ;;  %v1035_v1 = vld [vmem:[%s1929_s27 + $0x68] sm:$0xff]  ;;  %v1037_v2 = vld [vmem:[%s1929_s27 + $0x78] sm:$0xff] }
  0x20   : > { %1418 = vmatpush3.bf16.msra.mxu1 %v1948_v19  ;;  %1388 = vmatprep.subr.bf16.mxu0 %v1950_v20  ;;  %v1034_v4 = vld [vmem:[%s1929_s27 + $0x60] sm:$0xff]  ;;  %v1036_v6 = vld [vmem:[%s1929_s27 + $0x70] sm:$0xff]  ;;  %v1039_v9 = vld [vmem:[%s1929_s27 + $0x88] sm:$0xff] }
  0x21   : > { %1420 = vmatprep.subr.bf16.mxu1 %v1958_v27  ;;  %v1041_v10 = vld [vmem:[%s1929_s27 + $0x98] sm:$0xff]  ;;  %v1038_v11 = vld [vmem:[%s1929_s27 + $0x80] sm:$0xff]  ;;  %v1040_v13 = vld [vmem:[%s1929_s27 + $0x90] sm:$0xff] }
  0x22   : > { %v1043_v15 = vld [vmem:[%s1929_s27 + $0xa8] sm:$0xff]  ;;  %v1045_v18 = vld [vmem:[%s1929_s27 + $0xb8] sm:$0xff]  ;;  %v1042_v22 = vld [vmem:[%s1929_s27 + $0xa0] sm:$0xff] }
  0x23   : > { %1390 = vmatpush3.bf16.msra.mxu0 %v1976_v35  ;;  %v1044_v23 = vld [vmem:[%s1929_s27 + $0xb0] sm:$0xff] }
  0x24   : > { %1422 = vmatpush3.bf16.msra.mxu1 %v1980_v36  ;;  %1392 = vmatprep.subr.bf16.mxu0 %v1982_v37 }
  0x25   : > { %1424 = vmatprep.subr.bf16.mxu1 %v1991_v42 }
  0x27   : > { %1394 = vmatpush3.bf16.msra.mxu0 %v2000_v46 }
  0x28   : > { %1426 = vmatpush3.bf16.msra.mxu1 %v2004_v47  ;;  %1428 = vmatprep.subr.bf16.mxu0 %v1716_v3 }
  0x29   : > { %1460 = vmatprep.subr.bf16.mxu1 %v1727_v7 }
  0x2a   : > { %350 = vmatmul.mubr.f32.vlgmr.msra.gmra.mrb[0].mxu0 %v277_v48 }
  0x2b   : > { %425 = vmatmul.mubr.f32.vlgmr.msra.gmra.mrb[0].mxu1 %v279_v49  ;;  %1430 = vmatpush3.bf16.msra.mxu0 %v1729_v8 }
  0x2c   : > { %1462 = vmatpush3.bf16.msra.mxu1 %v1741_v12  ;;  %1432 = vmatprep.subr.bf16.mxu0 %v1754_v16 }
  0x2d   : > { %1464 = vmatprep.subr.bf16.mxu1 %v1756_v17  ;;  %354 = vmatprep.mubr.f32.mxu0 %v282_v53 }
  0x2e   : > { %429 = vmatprep.mubr.f32.mxu1 %v284_v54  ;;  %355 = vmatmul.mubr.f32.gmra.mrb[2].mxu0 %v281_v55 }
  0x2f   : > { %1434 = vmatpush3.bf16.msra.mxu0 %v1768_v21  ;;  %430 = vmatmul.mubr.f32.gmra.mrb[2].mxu1 %v283_v57 }
  0x30   : > { %1466 = vmatpush3.bf16.msra.mxu1 %v1781_v25  ;;  %1436 = vmatprep.subr.bf16.mxu0 %v1783_v26 }
  0x31   : > { %1468 = vmatprep.subr.bf16.mxu1 %v1794_v30  ;;  %508 = vmatprep.mubr.f32.mxu0 %v1031_v58 }
  0x32   : > { %583 = vmatprep.mubr.f32.mxu1 %v1033_v59 }
  0x33   : > { %1438 = vmatpush3.bf16.msra.mxu0 %v1807_v34 }
  0x34   : > { %1470 = vmatpush3.bf16.msra.mxu1 %v1820_v38  ;;  %1440 = vmatprep.subr.bf16.mxu0 %v1822_v39 }
  0x35   : > { %1472 = vmatprep.subr.bf16.mxu1 %v1834_v43 }
  0x37   : > { %1442 = vmatpush3.bf16.msra.mxu0 %v1860_v50 }
  0x38   : > { %1474 = vmatpush3.bf16.msra.mxu1 %v1864_v51  ;;  %1444 = vmatprep.subr.bf16.mxu0 %v1866_v52 }
  0x39   : > { %1476 = vmatprep.subr.bf16.mxu1 %v1878_v56 }
  0x3b   : > { %1446 = vmatpush3.bf16.msra.mxu0 %v1897_v62 }
  0x3c   : > { %1478 = vmatpush3.bf16.msra.mxu1 %v1901_v63  ;;  %1448 = vmatprep.subr.bf16.mxu0 %v1903_v0 }
  0x3d   : > { %1480 = vmatprep.subr.bf16.mxu1 %v1915_v5 }
  0x3f   : > { %1450 = vmatpush3.bf16.msra.mxu0 %v1938_v14 }
  0x40   : > { %1482 = vmatpush3.bf16.msra.mxu1 %v1948_v19  ;;  %1452 = vmatprep.subr.bf16.mxu0 %v1950_v20 }
  0x41   : > { %1484 = vmatprep.subr.bf16.mxu1 %v1958_v27 }
  0x43   : > { %1454 = vmatpush3.bf16.msra.mxu0 %v1976_v35 }
  0x44   : > { %1486 = vmatpush3.bf16.msra.mxu1 %v1980_v36  ;;  %1456 = vmatprep.subr.bf16.mxu0 %v1982_v37 }
  0x45   : > { %1488 = vmatprep.subr.bf16.mxu1 %v1991_v42 }
  0x47   : > { %1458 = vmatpush3.bf16.msra.mxu0 %v2000_v46 }
  0x48   : > { %1490 = vmatpush3.bf16.msra.mxu1 %v2004_v47  ;;  %1492 = vmatprep.subr.bf16.mxu0 %v1716_v3 }
  0x49   : > { %1524 = vmatprep.subr.bf16.mxu1 %v1727_v7 }
  0x4a   : > { %509 = vmatmul.mubr.f32.vlgmr.msra.gmra.mrb[4].mxu0 %v1030_v60 }
  0x4b   : > { %584 = vmatmul.mubr.f32.vlgmr.msra.gmra.mrb[4].mxu1 %v1032_v61  ;;  %1494 = vmatpush3.bf16.msra.mxu0 %v1729_v8 }
  0x4c   : > { %1526 = vmatpush3.bf16.msra.mxu1 %v1741_v12  ;;  %513 = vmatprep.mubr.f32.mxu0 %v1035_v1 }
  0x4d   : > { %588 = vmatprep.mubr.f32.mxu1 %v1037_v2  ;;  %1496 = vmatprep.subr.bf16.mxu0 %v1754_v16 }
  0x4e   : > { %514 = vmatmul.mubr.f32.gmra.mrb[6].mxu0 %v1034_v4  ;;  %1528 = vmatprep.subr.bf16.mxu1 %v1756_v17 }
  0x4f   : > { %589 = vmatmul.mubr.f32.gmra.mrb[6].mxu1 %v1036_v6  ;;  %1498 = vmatpush3.bf16.msra.mxu0 %v1768_v21 }
  0x50   : > { %1530 = vmatpush3.bf16.msra.mxu1 %v1781_v25  ;;  %1500 = vmatprep.subr.bf16.mxu0 %v1783_v26 }
  0x51   : > { %1532 = vmatprep.subr.bf16.mxu1 %v1794_v30  ;;  %667 = vmatprep.mubr.f32.mxu0 %v1039_v9 }
  0x52   : > { %742 = vmatprep.mubr.f32.mxu1 %v1041_v10 }
  0x53   : > { %1502 = vmatpush3.bf16.msra.mxu0 %v1807_v34 }
  0x54   : > { %1534 = vmatpush3.bf16.msra.mxu1 %v1820_v38  ;;  %1504 = vmatprep.subr.bf16.mxu0 %v1822_v39 }
  0x55   : > { %1536 = vmatprep.subr.bf16.mxu1 %v1834_v43 }
  0x57   : > { %1506 = vmatpush3.bf16.msra.mxu0 %v1860_v50 }
  0x58   : > { %1538 = vmatpush3.bf16.msra.mxu1 %v1864_v51  ;;  %1508 = vmatprep.subr.bf16.mxu0 %v1866_v52 }
  0x59   : > { %1540 = vmatprep.subr.bf16.mxu1 %v1878_v56 }
  0x5b   : > { %1510 = vmatpush3.bf16.msra.mxu0 %v1897_v62 }
  0x5c   : > { %1542 = vmatpush3.bf16.msra.mxu1 %v1901_v63  ;;  %1512 = vmatprep.subr.bf16.mxu0 %v1903_v0 }
  0x5d   : > { %1544 = vmatprep.subr.bf16.mxu1 %v1915_v5 }
  0x5f   : > { %1514 = vmatpush3.bf16.msra.mxu0 %v1938_v14 }
  0x60   : > { %1546 = vmatpush3.bf16.msra.mxu1 %v1948_v19  ;;  %1516 = vmatprep.subr.bf16.mxu0 %v1950_v20 }
  0x61   : > { %1548 = vmatprep.subr.bf16.mxu1 %v1958_v27 }
  0x63   : > { %1518 = vmatpush3.bf16.msra.mxu0 %v1976_v35 }
  0x64   : > { %1550 = vmatpush3.bf16.msra.mxu1 %v1980_v36  ;;  %1520 = vmatprep.subr.bf16.mxu0 %v1982_v37 }
  0x65   : > { %1552 = vmatprep.subr.bf16.mxu1 %v1991_v42 }
  0x67   : > { %1522 = vmatpush3.bf16.msra.mxu0 %v2000_v46 }
  0x68   : > { %1554 = vmatpush3.bf16.msra.mxu1 %v2004_v47  ;;  %1556 = vmatprep.subr.bf16.mxu0 %v1716_v3  ;;  %v1047_v3 = vld [vmem:[%s1929_s27 + $0xc8] sm:$0xff] }
  0x69   : > { %1588 = vmatprep.subr.bf16.mxu1 %v1727_v7  ;;  %v1049_v7 = vld [vmem:[%s1929_s27 + $0xd8] sm:$0xff] }
  0x6a   : > { %668 = vmatmul.mubr.f32.vlgmr.msra.gmra.mrb[8].mxu0 %v1038_v11 }
  0x6b   : > { %743 = vmatmul.mubr.f32.vlgmr.msra.gmra.mrb[8].mxu1 %v1040_v13  ;;  %1558 = vmatpush3.bf16.msra.mxu0 %v1729_v8  ;;  %v1046_v8 = vld [vmem:[%s1929_s27 + $0xc0] sm:$0xff] }
  0x6c   : > { %1590 = vmatpush3.bf16.msra.mxu1 %v1741_v12  ;;  %1560 = vmatprep.subr.bf16.mxu0 %v1754_v16  ;;  %v1048_v12 = vld [vmem:[%s1929_s27 + $0xd0] sm:$0xff]  ;;  %v1051_v16 = vld [vmem:[%s1929_s27 + $0xe8] sm:$0xff] }
  0x6d   : > { %1592 = vmatprep.subr.bf16.mxu1 %v1756_v17  ;;  %672 = vmatprep.mubr.f32.mxu0 %v1043_v15  ;;  %v1053_v17 = vld [vmem:[%s1929_s27 + $0xf8] sm:$0xff] }
  0x6e   : > { %747 = vmatprep.mubr.f32.mxu1 %v1045_v18  ;;  %673 = vmatmul.mubr.f32.gmra.mrb[10].mxu0 %v1042_v22 }
  0x6f   : > { %1562 = vmatpush3.bf16.msra.mxu0 %v1768_v21  ;;  %748 = vmatmul.mubr.f32.gmra.mrb[10].mxu1 %v1044_v23  ;;  %v1050_v21 = vld [vmem:[%s1929_s27 + $0xe0] sm:$0xff] }
  0x70   : > { %1594 = vmatpush3.bf16.msra.mxu1 %v1781_v25  ;;  %1564 = vmatprep.subr.bf16.mxu0 %v1783_v26  ;;  %v1052_v25 = vld [vmem:[%s1929_s27 + $0xf0] sm:$0xff] }
  0x71   : > { %1596 = vmatprep.subr.bf16.mxu1 %v1794_v30  ;;  %826 = vmatprep.mubr.f32.mxu0 %v1047_v3 }
  0x72   : > { %901 = vmatprep.mubr.f32.mxu1 %v1049_v7 }
  0x73   : > { %1566 = vmatpush3.bf16.msra.mxu0 %v1807_v34 }
  0x74   : > { %1598 = vmatpush3.bf16.msra.mxu1 %v1820_v38  ;;  %1568 = vmatprep.subr.bf16.mxu0 %v1822_v39 }
  0x75   : > { %1600 = vmatprep.subr.bf16.mxu1 %v1834_v43 }
  0x77   : > { %1570 = vmatpush3.bf16.msra.mxu0 %v1860_v50 }
  0x78   : > { %1602 = vmatpush3.bf16.msra.mxu1 %v1864_v51  ;;  %1572 = vmatprep.subr.bf16.mxu0 %v1866_v52 }
  0x79   : > { %1604 = vmatprep.subr.bf16.mxu1 %v1878_v56 }
  0x7b   : > { %1574 = vmatpush3.bf16.msra.mxu0 %v1897_v62 }
  0x7c   : > { %1606 = vmatpush3.bf16.msra.mxu1 %v1901_v63  ;;  %1576 = vmatprep.subr.bf16.mxu0 %v1903_v0 }
  0x7d   : > { %1608 = vmatprep.subr.bf16.mxu1 %v1915_v5 }
  0x7f   : > { %1578 = vmatpush3.bf16.msra.mxu0 %v1938_v14 }
  0x80   : > { %1610 = vmatpush3.bf16.msra.mxu1 %v1948_v19  ;;  %1580 = vmatprep.subr.bf16.mxu0 %v1950_v20 }
  0x81   : > { %1612 = vmatprep.subr.bf16.mxu1 %v1958_v27 }
  0x83   : > { %1582 = vmatpush3.bf16.msra.mxu0 %v1976_v35 }
  0x84   : > { %1614 = vmatpush3.bf16.msra.mxu1 %v1980_v36  ;;  %1584 = vmatprep.subr.bf16.mxu0 %v1982_v37 }
  0x85   : > { %1616 = vmatprep.subr.bf16.mxu1 %v1991_v42 }
  0x87   : > { %1586 = vmatpush3.bf16.msra.mxu0 %v2000_v46 }
  0x88   : > { %1618 = vmatpush3.bf16.msra.mxu1 %v2004_v47 }
  0x8a   : > { %827 = vmatmul.mubr.f32.vlgmr.msra.gmra.mrb[12].mxu0 %v1046_v8  ;;  %v1054_v8 = vld [vmem:[%s2153_s2] ss:$0 sm:$0xff] }
  0x8b   : > { %902 = vmatmul.mubr.f32.vlgmr.msra.gmra.mrb[12].mxu1 %v1048_v12  ;;  %831 = vmatprep.mubr.f32.mxu0 %v1051_v16 }
  0x8c   : > { %906 = vmatprep.mubr.f32.mxu1 %v1053_v17 }
  0x8e   : > { %832 = vmatmul.mubr.f32.gmra.mrb[14].mxu0 %v1050_v21 }
  0x8f   : > { %907 = vmatmul.mubr.f32.gmra.mrb[14].mxu1 %v1052_v25 }
  0xfd   : > { %v1091_v26 = vpop.f32.mrb[0].mxu0 }
  0xfe   : > { %v1129_v30 = vpop.f32.mrb[0].mxu1  ;;  %v1092_v34 = vpop.f32.mrb[1].mxu0 }
  0xff   : > { %v1093_v38 = vadd.f32 %v1092_v34, %v1091_v26  ;;  %v1130_v39 = vpop.f32.mrb[1].mxu1 }
 0x100   : > { %v1131_v43 = vadd.f32 %v1130_v39, %v1129_v30 }
 0x101   : > { %v1094_v50 = vpop.f32.mrb[2].mxu0 }
 0x102   : > { %v427_v51 = vadd.f32 %v1131_v43, %v1093_v38  ;;  %v1132_v52 = vpop.f32.mrb[2].mxu1  ;;  %v1095_v56 = vpop.f32.mrb[3].mxu0 }
 0x103   : > { %v1096_v62 = vadd.f32 %v1095_v56, %v1094_v50  ;;  %v1133_v63 = vpop.f32.mrb[3].mxu1 }
 0x104   : > { %v1134_v0 = vadd.f32 %v1133_v63, %v1132_v52 }
 0x106   : > { %v432_v5 = vadd.f32 %v1134_v0, %v1096_v62 }
 0x11d   : > { %v1167_v14 = vpop.f32.mrb[4].mxu0 }
 0x11e   : > { %v1205_v19 = vpop.f32.mrb[4].mxu1  ;;  %v1168_v20 = vpop.f32.mrb[5].mxu0 }
 0x11f   : > { %v1169_v24 = vadd.f32 %v1168_v20, %v1167_v14  ;;  %v1206_v27 = vpop.f32.mrb[5].mxu1 }
 0x120   : > { %v1207_v28 = vadd.f32 %v1206_v27, %v1205_v19 }
 0x121   : > { %v1170_v29 = vpop.f32.mrb[6].mxu0 }
 0x122   : > { %v586_v31 = vadd.f32 %v1207_v28, %v1169_v24  ;;  %v1208_v32 = vpop.f32.mrb[6].mxu1  ;;  %v1171_v33 = vpop.f32.mrb[7].mxu0 }
 0x123   : > { %v1172_v35 = vadd.f32 %v1171_v33, %v1170_v29  ;;  %v1209_v36 = vpop.f32.mrb[7].mxu1 }
 0x124   : > { %v912_v37 = vmax.f32 %v427_v51, %v586_v31  ;;  %v1210_v40 = vadd.f32 %v1209_v36, %v1208_v32 }
 0x126   : > { %v591_v41 = vadd.f32 %v1210_v40, %v1172_v35 }
 0x128   : > { %v913_v42 = vmax.f32 %v432_v5, %v591_v41 }
 0x13d   : > { %v1243_v44 = vpop.f32.mrb[8].mxu0 }
 0x13e   : > { %v1281_v45 = vpop.f32.mrb[8].mxu1  ;;  %v1244_v46 = vpop.f32.mrb[9].mxu0 }
 0x13f   : > { %v1245_v47 = vadd.f32 %v1244_v46, %v1243_v44  ;;  %v1282_v48 = vpop.f32.mrb[9].mxu1 }
 0x140   : > { %v1283_v49 = vadd.f32 %v1282_v48, %v1281_v45 }
 0x141   : > { %v1246_v53 = vpop.f32.mrb[10].mxu0 }
 0x142   : > { %v745_v54 = vadd.f32 %v1283_v49, %v1245_v47  ;;  %v1284_v55 = vpop.f32.mrb[10].mxu1  ;;  %v1247_v57 = vpop.f32.mrb[11].mxu0 }
 0x143   : > { %v1248_v58 = vadd.f32 %v1247_v57, %v1246_v53  ;;  %v1285_v59 = vpop.f32.mrb[11].mxu1 }
 0x144   : > { %v1286_v60 = vadd.f32 %v1285_v59, %v1284_v55 }
 0x146   : > { %v750_v61 = vadd.f32 %v1286_v60, %v1248_v58 }
 0x15d   : > { %v1319_v1 = vpop.f32.mrb[12].mxu0 }
 0x15e   : > { %v1357_v2 = vpop.f32.mrb[12].mxu1  ;;  %v1320_v4 = vpop.f32.mrb[13].mxu0 }
 0x15f   : > { %v1321_v6 = vadd.f32 %v1320_v4, %v1319_v1  ;;  %v1358_v9 = vpop.f32.mrb[13].mxu1 }
 0x160   : > { %v1359_v10 = vadd.f32 %v1358_v9, %v1357_v2 }
 0x161   : > { %v1322_v11 = vpop.f32.mrb[14].mxu0 }
 0x162   : > { %v904_v13 = vadd.f32 %v1359_v10, %v1321_v6  ;;  %v1360_v15 = vpop.f32.mrb[14].mxu1  ;;  %v1323_v18 = vpop.f32.mrb[15].mxu0 }
 0x163   : > { %v1324_v22 = vadd.f32 %v1323_v18, %v1322_v11  ;;  %v1361_v23 = vpop.f32.mrb[15].mxu1 }
 0x164   : > { %v914_v3 = vmax.f32 %v745_v54, %v904_v13  ;;  %v1362_v7 = vadd.f32 %v1361_v23, %v1360_v15 }
 0x166   : > { %v916_v12 = vmax.f32 %v912_v37, %v914_v3  ;;  %v909_v16 = vadd.f32 %v1362_v7, %v1324_v22 }
 0x168   : > { %v925_v17 = vadd.f32 %v1054_v8, %v916_v12  ;;  %v915_v21 = vmax.f32 %v750_v61, %v909_v16 }
 0x16a   : > { %v927_v25 = vmax.f32 %v925_v17, 0.0  ;;  %v917_v26 = vmax.f32 %v913_v42, %v915_v21 }
 0x16c   : > { %929 = vst [vmem:[%s211_s11] sm:$0xff] %v927_v25  ;;  %v926_v30 = vadd.f32 %v1054_v8, %v917_v26 }
 0x16e   : > { %v928_v34 = vmax.f32 %v926_v30, 0.0 }
 0x170   : > { %930 = vst [vmem:[%s211_s11 + $0x8] sm:$0xff] %v928_v34 }
 0x171 PF: > { %s13_s14 = sadd.s32 1, %s1665_s14   ;;  %s2155_s12 = smov %s1661_s13 }
 0x172   : > { %p10_p5 = scmp.ge.s32.totalorder %s13_s14, 4   ;;  %s2156_s13 = smov %s2158_s15 }
 0x174   :  { %12 = sbr.rel (!%p10_p5) target bundleno = 2 (0x2), region = 65 }

// kernel: widerface_forward.7
= control target key start
LH: loop header
LB: loop body
LE: loop exit
PB: predicated region body
PF: predicated region fallthrough
CT: control target
= control target key end

     0   :  { %s1823_s24 = smov 0   ;;  %s1825_s25 = smov 0   ;;  %s2780_s0 = inlined_call_operand.vmem [shape: f32[8,512], index: 0, kind: input, shape index: {}]   ;;  %s2781_s1 = inlined_call_operand.vmem [shape: f32[512,1024], index: 1, kind: input, shape index: {}]   ;;  %s2782_s2 = inlined_call_operand.vmem [shape: f32[1,1024], index: 2, kind: input, shape index: {}]   ;;  %s2783_s3 = inlined_call_operand.vmem [shape: f32[1024,256], index: 3, kind: input, shape index: {}]   ;;  %s2784_s4 = inlined_call_operand.vmem [shape: f32[1,256], index: 4, kind: input, shape index: {}]   ;;  %s2785_s5 = inlined_call_operand.vmem [shape: f32[256,512], index: 5, kind: input, shape index: {}]   ;;  %s2786_s6 = inlined_call_operand.vmem [shape: f32[1,512], index: 6, kind: input, shape index: {}]   ;;  %s2787_s7 = inlined_call_operand.vmem [shape: f32[8,512], index: 7, kind: output, shape index: {}]  }
   0x1   :  { %s1827_s26 = smov 0  }
   0x2 LB: > { %s1839_s27 = sadd.s32 4294967295, %s1780_s26   ;;  %s1842_s28 = sadd.s32 1, %s1780_s26   ;;  %s1780_s26 = sphi %s1827_s26, %s2790_s26   ;;  %s1776_s25 = sphi %s1825_s25, %s2789_s25   ;;  %s1772_s24 = sphi %s1823_s24, %s2788_s24  }
   0x3   : > { %s42_s29 = ssub.s32 %s1780_s26, %s1842_s28  ;;  %s45_s30 = sadd.s32 1, %s1776_s25 }
   0x4   : > { %p43_p0 = scmp.eq.s32.totalorder %s42_s29, 0  ;;  %p52_p1 = scmp.ne.s32.totalorder %s1776_s25, %s1772_s24 }
   0x5   : > { %p53_p2 = scmp.eq.s32.totalorder %s1780_s26, 0  ;;  %p1393_p4 = scmp.ge.s32.totalorder %s1780_s26, 4 }
   0x6   : > { %s1851_s8 = scalar_select %p43_p0, %s1776_s25, %s45_s30  }
   0x7   : > { %p54_p3 = por %p53_p2, %p52_p1  ;;  %226 = sbr.rel (%p1393_p4) target bundleno = 82 (0x52), region = 32 }
   0xe   : > { %229 = sbr.rel (!%p54_p3) target bundleno = 82 (0x52), region = 36  ;;  %s231_s9 = sand.u32 (%p54_p3), 1, %s1776_s25  }
   0xf   : > { %s1407_s10 = sshll.u32 (%p54_p3), %s1780_s26, 4  ;;  %s1394_s11 = sshll.u32 (%p54_p3), %s231_s9, 10 }
  0x10   : > { %s1859_s14 = scalar_lea.vmem (%p54_p3), %s2781_s1, %s1407_s10  ;;  %s1864_s15 = scalar_lea.vmem (%p54_p3), [#allocation3], %s1394_s11 }
  0x11   : > { %v249_v0 = vld [vmem:[%s1859_s14] sm:$0xff] (%p54_p3)  ;;  %v251_v1 = vld [vmem:[%s1859_s14 + $0x8] sm:$0xff] (%p54_p3) }
  0x12   : > { %v253_v2 = vld [vmem:[%s1859_s14 + $0x40] sm:$0xff] (%p54_p3)  ;;  %250 = vst [vmem:[%s1864_s15] sm:$0xff] (%p54_p3), %v249_v0  ;;  %252 = vst [vmem:[%s1864_s15 + $0x8] sm:$0xff] (%p54_p3), %v251_v1  ;;  %v255_v3 = vld [vmem:[%s1859_s14 + $0x48] sm:$0xff] (%p54_p3) }
  0x13   : > { %254 = vst [vmem:[%s1864_s15 + $0x10] sm:$0xff] (%p54_p3), %v253_v2  ;;  %v257_v4 = vld [vmem:[%s1859_s14 + $0x80] sm:$0xff] (%p54_p3)  ;;  %v259_v5 = vld [vmem:[%s1859_s14 + $0x88] sm:$0xff] (%p54_p3)  ;;  %256 = vst [vmem:[%s1864_s15 + $0x18] sm:$0xff] (%p54_p3), %v255_v3 }
  0x14   : > { %258 = vst [vmem:[%s1864_s15 + $0x20] sm:$0xff] (%p54_p3), %v257_v4  ;;  %260 = vst [vmem:[%s1864_s15 + $0x28] sm:$0xff] (%p54_p3), %v259_v5  ;;  %v261_v6 = vld [vmem:[%s1859_s14 + $0xc0] sm:$0xff] (%p54_p3)  ;;  %v263_v7 = vld [vmem:[%s1859_s14 + $0xc8] sm:$0xff] (%p54_p3) }
  0x15   : > { %v265_v8 = vld [vmem:[%s1859_s14 + $0x100] sm:$0xff]  ;;  %262 = vst [vmem:[%s1864_s15 + $0x30] sm:$0xff] %v261_v6  ;;  %264 = vst [vmem:[%s1864_s15 + $0x38] sm:$0xff] %v263_v7  ;;  %v267_v9 = vld [vmem:[%s1859_s14 + $0x108] sm:$0xff] }
  0x16   : > { %266 = vst [vmem:[%s1864_s15 + $0x40] sm:$0xff] %v265_v8  ;;  %v269_v10 = vld [vmem:[%s1859_s14 + $0x140] sm:$0xff]  ;;  %v271_v11 = vld [vmem:[%s1859_s14 + $0x148] sm:$0xff]  ;;  %268 = vst [vmem:[%s1864_s15 + $0x48] sm:$0xff] %v267_v9 }
  0x17   : > { %270 = vst [vmem:[%s1864_s15 + $0x50] sm:$0xff] %v269_v10  ;;  %272 = vst [vmem:[%s1864_s15 + $0x58] sm:$0xff] %v271_v11  ;;  %v273_v12 = vld [vmem:[%s1859_s14 + $0x180] sm:$0xff]  ;;  %v275_v13 = vld [vmem:[%s1859_s14 + $0x188] sm:$0xff] }
  0x18   : > { %v277_v14 = vld [vmem:[%s1859_s14 + $0x1c0] sm:$0xff]  ;;  %274 = vst [vmem:[%s1864_s15 + $0x60] sm:$0xff] %v273_v12  ;;  %276 = vst [vmem:[%s1864_s15 + $0x68] sm:$0xff] %v275_v13  ;;  %v279_v15 = vld [vmem:[%s1859_s14 + $0x1c8] sm:$0xff] }
  0x19   : > { %278 = vst [vmem:[%s1864_s15 + $0x70] sm:$0xff] %v277_v14  ;;  %v281_v16 = vld [vmem:[%s1859_s14 + $0x200] sm:$0xff]  ;;  %v283_v17 = vld [vmem:[%s1859_s14 + $0x208] sm:$0xff]  ;;  %280 = vst [vmem:[%s1864_s15 + $0x78] sm:$0xff] %v279_v15 }
  0x1a   : > { %282 = vst [vmem:[%s1864_s15 + $0x80] sm:$0xff] %v281_v16  ;;  %284 = vst [vmem:[%s1864_s15 + $0x88] sm:$0xff] %v283_v17  ;;  %v285_v18 = vld [vmem:[%s1859_s14 + $0x240] sm:$0xff]  ;;  %v287_v19 = vld [vmem:[%s1859_s14 + $0x248] sm:$0xff] }
  0x1b   : > { %v289_v20 = vld [vmem:[%s1859_s14 + $0x280] sm:$0xff]  ;;  %286 = vst [vmem:[%s1864_s15 + $0x90] sm:$0xff] %v285_v18  ;;  %288 = vst [vmem:[%s1864_s15 + $0x98] sm:$0xff] %v287_v19  ;;  %v291_v21 = vld [vmem:[%s1859_s14 + $0x288] sm:$0xff] }
  0x1c   : > { %290 = vst [vmem:[%s1864_s15 + $0xa0] sm:$0xff] %v289_v20  ;;  %v293_v22 = vld [vmem:[%s1859_s14 + $0x2c0] sm:$0xff]  ;;  %v295_v23 = vld [vmem:[%s1859_s14 + $0x2c8] sm:$0xff]  ;;  %292 = vst [vmem:[%s1864_s15 + $0xa8] sm:$0xff] %v291_v21 }
  0x1d   : > { %294 = vst [vmem:[%s1864_s15 + $0xb0] sm:$0xff] %v293_v22  ;;  %296 = vst [vmem:[%s1864_s15 + $0xb8] sm:$0xff] %v295_v23  ;;  %v297_v24 = vld [vmem:[%s1859_s14 + $0x300] sm:$0xff]  ;;  %v299_v25 = vld [vmem:[%s1859_s14 + $0x308] sm:$0xff] }
  0x1e   : > { %v301_v26 = vld [vmem:[%s1859_s14 + $0x340] sm:$0xff]  ;;  %298 = vst [vmem:[%s1864_s15 + $0xc0] sm:$0xff] %v297_v24  ;;  %300 = vst [vmem:[%s1864_s15 + $0xc8] sm:$0xff] %v299_v25  ;;  %v303_v27 = vld [vmem:[%s1859_s14 + $0x348] sm:$0xff] }
  0x1f   : > { %302 = vst [vmem:[%s1864_s15 + $0xd0] sm:$0xff] %v301_v26  ;;  %v305_v28 = vld [vmem:[%s1859_s14 + $0x380] sm:$0xff]  ;;  %v307_v29 = vld [vmem:[%s1859_s14 + $0x388] sm:$0xff]  ;;  %304 = vst [vmem:[%s1864_s15 + $0xd8] sm:$0xff] %v303_v27 }
  0x20   : > { %306 = vst [vmem:[%s1864_s15 + $0xe0] sm:$0xff] %v305_v28  ;;  %308 = vst [vmem:[%s1864_s15 + $0xe8] sm:$0xff] %v307_v29  ;;  %v309_v30 = vld [vmem:[%s1859_s14 + $0x3c0] sm:$0xff]  ;;  %v311_v31 = vld [vmem:[%s1859_s14 + $0x3c8] sm:$0xff] }
  0x21   : > { %v313_v32 = vld [vmem:[%s1859_s14 + $0x400] sm:$0xff]  ;;  %310 = vst [vmem:[%s1864_s15 + $0xf0] sm:$0xff] %v309_v30  ;;  %312 = vst [vmem:[%s1864_s15 + $0xf8] sm:$0xff] %v311_v31  ;;  %v315_v33 = vld [vmem:[%s1859_s14 + $0x408] sm:$0xff] }
  0x22   : > { %314 = vst [vmem:[%s1864_s15 + $0x100] sm:$0xff] %v313_v32  ;;  %v317_v34 = vld [vmem:[%s1859_s14 + $0x440] sm:$0xff]  ;;  %v319_v35 = vld [vmem:[%s1859_s14 + $0x448] sm:$0xff]  ;;  %316 = vst [vmem:[%s1864_s15 + $0x108] sm:$0xff] %v315_v33 }
  0x23   : > { %318 = vst [vmem:[%s1864_s15 + $0x110] sm:$0xff] %v317_v34  ;;  %320 = vst [vmem:[%s1864_s15 + $0x118] sm:$0xff] %v319_v35  ;;  %v321_v36 = vld [vmem:[%s1859_s14 + $0x480] sm:$0xff]  ;;  %v323_v37 = vld [vmem:[%s1859_s14 + $0x488] sm:$0xff] }
  0x24   : > { %v325_v38 = vld [vmem:[%s1859_s14 + $0x4c0] sm:$0xff]  ;;  %322 = vst [vmem:[%s1864_s15 + $0x120] sm:$0xff] %v321_v36  ;;  %324 = vst [vmem:[%s1864_s15 + $0x128] sm:$0xff] %v323_v37  ;;  %v327_v39 = vld [vmem:[%s1859_s14 + $0x4c8] sm:$0xff] }
  0x25   : > { %326 = vst [vmem:[%s1864_s15 + $0x130] sm:$0xff] %v325_v38  ;;  %v329_v40 = vld [vmem:[%s1859_s14 + $0x500] sm:$0xff]  ;;  %v331_v41 = vld [vmem:[%s1859_s14 + $0x508] sm:$0xff]  ;;  %328 = vst [vmem:[%s1864_s15 + $0x138] sm:$0xff] %v327_v39 }
  0x26   : > { %330 = vst [vmem:[%s1864_s15 + $0x140] sm:$0xff] %v329_v40  ;;  %332 = vst [vmem:[%s1864_s15 + $0x148] sm:$0xff] %v331_v41  ;;  %v333_v42 = vld [vmem:[%s1859_s14 + $0x540] sm:$0xff]  ;;  %v335_v43 = vld [vmem:[%s1859_s14 + $0x548] sm:$0xff] }
  0x27   : > { %v337_v44 = vld [vmem:[%s1859_s14 + $0x580] sm:$0xff]  ;;  %334 = vst [vmem:[%s1864_s15 + $0x150] sm:$0xff] %v333_v42  ;;  %336 = vst [vmem:[%s1864_s15 + $0x158] sm:$0xff] %v335_v43  ;;  %v339_v45 = vld [vmem:[%s1859_s14 + $0x588] sm:$0xff] }
  0x28   : > { %338 = vst [vmem:[%s1864_s15 + $0x160] sm:$0xff] %v337_v44  ;;  %v341_v46 = vld [vmem:[%s1859_s14 + $0x5c0] sm:$0xff]  ;;  %v343_v47 = vld [vmem:[%s1859_s14 + $0x5c8] sm:$0xff]  ;;  %340 = vst [vmem:[%s1864_s15 + $0x168] sm:$0xff] %v339_v45 }
  0x29   : > { %342 = vst [vmem:[%s1864_s15 + $0x170] sm:$0xff] %v341_v46  ;;  %344 = vst [vmem:[%s1864_s15 + $0x178] sm:$0xff] %v343_v47  ;;  %v345_v48 = vld [vmem:[%s1859_s14 + $0x600] sm:$0xff]  ;;  %v347_v49 = vld [vmem:[%s1859_s14 + $0x608] sm:$0xff] }
  0x2a   : > { %v349_v50 = vld [vmem:[%s1859_s14 + $0x640] sm:$0xff]  ;;  %346 = vst [vmem:[%s1864_s15 + $0x180] sm:$0xff] %v345_v48  ;;  %348 = vst [vmem:[%s1864_s15 + $0x188] sm:$0xff] %v347_v49  ;;  %v351_v51 = vld [vmem:[%s1859_s14 + $0x648] sm:$0xff] }
  0x2b   : > { %350 = vst [vmem:[%s1864_s15 + $0x190] sm:$0xff] %v349_v50  ;;  %v353_v52 = vld [vmem:[%s1859_s14 + $0x680] sm:$0xff]  ;;  %v355_v53 = vld [vmem:[%s1859_s14 + $0x688] sm:$0xff]  ;;  %352 = vst [vmem:[%s1864_s15 + $0x198] sm:$0xff] %v351_v51 }
  0x2c   : > { %354 = vst [vmem:[%s1864_s15 + $0x1a0] sm:$0xff] %v353_v52  ;;  %356 = vst [vmem:[%s1864_s15 + $0x1a8] sm:$0xff] %v355_v53  ;;  %v357_v54 = vld [vmem:[%s1859_s14 + $0x6c0] sm:$0xff]  ;;  %v359_v55 = vld [vmem:[%s1859_s14 + $0x6c8] sm:$0xff] }
  0x2d   : > { %v361_v56 = vld [vmem:[%s1859_s14 + $0x700] sm:$0xff]  ;;  %358 = vst [vmem:[%s1864_s15 + $0x1b0] sm:$0xff] %v357_v54  ;;  %360 = vst [vmem:[%s1864_s15 + $0x1b8] sm:$0xff] %v359_v55  ;;  %v363_v57 = vld [vmem:[%s1859_s14 + $0x708] sm:$0xff] }
  0x2e   : > { %362 = vst [vmem:[%s1864_s15 + $0x1c0] sm:$0xff] %v361_v56  ;;  %v365_v58 = vld [vmem:[%s1859_s14 + $0x740] sm:$0xff]  ;;  %v367_v59 = vld [vmem:[%s1859_s14 + $0x748] sm:$0xff]  ;;  %364 = vst [vmem:[%s1864_s15 + $0x1c8] sm:$0xff] %v363_v57 }
  0x2f   : > { %366 = vst [vmem:[%s1864_s15 + $0x1d0] sm:$0xff] %v365_v58  ;;  %368 = vst [vmem:[%s1864_s15 + $0x1d8] sm:$0xff] %v367_v59  ;;  %v369_v60 = vld [vmem:[%s1859_s14 + $0x780] sm:$0xff]  ;;  %v371_v61 = vld [vmem:[%s1859_s14 + $0x788] sm:$0xff] }
  0x30   : > { %v373_v62 = vld [vmem:[%s1859_s14 + $0x7c0] sm:$0xff]  ;;  %370 = vst [vmem:[%s1864_s15 + $0x1e0] sm:$0xff] %v369_v60  ;;  %372 = vst [vmem:[%s1864_s15 + $0x1e8] sm:$0xff] %v371_v61  ;;  %v375_v63 = vld [vmem:[%s1859_s14 + $0x7c8] sm:$0xff] }
  0x31   : > { %374 = vst [vmem:[%s1864_s15 + $0x1f0] sm:$0xff] %v373_v62  ;;  %v377_v0 = vld [vmem:[%s1859_s14 + $0x800] sm:$0xff]  ;;  %v379_v1 = vld [vmem:[%s1859_s14 + $0x808] sm:$0xff]  ;;  %376 = vst [vmem:[%s1864_s15 + $0x1f8] sm:$0xff] %v375_v63 }
  0x32   : > { %378 = vst [vmem:[%s1864_s15 + $0x200] sm:$0xff] %v377_v0  ;;  %380 = vst [vmem:[%s1864_s15 + $0x208] sm:$0xff] %v379_v1  ;;  %v381_v2 = vld [vmem:[%s1859_s14 + $0x840] sm:$0xff]  ;;  %v383_v3 = vld [vmem:[%s1859_s14 + $0x848] sm:$0xff] }
  0x33   : > { %v385_v4 = vld [vmem:[%s1859_s14 + $0x880] sm:$0xff]  ;;  %382 = vst [vmem:[%s1864_s15 + $0x210] sm:$0xff] %v381_v2  ;;  %384 = vst [vmem:[%s1864_s15 + $0x218] sm:$0xff] %v383_v3  ;;  %v387_v5 = vld [vmem:[%s1859_s14 + $0x888] sm:$0xff] }
  0x34   : > { %386 = vst [vmem:[%s1864_s15 + $0x220] sm:$0xff] %v385_v4  ;;  %v389_v6 = vld [vmem:[%s1859_s14 + $0x8c0] sm:$0xff]  ;;  %v391_v7 = vld [vmem:[%s1859_s14 + $0x8c8] sm:$0xff]  ;;  %388 = vst [vmem:[%s1864_s15 + $0x228] sm:$0xff] %v387_v5 }
  0x35   : > { %390 = vst [vmem:[%s1864_s15 + $0x230] sm:$0xff] %v389_v6  ;;  %392 = vst [vmem:[%s1864_s15 + $0x238] sm:$0xff] %v391_v7  ;;  %v393_v8 = vld [vmem:[%s1859_s14 + $0x900] sm:$0xff]  ;;  %v395_v9 = vld [vmem:[%s1859_s14 + $0x908] sm:$0xff] }
  0x36   : > { %v397_v10 = vld [vmem:[%s1859_s14 + $0x940] sm:$0xff]  ;;  %394 = vst [vmem:[%s1864_s15 + $0x240] sm:$0xff] %v393_v8  ;;  %396 = vst [vmem:[%s1864_s15 + $0x248] sm:$0xff] %v395_v9  ;;  %v399_v11 = vld [vmem:[%s1859_s14 + $0x948] sm:$0xff] }
  0x37   : > { %398 = vst [vmem:[%s1864_s15 + $0x250] sm:$0xff] %v397_v10  ;;  %v401_v12 = vld [vmem:[%s1859_s14 + $0x980] sm:$0xff]  ;;  %v403_v13 = vld [vmem:[%s1859_s14 + $0x988] sm:$0xff]  ;;  %400 = vst [vmem:[%s1864_s15 + $0x258] sm:$0xff] %v399_v11 }
  0x38   : > { %402 = vst [vmem:[%s1864_s15 + $0x260] sm:$0xff] %v401_v12  ;;  %404 = vst [vmem:[%s1864_s15 + $0x268] sm:$0xff] %v403_v13  ;;  %v405_v14 = vld [vmem:[%s1859_s14 + $0x9c0] sm:$0xff]  ;;  %v407_v15 = vld [vmem:[%s1859_s14 + $0x9c8] sm:$0xff] }
  0x39   : > { %v409_v16 = vld [vmem:[%s1859_s14 + $0xa00] sm:$0xff]  ;;  %406 = vst [vmem:[%s1864_s15 + $0x270] sm:$0xff] %v405_v14  ;;  %408 = vst [vmem:[%s1864_s15 + $0x278] sm:$0xff] %v407_v15  ;;  %v411_v17 = vld [vmem:[%s1859_s14 + $0xa08] sm:$0xff] }
  0x3a   : > { %410 = vst [vmem:[%s1864_s15 + $0x280] sm:$0xff] %v409_v16  ;;  %v413_v18 = vld [vmem:[%s1859_s14 + $0xa40] sm:$0xff]  ;;  %v415_v19 = vld [vmem:[%s1859_s14 + $0xa48] sm:$0xff]  ;;  %412 = vst [vmem:[%s1864_s15 + $0x288] sm:$0xff] %v411_v17 }
  0x3b   : > { %414 = vst [vmem:[%s1864_s15 + $0x290] sm:$0xff] %v413_v18  ;;  %416 = vst [vmem:[%s1864_s15 + $0x298] sm:$0xff] %v415_v19  ;;  %v417_v20 = vld [vmem:[%s1859_s14 + $0xa80] sm:$0xff]  ;;  %v419_v21 = vld [vmem:[%s1859_s14 + $0xa88] sm:$0xff] }
  0x3c   : > { %v421_v22 = vld [vmem:[%s1859_s14 + $0xac0] sm:$0xff]  ;;  %418 = vst [vmem:[%s1864_s15 + $0x2a0] sm:$0xff] %v417_v20  ;;  %420 = vst [vmem:[%s1864_s15 + $0x2a8] sm:$0xff] %v419_v21  ;;  %v423_v23 = vld [vmem:[%s1859_s14 + $0xac8] sm:$0xff] }
  0x3d   : > { %422 = vst [vmem:[%s1864_s15 + $0x2b0] sm:$0xff] %v421_v22  ;;  %v425_v24 = vld [vmem:[%s1859_s14 + $0xb00] sm:$0xff]  ;;  %v427_v25 = vld [vmem:[%s1859_s14 + $0xb08] sm:$0xff]  ;;  %424 = vst [vmem:[%s1864_s15 + $0x2b8] sm:$0xff] %v423_v23 }
  0x3e   : > { %426 = vst [vmem:[%s1864_s15 + $0x2c0] sm:$0xff] %v425_v24  ;;  %428 = vst [vmem:[%s1864_s15 + $0x2c8] sm:$0xff] %v427_v25  ;;  %v429_v26 = vld [vmem:[%s1859_s14 + $0xb40] sm:$0xff]  ;;  %v431_v27 = vld [vmem:[%s1859_s14 + $0xb48] sm:$0xff] }
  0x3f   : > { %v433_v28 = vld [vmem:[%s1859_s14 + $0xb80] sm:$0xff]  ;;  %430 = vst [vmem:[%s1864_s15 + $0x2d0] sm:$0xff] %v429_v26  ;;  %432 = vst [vmem:[%s1864_s15 + $0x2d8] sm:$0xff] %v431_v27  ;;  %v435_v29 = vld [vmem:[%s1859_s14 + $0xb88] sm:$0xff] }
  0x40   : > { %434 = vst [vmem:[%s1864_s15 + $0x2e0] sm:$0xff] %v433_v28  ;;  %v437_v30 = vld [vmem:[%s1859_s14 + $0xbc0] sm:$0xff]  ;;  %v439_v31 = vld [vmem:[%s1859_s14 + $0xbc8] sm:$0xff]  ;;  %436 = vst [vmem:[%s1864_s15 + $0x2e8] sm:$0xff] %v435_v29 }
  0x41   : > { %438 = vst [vmem:[%s1864_s15 + $0x2f0] sm:$0xff] %v437_v30  ;;  %440 = vst [vmem:[%s1864_s15 + $0x2f8] sm:$0xff] %v439_v31  ;;  %v441_v32 = vld [vmem:[%s1859_s14 + $0xc00] sm:$0xff]  ;;  %v443_v33 = vld [vmem:[%s1859_s14 + $0xc08] sm:$0xff] }
  0x42   : > { %v445_v34 = vld [vmem:[%s1859_s14 + $0xc40] sm:$0xff]  ;;  %442 = vst [vmem:[%s1864_s15 + $0x300] sm:$0xff] %v441_v32  ;;  %444 = vst [vmem:[%s1864_s15 + $0x308] sm:$0xff] %v443_v33  ;;  %v447_v35 = vld [vmem:[%s1859_s14 + $0xc48] sm:$0xff] }
  0x43   : > { %446 = vst [vmem:[%s1864_s15 + $0x310] sm:$0xff] %v445_v34  ;;  %v449_v36 = vld [vmem:[%s1859_s14 + $0xc80] sm:$0xff]  ;;  %v451_v37 = vld [vmem:[%s1859_s14 + $0xc88] sm:$0xff]  ;;  %448 = vst [vmem:[%s1864_s15 + $0x318] sm:$0xff] %v447_v35 }
  0x44   : > { %450 = vst [vmem:[%s1864_s15 + $0x320] sm:$0xff] %v449_v36  ;;  %452 = vst [vmem:[%s1864_s15 + $0x328] sm:$0xff] %v451_v37  ;;  %v453_v38 = vld [vmem:[%s1859_s14 + $0xcc0] sm:$0xff]  ;;  %v455_v39 = vld [vmem:[%s1859_s14 + $0xcc8] sm:$0xff] }
  0x45   : > { %v457_v40 = vld [vmem:[%s1859_s14 + $0xd00] sm:$0xff]  ;;  %454 = vst [vmem:[%s1864_s15 + $0x330] sm:$0xff] %v453_v38  ;;  %456 = vst [vmem:[%s1864_s15 + $0x338] sm:$0xff] %v455_v39  ;;  %v459_v41 = vld [vmem:[%s1859_s14 + $0xd08] sm:$0xff] }
  0x46   : > { %458 = vst [vmem:[%s1864_s15 + $0x340] sm:$0xff] %v457_v40  ;;  %v461_v42 = vld [vmem:[%s1859_s14 + $0xd40] sm:$0xff]  ;;  %v463_v43 = vld [vmem:[%s1859_s14 + $0xd48] sm:$0xff]  ;;  %460 = vst [vmem:[%s1864_s15 + $0x348] sm:$0xff] %v459_v41 }
  0x47   : > { %462 = vst [vmem:[%s1864_s15 + $0x350] sm:$0xff] %v461_v42  ;;  %464 = vst [vmem:[%s1864_s15 + $0x358] sm:$0xff] %v463_v43  ;;  %v465_v44 = vld [vmem:[%s1859_s14 + $0xd80] sm:$0xff]  ;;  %v467_v45 = vld [vmem:[%s1859_s14 + $0xd88] sm:$0xff] }
  0x48   : > { %v469_v46 = vld [vmem:[%s1859_s14 + $0xdc0] sm:$0xff]  ;;  %466 = vst [vmem:[%s1864_s15 + $0x360] sm:$0xff] %v465_v44  ;;  %468 = vst [vmem:[%s1864_s15 + $0x368] sm:$0xff] %v467_v45  ;;  %v471_v47 = vld [vmem:[%s1859_s14 + $0xdc8] sm:$0xff] }
  0x49   : > { %470 = vst [vmem:[%s1864_s15 + $0x370] sm:$0xff] %v469_v46  ;;  %v473_v48 = vld [vmem:[%s1859_s14 + $0xe00] sm:$0xff]  ;;  %v475_v49 = vld [vmem:[%s1859_s14 + $0xe08] sm:$0xff]  ;;  %472 = vst [vmem:[%s1864_s15 + $0x378] sm:$0xff] %v471_v47 }
  0x4a   : > { %474 = vst [vmem:[%s1864_s15 + $0x380] sm:$0xff] %v473_v48  ;;  %476 = vst [vmem:[%s1864_s15 + $0x388] sm:$0xff] %v475_v49  ;;  %v477_v50 = vld [vmem:[%s1859_s14 + $0xe40] sm:$0xff]  ;;  %v479_v51 = vld [vmem:[%s1859_s14 + $0xe48] sm:$0xff] }
  0x4b   : > { %v481_v52 = vld [vmem:[%s1859_s14 + $0xe80] sm:$0xff]  ;;  %478 = vst [vmem:[%s1864_s15 + $0x390] sm:$0xff] %v477_v50  ;;  %480 = vst [vmem:[%s1864_s15 + $0x398] sm:$0xff] %v479_v51  ;;  %v483_v53 = vld [vmem:[%s1859_s14 + $0xe88] sm:$0xff] }
  0x4c   : > { %482 = vst [vmem:[%s1864_s15 + $0x3a0] sm:$0xff] %v481_v52  ;;  %v485_v54 = vld [vmem:[%s1859_s14 + $0xec0] sm:$0xff]  ;;  %v487_v55 = vld [vmem:[%s1859_s14 + $0xec8] sm:$0xff]  ;;  %484 = vst [vmem:[%s1864_s15 + $0x3a8] sm:$0xff] %v483_v53 }
  0x4d   : > { %486 = vst [vmem:[%s1864_s15 + $0x3b0] sm:$0xff] %v485_v54  ;;  %488 = vst [vmem:[%s1864_s15 + $0x3b8] sm:$0xff] %v487_v55  ;;  %v489_v56 = vld [vmem:[%s1859_s14 + $0xf00] sm:$0xff]  ;;  %v491_v57 = vld [vmem:[%s1859_s14 + $0xf08] sm:$0xff] }
  0x4e   : > { %v493_v58 = vld [vmem:[%s1859_s14 + $0xf40] sm:$0xff]  ;;  %490 = vst [vmem:[%s1864_s15 + $0x3c0] sm:$0xff] %v489_v56  ;;  %492 = vst [vmem:[%s1864_s15 + $0x3c8] sm:$0xff] %v491_v57  ;;  %v495_v59 = vld [vmem:[%s1859_s14 + $0xf48] sm:$0xff] }
  0x4f   : > { %494 = vst [vmem:[%s1864_s15 + $0x3d0] sm:$0xff] %v493_v58  ;;  %v497_v60 = vld [vmem:[%s1859_s14 + $0xf80] sm:$0xff]  ;;  %v499_v61 = vld [vmem:[%s1859_s14 + $0xf88] sm:$0xff]  ;;  %496 = vst [vmem:[%s1864_s15 + $0x3d8] sm:$0xff] %v495_v59 }
  0x50   : > { %498 = vst [vmem:[%s1864_s15 + $0x3e0] sm:$0xff] %v497_v60  ;;  %500 = vst [vmem:[%s1864_s15 + $0x3e8] sm:$0xff] %v499_v61  ;;  %v501_v62 = vld [vmem:[%s1859_s14 + $0xfc0] sm:$0xff]  ;;  %v503_v63 = vld [vmem:[%s1859_s14 + $0xfc8] sm:$0xff] }
  0x51   : > { %502 = vst [vmem:[%s1864_s15 + $0x3f0] sm:$0xff] %v501_v62  ;;  %504 = vst [vmem:[%s1864_s15 + $0x3f8] sm:$0xff] %v503_v63 }
  0x52 PF: > { %p1397_p5 = scmp.ge.s32.totalorder %s1780_s26, 1  ;;  %p527_p6 = scmp.lt.s32.totalorder %s1780_s26, 5 }
  0x54   : > { %p528_p7 = pnand %p1397_p5, %p527_p6 }
  0x55   : > { %s534_s16 = sand.u32 (!%p528_p7), 1, %s1772_s24   ;;  %s1399_s17 = sshll.u32 (!%p528_p7), %s1839_s27, 1 }
  0x56   : > { %531 = sbr.rel (%p528_p7) target bundleno = 930 (0x3a2), region = 67  ;;  %s1398_s18 = sshll.u32 (!%p528_p7), %s534_s16, 10 }
  0x57   : > { %p572_p8 = scmp.lt.s32.totalorder (!%p528_p7), %s1399_s17, 7  ;;  %s1400_s19 = sshll.u32 (!%p528_p7), %s1839_s27, 5 }
  0x58   : > { %p577_p9 = scmp.lt.s32.totalorder (!%p528_p7), %s1400_s19, 127  ;;  %s2135_s24 = scalar_lea.vmem (!%p528_p7), [#allocation3], %s1398_s18 }
  0x59   : > { %p1403_p10 = scmp.ne.s32.totalorder (!%p528_p7), %s1839_s27, 0 }
  0x5d   : > { %s2792_s17 = smov (!%p572_p8, %s1399_s17), 7  ;;  %s2794_s19 = smov (!%p577_p9, %s1400_s19), 127 }
  0x5e   : > { %s574_s22 = scalar_lea.vmem %s2782_s2, %s2792_s17  ;;  %s1408_s23 = sshll.u32 %s2794_s19, 4  ;;  %v1782_v0 = vmov (!%p1403_p10), 0.0  }
  0x5f   : > { %s2133_s30 = scalar_lea.vmem %s2783_s3, %s1408_s23  ;;  %586 = sbr.rel (%p1403_p10) target bundleno = 102 (0x66), region = 75  ;;  %587 = vst [vmem:[#allocation2] sm:$0xff] (!%p1403_p10), %v1782_v0  ;;  %588 = vst [vmem:[#allocation2 + $0x8] sm:$0xff] (!%p1403_p10), %v1782_v0 }
  0x66 PF: > { %v594_v1 = vld [vmem:[%s2135_s24 + $0x8] sm:$0xff]  ;;  %v596_v2 = vld [vmem:[%s2135_s24 + $0x18] sm:$0xff]  ;;  %v593_v3 = vld [vmem:[%s2135_s24] sm:$0xff]  ;;  %p1404_p11 = scmp.ne.s32.totalorder %s1839_s27, 3 }
  0x67   : > { %v1409_v4 = vpack.c.bf16 %v596_v2, %v594_v1  ;;  %v595_v5 = vld [vmem:[%s2135_s24 + $0x10] sm:$0xff]  ;;  %v598_v6 = vld [vmem:[%s2135_s24 + $0x28] sm:$0xff]  ;;  %v600_v7 = vld [vmem:[%s2135_s24 + $0x38] sm:$0xff] }
  0x68   : > { %v1411_v8 = vpack.c.bf16 %v595_v5, %v593_v3  ;;  %v1413_v9 = vpack.c.bf16 %v600_v7, %v598_v6  ;;  %v597_v10 = vld [vmem:[%s2135_s24 + $0x20] sm:$0xff]  ;;  %v599_v11 = vld [vmem:[%s2135_s24 + $0x30] sm:$0xff]  ;;  %v602_v12 = vld [vmem:[%s2135_s24 + $0x48] sm:$0xff] }
  0x69   : > { %1410 = vmatprep.subr.bf16.mxu0 %v1409_v4  ;;  %v604_v13 = vld [vmem:[%s2135_s24 + $0x58] sm:$0xff]  ;;  %v1415_v14 = vpack.c.bf16 %v599_v11, %v597_v10  ;;  %v601_v16 = vld [vmem:[%s2135_s24 + $0x40] sm:$0xff]  ;;  %v603_v17 = vld [vmem:[%s2135_s24 + $0x50] sm:$0xff] }
  0x6a   : > { %1412 = vmatpush1.bf16.msra.mxu0 %v1411_v8  ;;  %v1417_v15 = vpack.c.bf16 %v604_v13, %v602_v12  ;;  %v606_v18 = vld [vmem:[%s2135_s24 + $0x68] sm:$0xff]  ;;  %v608_v19 = vld [vmem:[%s2135_s24 + $0x78] sm:$0xff]  ;;  %v1419_v20 = vpack.c.bf16 %v603_v17, %v601_v16  ;;  %v605_v22 = vld [vmem:[%s2135_s24 + $0x60] sm:$0xff] }
  0x6b   : > { %1414 = vmatprep.subr.bf16.mxu0 %v1413_v9  ;;  %v1421_v21 = vpack.c.bf16 %v608_v19, %v606_v18  ;;  %v607_v23 = vld [vmem:[%s2135_s24 + $0x70] sm:$0xff]  ;;  %v610_v24 = vld [vmem:[%s2135_s24 + $0x88] sm:$0xff]  ;;  %v612_v25 = vld [vmem:[%s2135_s24 + $0x98] sm:$0xff] }
  0x6c   : > { %v1423_v26 = vpack.c.bf16 %v607_v23, %v605_v22  ;;  %v1425_v27 = vpack.c.bf16 %v612_v25, %v610_v24  ;;  %v609_v28 = vld [vmem:[%s2135_s24 + $0x80] sm:$0xff]  ;;  %v611_v29 = vld [vmem:[%s2135_s24 + $0x90] sm:$0xff]  ;;  %v614_v30 = vld [vmem:[%s2135_s24 + $0xa8] sm:$0xff] }
  0x6d   : > { %v616_v31 = vld [vmem:[%s2135_s24 + $0xb8] sm:$0xff]  ;;  %v1427_v32 = vpack.c.bf16 %v611_v29, %v609_v28  ;;  %v613_v34 = vld [vmem:[%s2135_s24 + $0xa0] sm:$0xff]  ;;  %v615_v35 = vld [vmem:[%s2135_s24 + $0xb0] sm:$0xff] }
  0x6e   : > { %1416 = vmatpush1.bf16.msra.mxu0 %v1415_v14  ;;  %v1429_v33 = vpack.c.bf16 %v616_v31, %v614_v30  ;;  %v618_v36 = vld [vmem:[%s2135_s24 + $0xc8] sm:$0xff]  ;;  %v620_v37 = vld [vmem:[%s2135_s24 + $0xd8] sm:$0xff]  ;;  %v1431_v38 = vpack.c.bf16 %v615_v35, %v613_v34  ;;  %v617_v40 = vld [vmem:[%s2135_s24 + $0xc0] sm:$0xff] }
  0x6f   : > { %1418 = vmatprep.subr.bf16.mxu0 %v1417_v15  ;;  %v1433_v39 = vpack.c.bf16 %v620_v37, %v618_v36  ;;  %v619_v41 = vld [vmem:[%s2135_s24 + $0xd0] sm:$0xff]  ;;  %v590_v42 = vld [vmem:[%s2780_s0 + $0x8] sm:$0xff]  ;;  %v622_v43 = vld [vmem:[%s2135_s24 + $0xe8] sm:$0xff] }
  0x70   : > { %v624_v44 = vld [vmem:[%s2135_s24 + $0xf8] sm:$0xff]  ;;  %797 = vmatprep.mubr.f32.mxu0 %v590_v42  ;;  %v1435_v45 = vpack.c.bf16 %v619_v41, %v617_v40  ;;  %v621_v47 = vld [vmem:[%s2135_s24 + $0xe0] sm:$0xff]  ;;  %v623_v48 = vld [vmem:[%s2135_s24 + $0xf0] sm:$0xff] }
  0x71   : > { %v1437_v46 = vpack.c.bf16 %v624_v44, %v622_v43  ;;  %v626_v49 = vld [vmem:[%s2135_s24 + $0x108] sm:$0xff]  ;;  %v628_v50 = vld [vmem:[%s2135_s24 + $0x118] sm:$0xff]  ;;  %v1439_v51 = vpack.c.bf16 %v623_v48, %v621_v47  ;;  %v625_v53 = vld [vmem:[%s2135_s24 + $0x100] sm:$0xff] }
  0x72   : > { %1420 = vmatpush1.bf16.msra.mxu0 %v1419_v20  ;;  %v1441_v52 = vpack.c.bf16 %v628_v50, %v626_v49  ;;  %v627_v54 = vld [vmem:[%s2135_s24 + $0x110] sm:$0xff]  ;;  %v630_v55 = vld [vmem:[%s2135_s24 + $0x128] sm:$0xff]  ;;  %v632_v56 = vld [vmem:[%s2135_s24 + $0x138] sm:$0xff] }
  0x73   : > { %1422 = vmatprep.subr.bf16.mxu0 %v1421_v21  ;;  %v1443_v57 = vpack.c.bf16 %v627_v54, %v625_v53  ;;  %v1445_v58 = vpack.c.bf16 %v632_v56, %v630_v55  ;;  %v629_v59 = vld [vmem:[%s2135_s24 + $0x120] sm:$0xff]  ;;  %v631_v60 = vld [vmem:[%s2135_s24 + $0x130] sm:$0xff]  ;;  %v634_v61 = vld [vmem:[%s2135_s24 + $0x148] sm:$0xff] }
  0x74   : > { %v636_v62 = vld [vmem:[%s2135_s24 + $0x158] sm:$0xff]  ;;  %v1447_v63 = vpack.c.bf16 %v631_v60, %v629_v59  ;;  %v633_v1 = vld [vmem:[%s2135_s24 + $0x140] sm:$0xff]  ;;  %v635_v2 = vld [vmem:[%s2135_s24 + $0x150] sm:$0xff] }
  0x75   : > { %v1449_v0 = vpack.c.bf16 %v636_v62, %v634_v61  ;;  %v638_v3 = vld [vmem:[%s2135_s24 + $0x168] sm:$0xff]  ;;  %v640_v4 = vld [vmem:[%s2135_s24 + $0x178] sm:$0xff]  ;;  %v1451_v5 = vpack.c.bf16 %v635_v2, %v633_v1  ;;  %v637_v7 = vld [vmem:[%s2135_s24 + $0x160] sm:$0xff] }
  0x76   : > { %1424 = vmatpush1.bf16.msra.mxu0 %v1423_v26  ;;  %v1453_v6 = vpack.c.bf16 %v640_v4, %v638_v3  ;;  %v639_v8 = vld [vmem:[%s2135_s24 + $0x170] sm:$0xff]  ;;  %v642_v9 = vld [vmem:[%s2135_s24 + $0x188] sm:$0xff]  ;;  %v644_v10 = vld [vmem:[%s2135_s24 + $0x198] sm:$0xff] }
  0x77   : > { %1426 = vmatprep.subr.bf16.mxu0 %v1425_v27  ;;  %v641_v11 = vld [vmem:[%s2135_s24 + $0x180] sm:$0xff]  ;;  %v643_v12 = vld [vmem:[%s2135_s24 + $0x190] sm:$0xff]  ;;  %v1455_v13 = vpack.c.bf16 %v639_v8, %v637_v7  ;;  %v646_v14 = vld [vmem:[%s2135_s24 + $0x1a8] sm:$0xff]  ;;  %v1457_v19 = vpack.c.bf16 %v644_v10, %v642_v9 }
  0x78   : > { %v648_v15 = vld [vmem:[%s2135_s24 + $0x1b8] sm:$0xff]  ;;  %v882_v17 = vld [vmem:[%s2133_s30 + $0x18] sm:$0xff]  ;;  %v879_v18 = vld [vmem:[%s2133_s30] sm:$0xff]  ;;  %v1459_v30 = vpack.c.bf16 %v643_v12, %v641_v11 }
  0x79   : > { %v880_v16 = vld [vmem:[%s2133_s30 + $0x8] sm:$0xff]  ;;  %v881_v21 = vld [vmem:[%s2133_s30 + $0x10] sm:$0xff]  ;;  %v886_v23 = vld [vmem:[%s2133_s30 + $0x38] sm:$0xff]  ;;  %v1461_v34 = vpack.c.bf16 %v648_v15, %v646_v14 }
  0x7a   : > { %1428 = vmatpush1.bf16.msra.mxu0 %v1427_v32  ;;  %v1537_v20 = vpack.c.bf16 %v882_v17, %v880_v16  ;;  %v884_v22 = vld [vmem:[%s2133_s30 + $0x28] sm:$0xff]  ;;  %v1539_v24 = vpack.c.bf16 %v881_v21, %v879_v18  ;;  %v883_v26 = vld [vmem:[%s2133_s30 + $0x20] sm:$0xff]  ;;  %v885_v27 = vld [vmem:[%s2133_s30 + $0x30] sm:$0xff] }
  0x7b   : > { %1430 = vmatprep.subr.bf16.mxu0 %v1429_v33  ;;  %v1541_v25 = vpack.c.bf16 %v886_v23, %v884_v22  ;;  %v888_v28 = vld [vmem:[%s2133_s30 + $0x48] sm:$0xff]  ;;  %v890_v29 = vld [vmem:[%s2133_s30 + $0x58] sm:$0xff]  ;;  %v645_v31 = vld [vmem:[%s2135_s24 + $0x1a0] sm:$0xff]  ;;  %v1543_v33 = vpack.c.bf16 %v885_v27, %v883_v26 }
  0x7c   : > { %1538 = vmatprep.subr.bf16.mxu1 %v1537_v20  ;;  %v647_v32 = vld [vmem:[%s2135_s24 + $0x1b0] sm:$0xff]  ;;  %v650_v35 = vld [vmem:[%s2135_s24 + $0x1c8] sm:$0xff]  ;;  %v1545_v36 = vpack.c.bf16 %v890_v29, %v888_v28  ;;  %v892_v40 = vld [vmem:[%s2133_s30 + $0x68] sm:$0xff] }
  0x7d   : > { %1540 = vmatpush1.bf16.msra.mxu1 %v1539_v24  ;;  %v887_v37 = vld [vmem:[%s2133_s30 + $0x40] sm:$0xff]  ;;  %v894_v41 = vld [vmem:[%s2133_s30 + $0x78] sm:$0xff]  ;;  %v1463_v42 = vpack.c.bf16 %v647_v32, %v645_v31  ;;  %v649_v43 = vld [vmem:[%s2135_s24 + $0x1c0] sm:$0xff] }
  0x7e   : > { %1432 = vmatpush1.bf16.msra.mxu0 %v1431_v38  ;;  %1542 = vmatprep.subr.bf16.mxu1 %v1541_v25  ;;  %v889_v38 = vld [vmem:[%s2133_s30 + $0x50] sm:$0xff]  ;;  %v651_v44 = vld [vmem:[%s2135_s24 + $0x1d0] sm:$0xff]  ;;  %v654_v47 = vld [vmem:[%s2135_s24 + $0x1e8] sm:$0xff]  ;;  %v1549_v48 = vpack.c.bf16 %v894_v41, %v892_v40 }
  0x7f   : > { %1434 = vmatprep.subr.bf16.mxu0 %v1433_v39  ;;  %v652_v39 = vld [vmem:[%s2135_s24 + $0x1d8] sm:$0xff]  ;;  %v891_v49 = vld [vmem:[%s2133_s30 + $0x60] sm:$0xff]  ;;  %v893_v50 = vld [vmem:[%s2133_s30 + $0x70] sm:$0xff]  ;;  %v1467_v54 = vpack.c.bf16 %v651_v44, %v649_v43 }
  0x80   : > { %v898_v53 = vld [vmem:[%s2133_s30 + $0x98] sm:$0xff]  ;;  %v653_v55 = vld [vmem:[%s2135_s24 + $0x1e0] sm:$0xff]  ;;  %v655_v56 = vld [vmem:[%s2135_s24 + $0x1f0] sm:$0xff] }
  0x81   : > { %1544 = vmatpush1.bf16.msra.mxu1 %v1543_v33  ;;  %v658_v59 = vld [vmem:[%s2135_s24 + $0x208] sm:$0xff]  ;;  %v895_v61 = vld [vmem:[%s2133_s30 + $0x80] sm:$0xff]  ;;  %v897_v62 = vld [vmem:[%s2133_s30 + $0x90] sm:$0xff]  ;;  %v1471_v2 = vpack.c.bf16 %v655_v56, %v653_v55 }
  0x82   : > { %1436 = vmatpush1.bf16.msra.mxu0 %v1435_v45  ;;  %v1547_v45 = vpack.c.bf16 %v889_v38, %v887_v37  ;;  %1546 = vmatprep.subr.bf16.mxu1 %v1545_v36  ;;  %v902_v1 = vld [vmem:[%s2133_s30 + $0xb8] sm:$0xff]  ;;  %v1555_v3 = vpack.c.bf16 %v897_v62, %v895_v61  ;;  %v664_v9 = vld [vmem:[%s2135_s24 + $0x238] sm:$0xff]  ;;  %v899_v10 = vld [vmem:[%s2133_s30 + $0xa0] sm:$0xff] }
  0x83   : > { %1438 = vmatprep.subr.bf16.mxu0 %v1437_v46  ;;  %v1465_v46 = vpack.c.bf16 %v652_v39, %v650_v35  ;;  %v662_v7 = vld [vmem:[%s2135_s24 + $0x228] sm:$0xff]  ;;  %v901_v11 = vld [vmem:[%s2133_s30 + $0xb0] sm:$0xff]  ;;  %v904_v12 = vld [vmem:[%s2133_s30 + $0xc8] sm:$0xff] }
  0x84   : > { %v589_v14 = vld [vmem:[%s2780_s0] sm:$0xff]  ;;  %v661_v16 = vld [vmem:[%s2135_s24 + $0x220] sm:$0xff]  ;;  %v1477_v17 = vpack.c.bf16 %v664_v9, %v662_v7  ;;  %v592_v20 = vld [vmem:[%s2780_s0 + $0x18] sm:$0xff]  ;;  %v1559_v21 = vpack.c.bf16 %v901_v11, %v899_v10 }
  0x85   : > { %1548 = vmatpush1.bf16.msra.mxu1 %v1547_v45  ;;  %v663_v18 = vld [vmem:[%s2135_s24 + $0x230] sm:$0xff]  ;;  %v668_v22 = vld [vmem:[%s2135_s24 + $0x258] sm:$0xff]  ;;  %v905_v25 = vld [vmem:[%s2133_s30 + $0xd0] sm:$0xff] }
  0x86   : > { %1440 = vmatpush1.bf16.msra.mxu0 %v1439_v51  ;;  %v656_v51 = vld [vmem:[%s2135_s24 + $0x1f8] sm:$0xff]  ;;  %1550 = vmatprep.subr.bf16.mxu1 %v1549_v48  ;;  %v903_v24 = vld [vmem:[%s2133_s30 + $0xc0] sm:$0xff]  ;;  %v910_v27 = vld [vmem:[%s2133_s30 + $0xf8] sm:$0xff]  ;;  %v1479_v28 = vpack.c.bf16 %v663_v18, %v661_v16 }
  0x87   : > { %1442 = vmatprep.subr.bf16.mxu0 %v1441_v52  ;;  %v896_v52 = vld [vmem:[%s2133_s30 + $0x88] sm:$0xff]  ;;  %v667_v31 = vld [vmem:[%s2135_s24 + $0x250] sm:$0xff]  ;;  %v670_v32 = vld [vmem:[%s2135_s24 + $0x268] sm:$0xff]  ;;  %v1563_v33 = vpack.c.bf16 %v905_v25, %v903_v24 }
  0x88   : > { %v1553_v60 = vpack.c.bf16 %v898_v53, %v896_v52  ;;  %v908_v26 = vld [vmem:[%s2133_s30 + $0xe8] sm:$0xff]  ;;  %v907_v36 = vld [vmem:[%s2133_s30 + $0xe0] sm:$0xff]  ;;  %v909_v37 = vld [vmem:[%s2133_s30 + $0xf0] sm:$0xff] }
  0x89   : > { %v1565_v35 = vpack.c.bf16 %v910_v27, %v908_v26  ;;  %v912_v38 = vld [vmem:[%s2133_s30 + $0x108] sm:$0xff]  ;;  %v914_v39 = vld [vmem:[%s2133_s30 + $0x118] sm:$0xff]  ;;  %v671_v43 = vld [vmem:[%s2135_s24 + $0x270] sm:$0xff]  ;;  %v1567_v45 = vpack.c.bf16 %v909_v37, %v907_v36 }
  0x8a   : > { %1444 = vmatpush1.bf16.msra.mxu0 %v1443_v57  ;;  %v1551_v57 = vpack.c.bf16 %v893_v50, %v891_v49  ;;  %v674_v44 = vld [vmem:[%s2135_s24 + $0x288] sm:$0xff]  ;;  %v911_v48 = vld [vmem:[%s2133_s30 + $0x100] sm:$0xff]  ;;  %v913_v49 = vld [vmem:[%s2133_s30 + $0x110] sm:$0xff] }
  0x8b   : > { %1446 = vmatprep.subr.bf16.mxu0 %v1445_v58  ;;  %v1469_v58 = vpack.c.bf16 %v656_v51, %v654_v47  ;;  %v1569_v47 = vpack.c.bf16 %v914_v39, %v912_v38  ;;  %v916_v50 = vld [vmem:[%s2133_s30 + $0x128] sm:$0xff]  ;;  %v918_v51 = vld [vmem:[%s2133_s30 + $0x138] sm:$0xff]  ;;  %v675_v55 = vld [vmem:[%s2135_s24 + $0x290] sm:$0xff] }
  0x8c   : > { %1552 = vmatpush1.bf16.msra.mxu1 %v1551_v57  ;;  %v678_v56 = vld [vmem:[%s2135_s24 + $0x2a8] sm:$0xff]  ;;  %v1571_v57 = vpack.c.bf16 %v913_v49, %v911_v48  ;;  %v917_v61 = vld [vmem:[%s2133_s30 + $0x130] sm:$0xff]  ;;  %v920_v62 = vld [vmem:[%s2133_s30 + $0x148] sm:$0xff] }
  0x8d   : > { %1554 = vmatprep.subr.bf16.mxu1 %v1553_v60  ;;  %v915_v60 = vld [vmem:[%s2133_s30 + $0x120] sm:$0xff]  ;;  %v921_v9 = vld [vmem:[%s2133_s30 + $0x150] sm:$0xff]  ;;  %v924_v10 = vld [vmem:[%s2133_s30 + $0x168] sm:$0xff] }
  0x8e   : > { %1448 = vmatpush1.bf16.msra.mxu0 %v1447_v63  ;;  %v660_v63 = vld [vmem:[%s2135_s24 + $0x218] sm:$0xff]  ;;  %v926_v11 = vld [vmem:[%s2133_s30 + $0x178] sm:$0xff]  ;;  %v685_v26 = vld [vmem:[%s2135_s24 + $0x2e0] sm:$0xff] }
  0x8f   : > { %1450 = vmatprep.subr.bf16.mxu0 %v1449_v0  ;;  %v900_v0 = vld [vmem:[%s2133_s30 + $0xa8] sm:$0xff]  ;;  %v1473_v4 = vpack.c.bf16 %v660_v63, %v658_v59  ;;  %v1573_v59 = vpack.c.bf16 %v918_v51, %v916_v50  ;;  %v922_v63 = vld [vmem:[%s2133_s30 + $0x158] sm:$0xff]  ;;  %v687_v27 = vld [vmem:[%s2135_s24 + $0x2f0] sm:$0xff] }
  0x90   : > { %v1557_v8 = vpack.c.bf16 %v902_v1, %v900_v0  ;;  %1556 = vmatpush1.bf16.msra.mxu1 %v1555_v3  ;;  %v679_v3 = vld [vmem:[%s2135_s24 + $0x2b0] sm:$0xff]  ;;  %v1577_v7 = vpack.c.bf16 %v922_v63, %v920_v62  ;;  %v686_v16 = vld [vmem:[%s2135_s24 + $0x2e8] sm:$0xff]  ;;  %v688_v18 = vld [vmem:[%s2135_s24 + $0x2f8] sm:$0xff]  ;;  %v1503_v36 = vpack.c.bf16 %v687_v27, %v685_v26 }
  0x91   : > { %v1501_v25 = vpack.c.bf16 %v688_v18, %v686_v16  ;;  %v689_v38 = vld [vmem:[%s2135_s24 + $0x300] sm:$0xff]  ;;  %v691_v39 = vld [vmem:[%s2135_s24 + $0x310] sm:$0xff] }
  0x92   : > { %1452 = vmatpush1.bf16.msra.mxu0 %v1451_v5  ;;  %v657_v5 = vld [vmem:[%s2135_s24 + $0x200] sm:$0xff]  ;;  %1558 = vmatprep.subr.bf16.mxu1 %v1557_v8  ;;  %v919_v8 = vld [vmem:[%s2133_s30 + $0x140] sm:$0xff]  ;;  %v1507_v48 = vpack.c.bf16 %v691_v39, %v689_v38 }
  0x93   : > { %1454 = vmatprep.subr.bf16.mxu0 %v1453_v6  ;;  %v659_v6 = vld [vmem:[%s2135_s24 + $0x210] sm:$0xff]  ;;  %v693_v50 = vld [vmem:[%s2135_s24 + $0x320] sm:$0xff] }
  0x94   : > { %v1475_v15 = vpack.c.bf16 %v659_v6, %v657_v5  ;;  %1560 = vmatpush1.bf16.msra.mxu1 %v1559_v21  ;;  %v1575_v5 = vpack.c.bf16 %v917_v61, %v915_v60  ;;  %v684_v6 = vld [vmem:[%s2135_s24 + $0x2d8] sm:$0xff]  ;;  %v925_v21 = vld [vmem:[%s2133_s30 + $0x170] sm:$0xff]  ;;  %v695_v51 = vld [vmem:[%s2135_s24 + $0x330] sm:$0xff] }
  0x95   : > { %v702_v60 = vld [vmem:[%s2135_s24 + $0x368] sm:$0xff]  ;;  %v704_v61 = vld [vmem:[%s2135_s24 + $0x378] sm:$0xff]  ;;  %v713_v18 = vld [vmem:[%s2135_s24 + $0x3c0] sm:$0xff] }
  0x96   : > { %1456 = vmatpush1.bf16.msra.mxu0 %v1455_v13  ;;  %v906_v13 = vld [vmem:[%s2133_s30 + $0xd8] sm:$0xff]  ;;  %v1517_v63 = vpack.c.bf16 %v704_v61, %v702_v60  ;;  %v591_v27 = vld [vmem:[%s2780_s0 + $0x10] sm:$0xff]  ;;  %v1040_v61 = vld [vmem:[%s2785_s5] sm:$0xff] (!%p1404_p11) }
  0x97   : > { %1458 = vmatprep.subr.bf16.mxu0 %v1457_v19  ;;  %v666_v19 = vld [vmem:[%s2135_s24 + $0x248] sm:$0xff]  ;;  %v1561_v23 = vpack.c.bf16 %v906_v13, %v904_v12 }
  0x98   : > { %v1481_v29 = vpack.c.bf16 %v668_v22, %v666_v19  ;;  %v1581_v19 = vpack.c.bf16 %v926_v11, %v924_v10  ;;  %v928_v22 = vld [vmem:[%s2133_s30 + $0x188] sm:$0xff]  ;;  %v1047_v60 = vld [vmem:[%s2785_s5 + $0x38] sm:$0xff] (!%p1404_p11) }
  0x99   : > { %1562 = vmatprep.subr.bf16.mxu1 %v1561_v23  ;;  %v930_v23 = vld [vmem:[%s2133_s30 + $0x198] sm:$0xff] }
  0x9a   : > { %1460 = vmatpush1.bf16.msra.mxu0 %v1459_v30  ;;  %v665_v30 = vld [vmem:[%s2135_s24 + $0x240] sm:$0xff]  ;;  %1564 = vmatpush1.bf16.msra.mxu1 %v1563_v33 }
  0x9b   : > { %1462 = vmatprep.subr.bf16.mxu0 %v1461_v34  ;;  %v672_v34 = vld [vmem:[%s2135_s24 + $0x278] sm:$0xff]  ;;  %v1483_v40 = vpack.c.bf16 %v667_v31, %v665_v30  ;;  %1566 = vmatprep.subr.bf16.mxu1 %v1565_v35  ;;  %v1585_v31 = vpack.c.bf16 %v930_v23, %v928_v22  ;;  %v929_v33 = vld [vmem:[%s2133_s30 + $0x190] sm:$0xff]  ;;  %v934_v35 = vld [vmem:[%s2133_s30 + $0x1b8] sm:$0xff] }
  0x9c   : > { %v1485_v41 = vpack.c.bf16 %v672_v34, %v670_v32  ;;  %v692_v30 = vld [vmem:[%s2135_s24 + $0x318] sm:$0xff]  ;;  %v927_v32 = vld [vmem:[%s2133_s30 + $0x180] sm:$0xff] }
  0x9d   : > { %v932_v34 = vld [vmem:[%s2133_s30 + $0x1a8] sm:$0xff] }
  0x9e   : > { %1464 = vmatpush1.bf16.msra.mxu0 %v1463_v42  ;;  %v669_v42 = vld [vmem:[%s2135_s24 + $0x260] sm:$0xff]  ;;  %1568 = vmatpush1.bf16.msra.mxu1 %v1567_v45 }
  0x9f   : > { %1466 = vmatprep.subr.bf16.mxu0 %v1465_v46  ;;  %v676_v46 = vld [vmem:[%s2135_s24 + $0x298] sm:$0xff]  ;;  %v1487_v52 = vpack.c.bf16 %v671_v43, %v669_v42  ;;  %1570 = vmatprep.subr.bf16.mxu1 %v1569_v47  ;;  %v1589_v43 = vpack.c.bf16 %v934_v35, %v932_v34  ;;  %v933_v45 = vld [vmem:[%s2133_s30 + $0x1b0] sm:$0xff]  ;;  %v938_v47 = vld [vmem:[%s2133_s30 + $0x1d8] sm:$0xff] }
  0xa0   : > { %v1489_v53 = vpack.c.bf16 %v676_v46, %v674_v44  ;;  %v696_v42 = vld [vmem:[%s2135_s24 + $0x338] sm:$0xff]  ;;  %v931_v44 = vld [vmem:[%s2133_s30 + $0x1a0] sm:$0xff]  ;;  %v941_v35 = vld [vmem:[%s2133_s30 + $0x1f0] sm:$0xff] }
  0xa1   : > { %v936_v46 = vld [vmem:[%s2133_s30 + $0x1c8] sm:$0xff]  ;;  %v939_v34 = vld [vmem:[%s2133_s30 + $0x1e0] sm:$0xff] }
  0xa2   : > { %1468 = vmatpush1.bf16.msra.mxu0 %v1467_v54  ;;  %v673_v54 = vld [vmem:[%s2135_s24 + $0x280] sm:$0xff]  ;;  %1572 = vmatpush1.bf16.msra.mxu1 %v1571_v57 }
  0xa3   : > { %1470 = vmatprep.subr.bf16.mxu0 %v1469_v58  ;;  %v680_v58 = vld [vmem:[%s2135_s24 + $0x2b8] sm:$0xff]  ;;  %v1491_v0 = vpack.c.bf16 %v675_v55, %v673_v54  ;;  %1574 = vmatprep.subr.bf16.mxu1 %v1573_v59  ;;  %v1593_v55 = vpack.c.bf16 %v938_v47, %v936_v46  ;;  %v699_v59 = vld [vmem:[%s2135_s24 + $0x350] sm:$0xff] }
  0xa4   : > { %v1493_v1 = vpack.c.bf16 %v680_v58, %v678_v56  ;;  %v700_v54 = vld [vmem:[%s2135_s24 + $0x358] sm:$0xff]  ;;  %v1511_v56 = vpack.c.bf16 %v695_v51, %v693_v50  ;;  %v697_v58 = vld [vmem:[%s2135_s24 + $0x340] sm:$0xff]  ;;  %v877_v50 = vld [vmem:[#allocation2] sm:$0xff] }
  0xa5   : > { %v1515_v62 = vpack.c.bf16 %v699_v59, %v697_v58  ;;  %v878_v51 = vld [vmem:[#allocation2 + $0x8] sm:$0xff]  ;;  %v1043_v58 = vld [vmem:[%s2785_s5 + $0x18] sm:$0xff] (!%p1404_p11) }
  0xa6   : > { %1472 = vmatpush1.bf16.msra.mxu0 %v1471_v2  ;;  %v677_v2 = vld [vmem:[%s2135_s24 + $0x2a0] sm:$0xff]  ;;  %1576 = vmatpush1.bf16.msra.mxu1 %v1575_v5 }
  0xa7   : > { %1474 = vmatprep.subr.bf16.mxu0 %v1473_v4  ;;  %v682_v4 = vld [vmem:[%s2135_s24 + $0x2c8] sm:$0xff]  ;;  %v1495_v12 = vpack.c.bf16 %v679_v3, %v677_v2  ;;  %1578 = vmatprep.subr.bf16.mxu1 %v1577_v7  ;;  %v708_v3 = vld [vmem:[%s2135_s24 + $0x398] sm:$0xff]  ;;  %v707_v7 = vld [vmem:[%s2135_s24 + $0x390] sm:$0xff] }
  0xa8   : > { %v1497_v13 = vpack.c.bf16 %v684_v6, %v682_v4  ;;  %v706_v2 = vld [vmem:[%s2135_s24 + $0x388] sm:$0xff]  ;;  %v705_v6 = vld [vmem:[%s2135_s24 + $0x380] sm:$0xff] }
  0xa9   : > { %798 = vmatmul.mubr.f32.vlgmr.msra.gmra.mrb[0].mxu0 %v589_v14  ;;  %v681_v14 = vld [vmem:[%s2135_s24 + $0x2c0] sm:$0xff]  ;;  %v1521_v5 = vpack.c.bf16 %v708_v3, %v706_v2  ;;  %v1523_v10 = vpack.c.bf16 %v707_v7, %v705_v6  ;;  %v1049_v3 = vld [vmem:[%s2785_s5 + $0x48] sm:$0xff] (!%p1404_p11)  ;;  %v1051_v6 = vld [vmem:[%s2785_s5 + $0x58] sm:$0xff] (!%p1404_p11) }
  0xaa   : > { %1476 = vmatpush1.bf16.msra.mxu0 %v1475_v15  ;;  %868 = vmatprep.mubr.f32.mxu0 %v592_v20  ;;  %v683_v15 = vld [vmem:[%s2135_s24 + $0x2d0] sm:$0xff]  ;;  %v1046_v2 = vld [vmem:[%s2785_s5 + $0x30] sm:$0xff] (!%p1404_p11)  ;;  %v1055_v7 = vld [vmem:[%s2785_s5 + $0x78] sm:$0xff] (!%p1404_p11) }
  0xab   : > { %1478 = vmatprep.subr.bf16.mxu0 %v1477_v17  ;;  %v1579_v17 = vpack.c.bf16 %v921_v9, %v919_v8  ;;  %v923_v20 = vld [vmem:[%s2133_s30 + $0x160] sm:$0xff]  ;;  %v1499_v24 = vpack.c.bf16 %v683_v15, %v681_v14  ;;  %v710_v8 = vld [vmem:[%s2135_s24 + $0x3a8] sm:$0xff]  ;;  %v712_v9 = vld [vmem:[%s2135_s24 + $0x3b8] sm:$0xff] }
  0xac   : > { %v1525_v11 = vpack.c.bf16 %v712_v9, %v710_v8  ;;  %v714_v14 = vld [vmem:[%s2135_s24 + $0x3c8] sm:$0xff]  ;;  %v716_v15 = vld [vmem:[%s2135_s24 + $0x3d8] sm:$0xff]  ;;  %v1669_v9 = vpack.c.bf16 (!%p1404_p11), %v1055_v7, %v1051_v6 }
  0xad   : > { %1580 = vmatpush1.bf16.msra.mxu1 %v1579_v17  ;;  %v1529_v17 = vpack.c.bf16 %v716_v15, %v714_v14  ;;  %v1054_v14 = vld [vmem:[%s2785_s5 + $0x70] sm:$0xff] (!%p1404_p11)  ;;  %v1057_v15 = vld [vmem:[%s2785_s5 + $0x88] sm:$0xff] (!%p1404_p11) }
  0xae   : > { %1480 = vmatpush1.bf16.msra.mxu0 %v1479_v28  ;;  %v690_v28 = vld [vmem:[%s2135_s24 + $0x308] sm:$0xff]  ;;  %1582 = vmatprep.subr.bf16.mxu1 %v1581_v19  ;;  %v715_v19 = vld [vmem:[%s2135_s24 + $0x3d0] sm:$0xff] }
  0xaf   : > { %1482 = vmatprep.subr.bf16.mxu0 %v1481_v29  ;;  %v1583_v29 = vpack.c.bf16 %v925_v21, %v923_v20  ;;  %v1505_v37 = vpack.c.bf16 %v692_v30, %v690_v28  ;;  %v718_v20 = vld [vmem:[%s2135_s24 + $0x3e8] sm:$0xff]  ;;  %v720_v21 = vld [vmem:[%s2135_s24 + $0x3f8] sm:$0xff]  ;;  %v1531_v22 = vpack.c.bf16 %v715_v19, %v713_v18  ;;  %v935_v28 = vld [vmem:[%s2133_s30 + $0x1c0] sm:$0xff] }
  0xb0   : > { %v1533_v23 = vpack.c.bf16 %v720_v21, %v718_v20  ;;  %v1059_v19 = vld [vmem:[%s2785_s5 + $0x98] sm:$0xff] (!%p1404_p11)  ;;  %v1056_v21 = vld [vmem:[%s2785_s5 + $0x80] sm:$0xff] (!%p1404_p11) }
  0xb1   : > { %1584 = vmatpush1.bf16.msra.mxu1 %v1583_v29  ;;  %v937_v29 = vld [vmem:[%s2133_s30 + $0x1d0] sm:$0xff]  ;;  %v1063_v20 = vld [vmem:[%s2785_s5 + $0xb8] sm:$0xff] (!%p1404_p11) }
  0xb2   : > { %1484 = vmatpush1.bf16.msra.mxu0 %v1483_v40  ;;  %v694_v40 = vld [vmem:[%s2135_s24 + $0x328] sm:$0xff]  ;;  %1586 = vmatprep.subr.bf16.mxu1 %v1585_v31  ;;  %v1595_v30 = vpack.c.bf16 %v937_v29, %v935_v28  ;;  %v940_v31 = vld [vmem:[%s2133_s30 + $0x1e8] sm:$0xff] }
  0xb3   : > { %1486 = vmatprep.subr.bf16.mxu0 %v1485_v41  ;;  %v1587_v41 = vpack.c.bf16 %v929_v33, %v927_v32  ;;  %v1509_v49 = vpack.c.bf16 %v696_v42, %v694_v40  ;;  %v942_v32 = vld [vmem:[%s2133_s30 + $0x1f8] sm:$0xff]  ;;  %v721_v40 = vld [vmem:[%s574_s22] sm:$0x3]  ;;  %v1069_v28 = vld [vmem:[%s2785_s5 + $0xe8] sm:$0xff] (!%p1404_p11) }
  0xb4   : > { %v1597_v33 = vpack.c.bf16 %v942_v32, %v940_v31  ;;  %v1067_v29 = vld [vmem:[%s2785_s5 + $0xd8] sm:$0xff] (!%p1404_p11) }
  0xb5   : > { %1588 = vmatpush1.bf16.msra.mxu1 %v1587_v41  ;;  %v1071_v32 = vld [vmem:[%s2785_s5 + $0xf8] sm:$0xff] (!%p1404_p11) }
  0xb6   : > { %1488 = vmatpush1.bf16.msra.mxu0 %v1487_v52  ;;  %v1591_v52 = vpack.c.bf16 %v933_v45, %v931_v44  ;;  %1590 = vmatprep.subr.bf16.mxu1 %v1589_v43 }
  0xb7   : > { %1490 = vmatprep.subr.bf16.mxu0 %v1489_v53  ;;  %v698_v53 = vld [vmem:[%s2135_s24 + $0x348] sm:$0xff] }
  0xb8   : > { %v1513_v57 = vpack.c.bf16 %v700_v54, %v698_v53 }
  0xb9   : > { %1592 = vmatpush1.bf16.msra.mxu1 %v1591_v52 }
  0xba   : > { %1492 = vmatpush1.bf16.msra.mxu0 %v1491_v0  ;;  %1594 = vmatprep.subr.bf16.mxu1 %v1593_v55  ;;  %v701_v0 = vld [vmem:[%s2135_s24 + $0x360] sm:$0xff] }
  0xbb   : > { %1494 = vmatprep.subr.bf16.mxu0 %v1493_v1  ;;  %v703_v1 = vld [vmem:[%s2135_s24 + $0x370] sm:$0xff] }
  0xbc   : > { %v1519_v4 = vpack.c.bf16 %v703_v1, %v701_v0  ;;  %v1042_v1 = vld [vmem:[%s2785_s5 + $0x10] sm:$0xff] (!%p1404_p11) }
  0xbd   : > { %1596 = vmatpush1.bf16.msra.mxu1 %v1595_v30 }
  0xbe   : > { %1496 = vmatpush1.bf16.msra.mxu0 %v1495_v12  ;;  %v709_v12 = vld [vmem:[%s2135_s24 + $0x3a0] sm:$0xff]  ;;  %1598 = vmatprep.subr.bf16.mxu1 %v1597_v33  ;;  %v1064_v33 = vld [vmem:[%s2785_s5 + $0xc0] sm:$0xff] (!%p1404_p11) }
  0xbf   : > { %1498 = vmatprep.subr.bf16.mxu0 %v1497_v13  ;;  %v711_v13 = vld [vmem:[%s2135_s24 + $0x3b0] sm:$0xff] }
  0xc0   : > { %v1527_v16 = vpack.c.bf16 %v711_v13, %v709_v12  ;;  %v1050_v12 = vld [vmem:[%s2785_s5 + $0x50] sm:$0xff] (!%p1404_p11) }
  0xc2   : > { %1500 = vmatpush1.bf16.msra.mxu0 %v1499_v24  ;;  %v717_v24 = vld [vmem:[%s2135_s24 + $0x3e0] sm:$0xff] }
  0xc3   : > { %1502 = vmatprep.subr.bf16.mxu0 %v1501_v25  ;;  %v719_v25 = vld [vmem:[%s2135_s24 + $0x3f0] sm:$0xff] }
  0xc4   : > { %v1535_v26 = vpack.c.bf16 %v719_v25, %v717_v24  ;;  %v1058_v24 = vld [vmem:[%s2785_s5 + $0x90] sm:$0xff] (!%p1404_p11) }
  0xc5   : > { %v1062_v25 = vld [vmem:[%s2785_s5 + $0xb0] sm:$0xff] (!%p1404_p11) }
  0xc6   : > { %1504 = vmatpush1.bf16.msra.mxu0 %v1503_v36  ;;  %v1599_v36 = vpack.c.bf16 %v941_v35, %v939_v34  ;;  %v1675_v30 = vpack.c.bf16 (!%p1404_p11), %v1062_v25, %v1058_v24  ;;  %v1068_v34 = vld [vmem:[%s2785_s5 + $0xe0] sm:$0xff] (!%p1404_p11)  ;;  %v1677_v35 = vpack.c.bf16 (!%p1404_p11), %v1071_v32, %v1067_v29  ;;  %v1102_v24 = vld [vmem:[%s2785_s5 + $0x1f0] sm:$0xff] (!%p1404_p11)  ;;  %v1105_v25 = vld [vmem:[%s2785_s5 + $0x208] sm:$0xff] (!%p1404_p11) }
  0xc7   : > { %1506 = vmatprep.subr.bf16.mxu0 %v1505_v37  ;;  %v723_v37 = vlaneseq  ;;  %v1104_v32 = vld [vmem:[%s2785_s5 + $0x200] sm:$0xff] (!%p1404_p11) }
  0xc8   : > { %1600 = vmatpush1.bf16.msra.mxu1 %v1599_v36  ;;  %v1066_v36 = vld [vmem:[%s2785_s5 + $0xd0] sm:$0xff] (!%p1404_p11) }
  0xc9   : > { %v2342_v38 = vshrl.u32 %v723_v37, 7  ;;  %v1070_v37 = vld [vmem:[%s2785_s5 + $0xf0] sm:$0xff] (!%p1404_p11) }
  0xca   : > { %1508 = vmatpush1.bf16.msra.mxu0 %v1507_v48 }
  0xcb   : > { %1510 = vmatprep.subr.bf16.mxu0 %v1509_v49  ;;  %v2345_v39 = vsub.s32 0, %v2342_v38  ;;  %v2353_v41 = vsub.s32 1, %v2342_v38 }
  0xcd   : > { %v726_v42 = vrot.slane %v721_v40, %v2345_v39  ;;  %v730_v43 = vrot.slane %v721_v40, %v2353_v41  ;;  %v1073_v40 = vld [vmem:[%s2785_s5 + $0x108] sm:$0xff] (!%p1404_p11) }
  0xce   : > { %1512 = vmatpush1.bf16.msra.mxu0 %v1511_v56  ;;  %v1041_v56 = vld [vmem:[%s2785_s5 + $0x8] sm:$0xff] (!%p1404_p11) }
  0xcf   : > { %1514 = vmatprep.subr.bf16.mxu0 %v1513_v57  ;;  %v1045_v57 = vld [vmem:[%s2785_s5 + $0x28] sm:$0xff] (!%p1404_p11) }
  0xd0   : > { %v1601_v59 = vpack.c.bf16 (!%p1404_p11), %v1045_v57, %v1041_v56  ;;  %v1087_v56 = vld [vmem:[%s2785_s5 + $0x178] sm:$0xff] (!%p1404_p11) }
  0xd2   : > { %1516 = vmatpush1.bf16.msra.mxu0 %v1515_v62  ;;  %v1044_v62 = vld [vmem:[%s2785_s5 + $0x20] sm:$0xff] (!%p1404_p11) }
  0xd3   : > { %1518 = vmatprep.subr.bf16.mxu0 %v1517_v63  ;;  %v1665_v63 = vpack.c.bf16 (!%p1404_p11), %v1047_v60, %v1043_v58  ;;  %v1603_v0 = vpack.c.bf16 (!%p1404_p11), %v1044_v62, %v1040_v61  ;;  %v1080_v60 = vld [vmem:[%s2785_s5 + $0x140] sm:$0xff] (!%p1404_p11)  ;;  %v1082_v62 = vld [vmem:[%s2785_s5 + $0x150] sm:$0xff] (!%p1404_p11) }
  0xd4   : > { %v1084_v61 = vld [vmem:[%s2785_s5 + $0x160] sm:$0xff] (!%p1404_p11) }
  0xd5   : > { %1666 = vmatprep.subr.bf16.mxu1 (!%p1404_p11), %v1665_v63 }
  0xd6   : > { %1520 = vmatpush1.bf16.msra.mxu0 %v1519_v4  ;;  %v1667_v4 = vpack.c.bf16 (!%p1404_p11), %v1046_v2, %v1042_v1  ;;  %v1089_v1 = vld [vmem:[%s2785_s5 + $0x188] sm:$0xff] (!%p1404_p11) }
  0xd7   : > { %1522 = vmatprep.subr.bf16.mxu0 %v1521_v5  ;;  %v1053_v5 = vld [vmem:[%s2785_s5 + $0x68] sm:$0xff] (!%p1404_p11) }
  0xd8   : > { %v1605_v8 = vpack.c.bf16 (!%p1404_p11), %v1053_v5, %v1049_v3  ;;  %v1093_v2 = vld [vmem:[%s2785_s5 + $0x1a8] sm:$0xff] (!%p1404_p11)  ;;  %v1091_v3 = vld [vmem:[%s2785_s5 + $0x198] sm:$0xff] (!%p1404_p11)  ;;  %v1623_v5 = vpack.c.bf16 (!%p1404_p11), %v1084_v61, %v1080_v60  ;;  %v1124_v60 = vld [vmem:[%s2785_s5 + $0x2a0] sm:$0xff] (!%p1404_p11) }
  0xd9   : > { %v1625_v7 = vpack.c.bf16 (!%p1404_p11), %v1093_v2, %v1089_v1  ;;  %v1122_v61 = vld [vmem:[%s2785_s5 + $0x290] sm:$0xff] (!%p1404_p11)  ;;  %v1133_v1 = vld [vmem:[%s2785_s5 + $0x2e8] sm:$0xff] (!%p1404_p11)  ;;  %v1131_v2 = vld [vmem:[%s2785_s5 + $0x2d8] sm:$0xff] (!%p1404_p11) }
  0xda   : > { %1524 = vmatpush1.bf16.msra.mxu0 %v1523_v10  ;;  %v1048_v10 = vld [vmem:[%s2785_s5 + $0x40] sm:$0xff] (!%p1404_p11) }
  0xdb   : > { %1526 = vmatprep.subr.bf16.mxu0 %v1525_v11  ;;  %v1052_v11 = vld [vmem:[%s2785_s5 + $0x60] sm:$0xff] (!%p1404_p11) }
  0xdc   : > { %v1607_v13 = vpack.c.bf16 (!%p1404_p11), %v1052_v11, %v1048_v10  ;;  %v1090_v10 = vld [vmem:[%s2785_s5 + $0x190] sm:$0xff] (!%p1404_p11) }
  0xde   : > { %1528 = vmatpush1.bf16.msra.mxu0 %v1527_v16  ;;  %v1061_v16 = vld [vmem:[%s2785_s5 + $0xa8] sm:$0xff] (!%p1404_p11) }
  0xdf   : > { %1530 = vmatprep.subr.bf16.mxu0 %v1529_v17  ;;  %v1671_v17 = vpack.c.bf16 (!%p1404_p11), %v1054_v14, %v1050_v12  ;;  %v1609_v18 = vpack.c.bf16 (!%p1404_p11), %v1061_v16, %v1057_v15  ;;  %v1094_v12 = vld [vmem:[%s2785_s5 + $0x1b0] sm:$0xff] (!%p1404_p11)  ;;  %v1101_v14 = vld [vmem:[%s2785_s5 + $0x1e8] sm:$0xff] (!%p1404_p11)  ;;  %v1099_v15 = vld [vmem:[%s2785_s5 + $0x1d8] sm:$0xff] (!%p1404_p11) }
  0xe0   : > { %v1103_v16 = vld [vmem:[%s2785_s5 + $0x1f8] sm:$0xff] (!%p1404_p11) }
  0xe2   : > { %1532 = vmatpush1.bf16.msra.mxu0 %v1531_v22  ;;  %v1673_v22 = vpack.c.bf16 (!%p1404_p11), %v1063_v20, %v1059_v19  ;;  %v1096_v20 = vld [vmem:[%s2785_s5 + $0x1c0] sm:$0xff] (!%p1404_p11) }
  0xe3   : > { %1534 = vmatprep.subr.bf16.mxu0 %v1533_v23  ;;  %v1060_v23 = vld [vmem:[%s2785_s5 + $0xa0] sm:$0xff] (!%p1404_p11) }
  0xe6   : > { %1536 = vmatpush1.bf16.msra.mxu0 %v1535_v26  ;;  %v1611_v26 = vpack.c.bf16 (!%p1404_p11), %v1060_v23, %v1056_v21  ;;  %v1100_v21 = vld [vmem:[%s2785_s5 + $0x1e0] sm:$0xff] (!%p1404_p11)  ;;  %v1693_v23 = vpack.c.bf16 (!%p1404_p11), %v1103_v16, %v1099_v15  ;;  %v1143_v15 = vld [vmem:[%s2785_s5 + $0x338] sm:$0xff] (!%p1404_p11) }
  0xe7   : > { %1602 = vmatprep.subr.bf16.mxu0 (!%p1404_p11), %v1601_v59  ;;  %v1631_v29 = vpack.c.bf16 (!%p1404_p11), %v1100_v21, %v1096_v20 }
  0xe9   : > { %869 = vmatmul.mubr.f32.vlgmr.msra.gmra.mrb[0].mxu0 %v591_v27  ;;  %v1065_v27 = vld [vmem:[%s2785_s5 + $0xc8] sm:$0xff] (!%p1404_p11) }
  0xea   : > { %1604 = vmatpush1.bf16.msra.mxu0 (!%p1404_p11), %v1603_v0  ;;  %v1613_v31 = vpack.c.bf16 (!%p1404_p11), %v1069_v28, %v1065_v27  ;;  %v1086_v0 = vld [vmem:[%s2785_s5 + $0x170] sm:$0xff] (!%p1404_p11)  ;;  %v1107_v27 = vld [vmem:[%s2785_s5 + $0x218] sm:$0xff] (!%p1404_p11) }
  0xeb   : > { %1606 = vmatprep.subr.bf16.mxu0 (!%p1404_p11), %v1605_v8  ;;  %v1687_v6 = vpack.c.bf16 (!%p1404_p11), %v1086_v0, %v1082_v62  ;;  %v1088_v8 = vld [vmem:[%s2785_s5 + $0x180] sm:$0xff] (!%p1404_p11)  ;;  %v1111_v28 = vld [vmem:[%s2785_s5 + $0x238] sm:$0xff] (!%p1404_p11)  ;;  %v1129_v0 = vld [vmem:[%s2785_s5 + $0x2c8] sm:$0xff] (!%p1404_p11) }
  0xee   : > { %1608 = vmatpush1.bf16.msra.mxu0 (!%p1404_p11), %v1607_v13  ;;  %v1097_v13 = vld [vmem:[%s2785_s5 + $0x1c8] sm:$0xff] (!%p1404_p11) }
  0xef   : > { %1610 = vmatprep.subr.bf16.mxu0 (!%p1404_p11), %v1609_v18  ;;  %v1691_v18 = vpack.c.bf16 (!%p1404_p11), %v1094_v12, %v1090_v10  ;;  %v1629_v19 = vpack.c.bf16 (!%p1404_p11), %v1101_v14, %v1097_v13  ;;  %v1134_v10 = vld [vmem:[%s2785_s5 + $0x2f0] sm:$0xff] (!%p1404_p11)  ;;  %v1137_v12 = vld [vmem:[%s2785_s5 + $0x308] sm:$0xff] (!%p1404_p11)  ;;  %v1139_v14 = vld [vmem:[%s2785_s5 + $0x318] sm:$0xff] (!%p1404_p11) }
  0xf0   : > { %v1141_v13 = vld [vmem:[%s2785_s5 + $0x328] sm:$0xff] (!%p1404_p11) }
  0xf1   : > { %v1649_v21 = vpack.c.bf16 (!%p1404_p11), %v1141_v13, %v1137_v12  ;;  %v1184_v12 = vsub.s32 (!%p1404_p11), 3, %v2342_v38 }
  0xf2   : > { %1612 = vmatpush1.bf16.msra.mxu0 (!%p1404_p11), %v1611_v26  ;;  %v1109_v26 = vld [vmem:[%s2785_s5 + $0x228] sm:$0xff] (!%p1404_p11) }
  0xf3   : > { %1614 = vmatprep.subr.bf16.mxu0 (!%p1404_p11), %v1613_v31  ;;  %v1633_v31 = vpack.c.bf16 (!%p1404_p11), %v1109_v26, %v1105_v25  ;;  %v1713_v25 = vpack.c.bf16 (!%p1404_p11), %v1143_v15, %v1139_v14  ;;  %v1142_v26 = vld [vmem:[%s2785_s5 + $0x330] sm:$0xff] (!%p1404_p11) }
 0x1bc   : > { %v870_v44 = vpop.f32.mrb[0].mxu0 }
 0x1bd   : > { %v1729_v45 = vadd.f32 %v870_v44, %v726_v42  ;;  %v872_v46 = vpop.f32.mrb[1].mxu0  ;;  %v1077_v42 = vld [vmem:[%s2785_s5 + $0x128] sm:$0xff] (!%p1404_p11)  ;;  %v1079_v44 = vld [vmem:[%s2785_s5 + $0x138] sm:$0xff] (!%p1404_p11) }
 0x1be   : > { %v1730_v47 = vadd.f32 %v872_v46, %v730_v43  ;;  %v1075_v43 = vld [vmem:[%s2785_s5 + $0x118] sm:$0xff] (!%p1404_p11)  ;;  %v1679_v46 = vpack.c.bf16 (!%p1404_p11), %v1070_v37, %v1066_v36  ;;  %v1110_v36 = vld [vmem:[%s2785_s5 + $0x230] sm:$0xff] (!%p1404_p11)  ;;  %v1113_v37 = vld [vmem:[%s2785_s5 + $0x248] sm:$0xff] (!%p1404_p11) }
 0x1bf   : > { %v875_v49 = vmax.f32 %v1729_v45, 0.0  ;;  %v1615_v45 = vpack.c.bf16 (!%p1404_p11), %v1068_v34, %v1064_v33  ;;  %v1108_v33 = vld [vmem:[%s2785_s5 + $0x220] sm:$0xff] (!%p1404_p11)  ;;  %v1106_v34 = vld [vmem:[%s2785_s5 + $0x210] sm:$0xff] (!%p1404_p11) }
 0x1c0   : > { %v876_v48 = vmax.f32 %v1730_v47, 0.0  ;;  %v1617_v47 = vpack.c.bf16 (!%p1404_p11), %v1077_v42, %v1073_v40  ;;  %v1117_v40 = vld [vmem:[%s2785_s5 + $0x268] sm:$0xff] (!%p1404_p11)  ;;  %v1115_v42 = vld [vmem:[%s2785_s5 + $0x258] sm:$0xff] (!%p1404_p11) }
 0x1c1   : > { %1616 = vmatpush1.bf16.msra.mxu0 (!%p1404_p11), %v1615_v45  ;;  %v1699_v45 = vpack.c.bf16 (!%p1404_p11), %v1110_v36, %v1106_v34  ;;  %v1144_v36 = vld [vmem:[%s2785_s5 + $0x340] sm:$0xff] (!%p1404_p11) }
 0x1c2   : > { %1007 = vmatprep.mubr.f32.mxu1 %v876_v48  ;;  %v1072_v48 = vld [vmem:[%s2785_s5 + $0x100] sm:$0xff] (!%p1404_p11)  ;;  %1618 = vmatprep.subr.bf16.mxu0 (!%p1404_p11), %v1617_v47 }
 0x1c3   : > { %1008 = vmatmul.mubr.f32.vlgmr.msra.gmra.mrb[0].mxu1 %v875_v49  ;;  %v1076_v49 = vld [vmem:[%s2785_s5 + $0x120] sm:$0xff] (!%p1404_p11) }
 0x1c4   : > { %1668 = vmatpush1.bf16.msra.mxu1 (!%p1404_p11), %v1667_v4  ;;  %v1619_v57 = vpack.c.bf16 (!%p1404_p11), %v1076_v49, %v1072_v48  ;;  %v1095_v4 = vld [vmem:[%s2785_s5 + $0x1b8] sm:$0xff] (!%p1404_p11)  ;;  %v1112_v47 = vld [vmem:[%s2785_s5 + $0x240] sm:$0xff] (!%p1404_p11)  ;;  %v1114_v49 = vld [vmem:[%s2785_s5 + $0x250] sm:$0xff] (!%p1404_p11) }
 0x1c5   : > { %1670 = vmatprep.subr.bf16.mxu1 (!%p1404_p11), %v1669_v9  ;;  %v1092_v9 = vld [vmem:[%s2785_s5 + $0x1a0] sm:$0xff] (!%p1404_p11)  ;;  %v1689_v11 = vpack.c.bf16 (!%p1404_p11), %v1095_v4, %v1091_v3  ;;  %v1135_v3 = vld [vmem:[%s2785_s5 + $0x2f8] sm:$0xff] (!%p1404_p11) }
 0x1c6   : > { %1620 = vmatpush1.bf16.msra.mxu0 (!%p1404_p11), %v1619_v57  ;;  %v1116_v48 = vld [vmem:[%s2785_s5 + $0x260] sm:$0xff] (!%p1404_p11) }
 0x1c8   : > { %1672 = vmatpush1.bf16.msra.mxu1 (!%p1404_p11), %v1671_v17  ;;  %v1627_v17 = vpack.c.bf16 (!%p1404_p11), %v1092_v9, %v1088_v8  ;;  %v1132_v8 = vld [vmem:[%s2785_s5 + $0x2e0] sm:$0xff] (!%p1404_p11)  ;;  %v1130_v9 = vld [vmem:[%s2785_s5 + $0x2d0] sm:$0xff] (!%p1404_p11) }
 0x1c9   : > { %1674 = vmatprep.subr.bf16.mxu1 (!%p1404_p11), %v1673_v22  ;;  %v1098_v22 = vld [vmem:[%s2785_s5 + $0x1d0] sm:$0xff] (!%p1404_p11)  ;;  %v1711_v20 = vpack.c.bf16 (!%p1404_p11), %v1134_v10, %v1130_v9  ;;  %v1168_v10 = vld [vmem:[%s2786_s6] sm:$0xf] (!%p1404_p11) }
 0x1ca   : > { %v1173_v13 = vrot.slane (!%p1404_p11), %v1168_v10, %v2345_v39  ;;  %v1177_v15 = vrot.slane (!%p1404_p11), %v1168_v10, %v2353_v41 }
 0x1cc   : > { %1676 = vmatpush1.bf16.msra.mxu1 (!%p1404_p11), %v1675_v30  ;;  %v1695_v30 = vpack.c.bf16 (!%p1404_p11), %v1102_v24, %v1098_v22  ;;  %v1136_v22 = vld [vmem:[%s2785_s5 + $0x300] sm:$0xff] (!%p1404_p11)  ;;  %v1138_v24 = vld [vmem:[%s2785_s5 + $0x310] sm:$0xff] (!%p1404_p11) }
 0x1cd   : > { %1678 = vmatprep.subr.bf16.mxu1 (!%p1404_p11), %v1677_v35  ;;  %v1697_v35 = vpack.c.bf16 (!%p1404_p11), %v1111_v28, %v1107_v27  ;;  %v1145_v27 = vld [vmem:[%s2785_s5 + $0x348] sm:$0xff] (!%p1404_p11)  ;;  %v1715_v34 = vpack.c.bf16 (!%p1404_p11), %v1142_v26, %v1138_v24 }
 0x1ce   : > { %v1149_v28 = vld [vmem:[%s2785_s5 + $0x368] sm:$0xff] (!%p1404_p11) }
 0x1d0   : > { %1680 = vmatpush1.bf16.msra.mxu1 (!%p1404_p11), %v1679_v46  ;;  %v1637_v46 = vpack.c.bf16 (!%p1404_p11), %v1117_v40, %v1113_v37  ;;  %v1148_v37 = vld [vmem:[%s2785_s5 + $0x360] sm:$0xff] (!%p1404_p11)  ;;  %v1146_v40 = vld [vmem:[%s2785_s5 + $0x350] sm:$0xff] (!%p1404_p11) }
 0x294   : > { %1021 = sbr.rel (%p1404_p11) target bundleno = 930 (0x3a2), region = 79 }
 0x296   : > { %v1009_v52 = vpop.f32.mrb[0].mxu1 }
 0x297   : > { %v1014_v53 = vadd.f32 %v1009_v52, %v877_v50  ;;  %v1011_v54 = vpop.f32.mrb[1].mxu1  ;;  %v1074_v50 = vld [vmem:[%s2785_s5 + $0x110] sm:$0xff] (!%p1404_p11) }
 0x298   : > { %v1015_v55 = vadd.f32 %v1011_v54, %v878_v51  ;;  %v1681_v51 = vpack.c.bf16 (!%p1404_p11), %v1079_v44, %v1075_v43  ;;  %v1078_v52 = vld [vmem:[%s2785_s5 + $0x130] sm:$0xff] (!%p1404_p11)  ;;  %v1085_v54 = vld [vmem:[%s2785_s5 + $0x168] sm:$0xff] (!%p1404_p11)  ;;  %v1119_v43 = vld [vmem:[%s2785_s5 + $0x278] sm:$0xff] (!%p1404_p11)  ;;  %v1635_v44 = vpack.c.bf16 (!%p1404_p11), %v1108_v33, %v1104_v32 }
 0x299   : > { %1016 = vst [vmem:[#allocation2] sm:$0xff] %v1014_v53  ;;  %v1081_v53 = vld [vmem:[%s2785_s5 + $0x148] sm:$0xff] (!%p1404_p11)  ;;  %v1683_v58 = vpack.c.bf16 (!%p1404_p11), %v1078_v52, %v1074_v50  ;;  %v1701_v50 = vpack.c.bf16 (!%p1404_p11), %v1119_v43, %v1115_v42  ;;  %v1150_v43 = vld [vmem:[%s2785_s5 + $0x370] sm:$0xff] (!%p1404_p11) }
 0x29a   : > { %1017 = vst [vmem:[#allocation2 + $0x8] sm:$0xff] %v1015_v55  ;;  %v1083_v55 = vld [vmem:[%s2785_s5 + $0x158] sm:$0xff] (!%p1404_p11)  ;;  %v1621_v59 = vpack.c.bf16 (!%p1404_p11), %v1085_v54, %v1081_v53  ;;  %1682 = vmatprep.subr.bf16.mxu1 (!%p1404_p11), %v1681_v51  ;;  %v1118_v51 = vld [vmem:[%s2785_s5 + $0x270] sm:$0xff] (!%p1404_p11)  ;;  %v1121_v52 = vld [vmem:[%s2785_s5 + $0x288] sm:$0xff] (!%p1404_p11) }
 0x29b   : > { %v1685_v63 = vpack.c.bf16 %v1087_v56, %v1083_v55  ;;  %1684 = vmatpush1.bf16.msra.mxu1 %v1683_v58  ;;  %v1125_v53 = vld [vmem:[%s2785_s5 + $0x2a8] sm:$0xff]  ;;  %v1123_v54 = vld [vmem:[%s2785_s5 + $0x298] sm:$0xff]  ;;  %v1639_v56 = vpack.c.bf16 %v1116_v48, %v1112_v47  ;;  %v1703_v57 = vpack.c.bf16 %v1118_v51, %v1114_v49  ;;  %v1655_v48 = vpack.c.bf16 %v1148_v37, %v1144_v36  ;;  %v1152_v51 = vld [vmem:[%s2785_s5 + $0x380] sm:$0xff] }
 0x29c   : > { %1622 = vmatprep.subr.bf16.mxu0 %v1621_v59  ;;  %v1127_v55 = vld [vmem:[%s2785_s5 + $0x2b8] sm:$0xff]  ;;  %v1641_v58 = vpack.c.bf16 %v1125_v53, %v1121_v52  ;;  %v1120_v59 = vld [vmem:[%s2785_s5 + $0x280] sm:$0xff]  ;;  %v1719_v49 = vpack.c.bf16 %v1150_v43, %v1146_v40  ;;  %v1154_v53 = vld [vmem:[%s2785_s5 + $0x390] sm:$0xff] }
 0x29d   : > { %1686 = vmatprep.subr.bf16.mxu1 %v1685_v63  ;;  %1624 = vmatpush1.bf16.msra.mxu0 %v1623_v5  ;;  %v1705_v62 = vpack.c.bf16 %v1127_v55, %v1123_v54  ;;  %v1126_v63 = vld [vmem:[%s2785_s5 + $0x2b0] sm:$0xff]  ;;  %v1643_v4 = vpack.c.bf16 %v1124_v60, %v1120_v59  ;;  %v1128_v5 = vld [vmem:[%s2785_s5 + $0x2c0] sm:$0xff]  ;;  %v1159_v47 = vld [vmem:[%s2785_s5 + $0x3b8] sm:$0xff] }
 0x29e   : > { %1626 = vmatprep.subr.bf16.mxu0 %v1625_v7  ;;  %v1645_v7 = vpack.c.bf16 %v1133_v1, %v1129_v0  ;;  %v1156_v52 = vld [vmem:[%s2785_s5 + $0x3a0] sm:$0xff]  ;;  %v1158_v55 = vld [vmem:[%s2785_s5 + $0x3b0] sm:$0xff]  ;;  %v1167_v59 = vld [vmem:[%s2785_s5 + $0x3f8] sm:$0xff] }
 0x29f   : > { %1688 = vmatpush1.bf16.msra.mxu1 %v1687_v6  ;;  %v1707_v6 = vpack.c.bf16 %v1126_v63, %v1122_v61  ;;  %v1659_v61 = vpack.c.bf16 %v1156_v52, %v1152_v51  ;;  %v1723_v63 = vpack.c.bf16 %v1158_v55, %v1154_v53  ;;  %v1160_v1 = vld [vmem:[%s2785_s5 + $0x3c0] sm:$0xff] }
 0x2a0   : > { %1690 = vmatprep.subr.bf16.mxu1 %v1689_v11  ;;  %v1709_v11 = vpack.c.bf16 %v1135_v3, %v1131_v2  ;;  %v1164_v2 = vld [vmem:[%s2785_s5 + $0x3e0] sm:$0xff] }
 0x2a1   : > { %1628 = vmatpush1.bf16.msra.mxu0 %v1627_v17  ;;  %v1023_v16 = vld [vmem:[#allocation2 + $0x8] sm:$0xff]  ;;  %v2661_v17 = vld [vmem:[%s2784_s4] sm:$0x3] }
 0x2a2   : > { %1630 = vmatprep.subr.bf16.mxu0 %v1629_v19  ;;  %v1033_v19 = vrot.slane %v2661_v17, %v2353_v41  ;;  %v1029_v60 = vrot.slane %v2661_v17, %v2345_v39 }
 0x2a3   : > { %1692 = vmatpush1.bf16.msra.mxu1 %v1691_v18  ;;  %v1647_v18 = vpack.c.bf16 %v1132_v8, %v1128_v5  ;;  %v1166_v5 = vld [vmem:[%s2785_s5 + $0x3f0] sm:$0xff] }
 0x2a4   : > { %1694 = vmatprep.subr.bf16.mxu1 %v1693_v23  ;;  %v1140_v23 = vld [vmem:[%s2785_s5 + $0x320] sm:$0xff] }
 0x2a5   : > { %1632 = vmatpush1.bf16.msra.mxu0 %v1631_v29  ;;  %v1037_v29 = vadd.f32 %v1033_v19, %v1023_v16  ;;  %v1651_v32 = vpack.c.bf16 %v1140_v23, %v1136_v22  ;;  %v1185_v16 = vrot.slane %v1168_v10, %v1184_v12 }
 0x2a6   : > { %1634 = vmatprep.subr.bf16.mxu0 %v1633_v31  ;;  %v1151_v31 = vld [vmem:[%s2785_s5 + $0x378] sm:$0xff] }
 0x2a7   : > { %1696 = vmatpush1.bf16.msra.mxu1 %v1695_v30  ;;  %v1147_v30 = vld [vmem:[%s2785_s5 + $0x358] sm:$0xff]  ;;  %v1039_v33 = vmax.f32 %v1037_v29, 0.0 }
 0x2a8   : > { %1698 = vmatprep.subr.bf16.mxu1 %v1697_v35  ;;  %v1653_v35 = vpack.c.bf16 %v1149_v28, %v1145_v27  ;;  %v1717_v42 = vpack.c.bf16 %v1151_v31, %v1147_v30 }
 0x2a9   : > { %1636 = vmatpush1.bf16.msra.mxu0 %v1635_v44  ;;  %v1153_v44 = vld [vmem:[%s2785_s5 + $0x388] sm:$0xff]  ;;  %1254 = vmatprep.mubr.f32.mxu0 %v1039_v33 }
 0x2aa   : > { %1638 = vmatprep.subr.bf16.mxu0 %v1637_v46  ;;  %v1155_v46 = vld [vmem:[%s2785_s5 + $0x398] sm:$0xff]  ;;  %1325 = vmatprep.mubr.f32.mxu1 %v1039_v33 }
 0x2ab   : > { %1700 = vmatpush1.bf16.msra.mxu1 %v1699_v45  ;;  %v1157_v45 = vld [vmem:[%s2785_s5 + $0x3a8] sm:$0xff]  ;;  %v1721_v54 = vpack.c.bf16 %v1159_v47, %v1155_v46 }
 0x2ac   : > { %1702 = vmatprep.subr.bf16.mxu1 %v1701_v50  ;;  %v1657_v50 = vpack.c.bf16 %v1157_v45, %v1153_v44 }
 0x2ad   : > { %1640 = vmatpush1.bf16.msra.mxu0 %v1639_v56  ;;  %v1161_v56 = vld [vmem:[%s2785_s5 + $0x3c8] sm:$0xff] }
 0x2ae   : > { %1642 = vmatprep.subr.bf16.mxu0 %v1641_v58  ;;  %v1163_v58 = vld [vmem:[%s2785_s5 + $0x3d8] sm:$0xff] }
 0x2af   : > { %1704 = vmatpush1.bf16.msra.mxu1 %v1703_v57  ;;  %v1165_v57 = vld [vmem:[%s2785_s5 + $0x3e8] sm:$0xff]  ;;  %v1725_v3 = vpack.c.bf16 %v1167_v59, %v1163_v58 }
 0x2b0   : > { %1706 = vmatprep.subr.bf16.mxu1 %v1705_v62  ;;  %v1022_v62 = vld [vmem:[#allocation2] sm:$0xff]  ;;  %v1661_v0 = vpack.c.bf16 %v1165_v57, %v1161_v56 }
 0x2b1   : > { %1644 = vmatpush1.bf16.msra.mxu0 %v1643_v4  ;;  %v1162_v4 = vld [vmem:[%s2785_s5 + $0x3d0] sm:$0xff] }
 0x2b2   : > { %1646 = vmatprep.subr.bf16.mxu0 %v1645_v7  ;;  %v1663_v7 = vpack.c.bf16 %v1164_v2, %v1160_v1  ;;  %v1727_v8 = vpack.c.bf16 %v1166_v5, %v1162_v4 }
 0x2b3   : > { %1708 = vmatpush1.bf16.msra.mxu1 %v1707_v6  ;;  %v1036_v6 = vadd.f32 %v1029_v60, %v1022_v62 }
 0x2b4   : > { %1710 = vmatprep.subr.bf16.mxu1 %v1709_v11  ;;  %v1180_v11 = vsub.s32 2, %v2342_v38 }
 0x2b5   : > { %1648 = vmatpush1.bf16.msra.mxu0 %v1647_v18  ;;  %v1038_v9 = vmax.f32 %v1036_v6, 0.0 }
 0x2b6   : > { %1650 = vmatprep.subr.bf16.mxu0 %v1649_v21  ;;  %v1181_v14 = vrot.slane %v1168_v10, %v1180_v11 }
 0x2b7   : > { %1712 = vmatpush1.bf16.msra.mxu1 %v1711_v20 }
 0x2b8   : > { %1714 = vmatprep.subr.bf16.mxu1 %v1713_v25 }
 0x2b9   : > { %1652 = vmatpush1.bf16.msra.mxu0 %v1651_v32 }
 0x2ba   : > { %1654 = vmatprep.subr.bf16.mxu0 %v1653_v35 }
 0x2bb   : > { %1716 = vmatpush1.bf16.msra.mxu1 %v1715_v34 }
 0x2bc   : > { %1718 = vmatprep.subr.bf16.mxu1 %v1717_v42 }
 0x2bd   : > { %1656 = vmatpush1.bf16.msra.mxu0 %v1655_v48 }
 0x2be   : > { %1658 = vmatprep.subr.bf16.mxu0 %v1657_v50 }
 0x2bf   : > { %1720 = vmatpush1.bf16.msra.mxu1 %v1719_v49 }
 0x2c0   : > { %1722 = vmatprep.subr.bf16.mxu1 %v1721_v54 }
 0x2c1   : > { %1660 = vmatpush1.bf16.msra.mxu0 %v1659_v61 }
 0x2c2   : > { %1662 = vmatprep.subr.bf16.mxu0 %v1661_v0 }
 0x2c3   : > { %1724 = vmatpush1.bf16.msra.mxu1 %v1723_v63 }
 0x2c4   : > { %1726 = vmatprep.subr.bf16.mxu1 %v1725_v3 }
 0x2c5   : > { %1664 = vmatpush1.bf16.msra.mxu0 %v1663_v7 }
 0x2c7   : > { %1728 = vmatpush1.bf16.msra.mxu1 %v1727_v8 }
 0x2c8   : > { %1255 = vmatmul.mubr.f32.vlgmr.msra.gmra.mrb[0].mxu0 %v1038_v9 }
 0x2ca   : > { %1326 = vmatmul.mubr.f32.vlgmr.msra.gmra.mrb[0].mxu1 %v1038_v9 }
 0x39b   : > { %v1256_v17 = vpop.f32.mrb[0].mxu0 }
 0x39c   : > { %v1257_v18 = vadd.f32 %v1256_v17, %v1173_v13  ;;  %v1258_v20 = vpop.f32.mrb[1].mxu0 }
 0x39d   : > { %v1327_v19 = vpop.f32.mrb[0].mxu1  ;;  %v1259_v22 = vadd.f32 %v1258_v20, %v1177_v15 }
 0x39e   : > { %v1328_v21 = vadd.f32 %v1327_v19, %v1181_v14  ;;  %v1329_v23 = vpop.f32.mrb[1].mxu1  ;;  %1332 = vst [vmem:[%s2787_s7] sm:$0xff] %v1257_v18 }
 0x39f   : > { %v1330_v24 = vadd.f32 %v1329_v23, %v1185_v16  ;;  %1333 = vst [vmem:[%s2787_s7 + $0x8] sm:$0xff] %v1259_v22 }
 0x3a0   : > { %1334 = vst [vmem:[%s2787_s7 + $0x10] sm:$0xff] %v1328_v21 }
 0x3a1   : > { %1335 = vst [vmem:[%s2787_s7 + $0x18] sm:$0xff] %v1330_v24 }
 0x3a2 PF: > { %p14_p12 = scmp.ge.s32.totalorder %s1842_s28, 6   ;;  %s2788_s24 = smov %s1776_s25 }
 0x3a3   : > { %s2789_s25 = smov %s1851_s8  ;;  %s2790_s26 = smov %s1842_s28 }
 0x3a4   :  { %16 = sbr.rel (!%p14_p12) target bundleno = 2 (0x2), region = 116 }

</bundles_post_ra>
